<compile_context>
chip_gen: v5e
topology: v5e:2x2
jax: 0.10.0
libtpu: 0.0.40
codegen_flags: <defaults>
</compile_context>

<pallas_src>
import jax
import jax.numpy as jnp
from jax.experimental import pallas as pl
from jax.experimental.pallas import tpu as pltpu

# ---------------- config ----------------
B = 2               # per-tower batch
TWO_B = 2 * B       # both Siamese towers stacked (shared weights)
S = 8               # sequence length
D = 64              # d_model
H = 4               # attention heads
DH = D // H         # d_kv per head
DFF = 128           # feed-forward dim
N_LAYERS = 2
VOCAB = 100
FLAT = S * D        # 512 -> matches nn.Linear(512, 512) / nn.Linear(512, 1)
M = TWO_B * S       # total token rows through the encoder (32)
EPS = 1e-6
REL_BUCKETS = 32
REL_MAX_DIST = 128
CDT = jnp.bfloat16  # MXU operand dtype (weights stored bf16; accumulation & VPU math stay f32)

# advisory cost estimate for XLA's scheduler
_EST_FLOPS = int(
    N_LAYERS * (2 * 3 * H * M * D * DH            # head-major QKV projection
                + 2 * (H * TWO_B) * S * S * DH * 2  # scores + attn@v
                + 2 * H * M * DH * D              # output projection
                + 2 * 2 * M * D * DFF)            # feed-forward (2 matmuls)
    + 2 * TWO_B * S * D * FLAT)                   # fused Linear(512, 512)
_EST_TRANS = int(N_LAYERS * (H * TWO_B) * S * S + TWO_B * FLAT + (2 * N_LAYERS + 1) * M)
_EST_BYTES = int(
    M * D * 4 + (H * TWO_B) * S * S * 4 + (2 * N_LAYERS + 1) * D * 4 + FLAT * 4
    + N_LAYERS * (3 * H * D * DH + D * D + 2 * D * DFF) * 2
    + S * D * FLAT * 2 + TWO_B * FLAT * 4)


# ---------------- fused Pallas kernel: full encoder stack + head ----------------
def _fused_forward_kernel(x_ref, bias_ref, ln1_ref, ln2_ref, fln_ref,
                          wqkv_ref, wo_ref, wi_ref, wof_ref, lb_ref,
                          lw_hbm_ref, o_ref, lw_vmem, lw_sem):
    # (1) Kick off the big Linear(512,512) weight DMA immediately; it is only waited on right
    #     before the final matmul, so it is fully hidden behind the encoder compute.
    lw_copy = pltpu.make_async_copy(lw_hbm_ref, lw_vmem, lw_sem)
    lw_copy.start()

    x = x_ref[...]                         # [M, D] f32 activations, VMEM/vreg resident throughout
    bias = bias_ref[...]                   # [H*2B, S, S] f32 relative-position bias (pre-expanded)

    def rmsnorm(v, w):                     # T5LayerNorm: no mean subtraction, no bias; w: [1, D]
        var = jnp.mean(v * v, axis=-1, keepdims=True)
        return v * jax.lax.rsqrt(var + EPS) * w

    for l in range(N_LAYERS):              # static unroll over layers
        # ----- self-attention sublayer (pre-RMSNorm, residual) -----
        h = rmsnorm(x, ln1_ref[l:l + 1, :])                                   # [M, D] f32
        # (4) Head-major QKV: one batched MXU einsum over the 3H weight slices; head index lands
        #     on a leading tile-group dim -> no lane slicing afterwards.
        hb = jnp.broadcast_to(h.astype(CDT), (3 * H, M, D))
        qkv = jnp.einsum('nmd,ndk->nmk', hb, wqkv_ref[l],
                         preferred_element_type=jnp.float32)                  # [3H, M, DH]
        q = qkv[0:H].reshape(H * TWO_B, S, DH).astype(CDT)
        k = qkv[H:2 * H].reshape(H * TWO_B, S, DH).astype(CDT)
        v = qkv[2 * H:3 * H].reshape(H * TWO_B, S, DH).astype(CDT)
        # T5 attention: no 1/sqrt(d_head) scaling; additive relative-position bias.
        scores = jnp.einsum('nqd,nkd->nqk', q, k,
                            preferred_element_type=jnp.float32) + bias        # [H*2B, S, S]
        # single batched softmax over all heads/batches (f32 VPU/EUP math)
        scores = scores - jnp.max(scores, axis=-1, keepdims=True)
        p = jnp.exp(scores)
        p = p * pl.reciprocal(jnp.sum(p, axis=-1, keepdims=True), approx=True)
        attn = jnp.einsum('nqk,nkd->nqd', p.astype(CDT), v,
                          preferred_element_type=jnp.float32)                 # [H*2B, S, DH]
        attn4 = attn.reshape(H, M, DH)
        # (3) Output projection without a lane-dim head concat: accumulate per-head partial
        #     matmuls against the matching sublane row-block of Wo (same math, MXU only).
        wo_l = wo_ref[l]                                                      # [D, D] bf16
        proj = jnp.zeros((M, D), jnp.float32)
        for hh in range(H):
            proj = proj + jnp.dot(attn4[hh].astype(CDT),
                                  wo_l[hh * DH:(hh + 1) * DH, :],
                                  preferred_element_type=jnp.float32)
        x = x + proj
        # ----- feed-forward sublayer (ReLU, residual) -----
        h = rmsnorm(x, ln2_ref[l:l + 1, :])
        g = jnp.dot(h.astype(CDT), wi_ref[l], preferred_element_type=jnp.float32)
        g = jnp.maximum(g, 0.0)
        x = x + jnp.dot(g.astype(CDT), wof_ref[l], preferred_element_type=jnp.float32)

    # ----- final RMSNorm + x.view(B, -1) + Linear(512, 512) + Sigmoid -----
    x = rmsnorm(x, fln_ref[...])                                              # [M, D] f32
    x3 = x.reshape(TWO_B, S, D)
    # (2) Flatten-free Linear: liner_w pre-reshaped host-side to [S, D, 512], so
    #     y[b] = sum_s x3[b, s, :] @ lw3[s] -- pure MXU work, no lane relayout.
    lw_copy.wait()                                                            # DMA now hidden
    y = jnp.zeros((TWO_B, FLAT), jnp.float32)
    for si in range(S):
        y = y + jnp.dot(x3[:, si, :].astype(CDT), lw_vmem[si],
                        preferred_element_type=jnp.float32)
    o_ref[...] = jax.nn.sigmoid(y + lb_ref[...])                              # [2B, 512] lane-dense


def fused_forward(x_emb, bias_full, params):
    vmem = pl.BlockSpec(memory_space=pltpu.MemorySpace.VMEM)
    return pl.pallas_call(
        _fused_forward_kernel,
        out_shape=jax.ShapeDtypeStruct((TWO_B, FLAT), jnp.float32),
        in_specs=[vmem] * 10 + [pl.BlockSpec(memory_space=pl.ANY)],   # liner_w stays in HBM
        out_specs=vmem,
        scratch_shapes=[pltpu.VMEM((S, D, FLAT), jnp.bfloat16),       # manual DMA landing buffer
                        pltpu.SemaphoreType.DMA(())],
        cost_estimate=pl.CostEstimate(flops=_EST_FLOPS,
                                      transcendentals=_EST_TRANS,
                                      bytes_accessed=_EST_BYTES),
    )(x_emb, bias_full,
      params["ln1"], params["ln2"], params["final_ln"],
      params["wqkv"], params["wo"], params["wi"], params["wo_ff"],
      params["liner_b"], params["liner_w3"])


# ---------------- JAX glue: T5 relative position bias (computed once, shared) ----------------
def _relative_position_bucket(rel_pos, num_buckets=REL_BUCKETS, max_distance=REL_MAX_DIST):
    num_buckets //= 2  # bidirectional
    ret = (rel_pos > 0).astype(jnp.int32) * num_buckets
    n = jnp.abs(rel_pos)
    max_exact = num_buckets // 2
    is_small = n < max_exact
    scaled = jnp.log(jnp.maximum(n, 1).astype(jnp.float32) / max_exact) / jnp.log(
        max_distance / max_exact)
    val_if_large = max_exact + (scaled * (num_buckets - max_exact)).astype(jnp.int32)
    val_if_large = jnp.minimum(val_if_large, num_buckets - 1)
    return ret + jnp.where(is_small, n, val_if_large)


def compute_position_bias(rel_emb):  # rel_emb: [REL_BUCKETS, H] -> [H*2B, S, S]
    ctx = jnp.arange(S)[:, None]
    mem = jnp.arange(S)[None, :]
    buckets = _relative_position_bucket(mem - ctx)   # [S, S]
    bias = jnp.transpose(rel_emb[buckets], (2, 0, 1))  # [H, S, S]
    # expand per tower/batch so the kernel's single batched softmax can add it directly
    return jnp.broadcast_to(bias[:, None], (H, TWO_B, S, S)).reshape(H * TWO_B, S, S)


# ---------------- parameters (deterministic synthetic init) ----------------
def init_params(key):
    # TODO(synk): pretrained t5-small weights are not loaded; deterministic synthetic weights
    # with the same structure are used instead.
    ks = iter(jax.random.split(key, 8 + 6 * N_LAYERS))

    def nrm(shape, scale=0.05):
        return scale * jax.random.normal(next(ks), shape, jnp.float32)

    wqkv, wo, wi, wo_ff = [], [], [], []
    for _ in range(N_LAYERS):
        # Wq|Wk|Wv restructured head-major: [3H, D, DH] so the per-head split in the kernel is a
        # leading-dim index, not a lane slice.
        w_q, w_k, w_v = nrm((D, D)), nrm((D, D)), nrm((D, D))
        heads = [w.reshape(D, H, DH).transpose(1, 0, 2) for w in (w_q, w_k, w_v)]  # 3 x [H, D, DH]
        wqkv.append(jnp.concatenate(heads, axis=0))
        wo.append(nrm((D, D)))
        wi.append(nrm((D, DFF)))
        wo_ff.append(nrm((DFF, D)))

    liner_w = nrm((FLAT, FLAT))   # self.liner = Linear(512, 512) (+ Sigmoid), x @ W layout
    return {
        "embed": nrm((VOCAB, D), 1.0),
        "rel_bias": nrm((REL_BUCKETS, H)),
        "ln1": jnp.ones((N_LAYERS, D), jnp.float32),
        "ln2": jnp.ones((N_LAYERS, D), jnp.float32),
        "final_ln": jnp.ones((1, D), jnp.float32),
        "wqkv": jnp.stack(wqkv).astype(CDT),     # [L, 3H, D, DH]  bf16, head-major
        "wo": jnp.stack(wo).astype(CDT),         # [L, D, D]       bf16
        "wi": jnp.stack(wi).astype(CDT),         # [L, D, DFF]     bf16
        "wo_ff": jnp.stack(wo_ff).astype(CDT),   # [L, DFF, D]     bf16
        # pre-reshaped to [S, D, 512] for the flatten-free head; bf16 halves its HBM traffic
        "liner_w3": liner_w.reshape(S, D, FLAT).astype(CDT),
        "liner_b": nrm((1, FLAT)),
        "out_w": nrm((FLAT, 1)),   # self.out = Linear(512, 1): result is discarded by forward
        "out_b": nrm((1,)),
    }


# ---------------- forward ----------------
def forward(x1, x2, params):
    # TODO(synk): dropout omitted (inference/eval semantics); embedding gather + position-bias
    # lookup kept as tiny XLA glue (no clean/robust in-kernel gather at this size).
    tokens = jnp.concatenate([x1, x2], axis=0)                        # [2B, S] both towers stacked
    x_emb = jnp.take(params["embed"], tokens, axis=0).reshape(M, D)   # [M, D]
    bias_full = compute_position_bias(params["rel_bias"])             # [H*2B, S, S]
    y = fused_forward(x_emb, bias_full, params)                       # [2B, 512]
    out1, out2 = y[:B], y[B:]
    # NOTE: the original forward computes self.out(|out1 - out2|) and discards it; it does not
    # affect the returned (out1, out2), so that dead (lane-width-1) branch is omitted.
    return out1, out2


if __name__ == "__main__":
    key = jax.random.PRNGKey(0)
    pkey, k1, k2 = jax.random.split(key, 3)
    params = init_params(pkey)
    x1 = jax.random.randint(k1, (B, S), 0, VOCAB, dtype=jnp.int32)
    x2 = jax.random.randint(k2, (B, S), 0, VOCAB, dtype=jnp.int32)
    out1, out2 = jax.jit(forward)(x1, x2, params)
    jax.block_until_ready((out1, out2))
    assert out1.shape == (B, FLAT) and out2.shape == (B, FLAT)
    assert bool(jnp.all(jnp.isfinite(out1))) and bool(jnp.all(jnp.isfinite(out2)))
    assert bool(jnp.all((out1 >= 0) & (out1 <= 1)))  # sigmoid range
    print("KERNEL_OK")
</pallas_src>

<mosaic_0001>
module attributes {stable_mosaic.version = 11 : i64} {
  func.func @_fused_forward_kernel(%arg0: memref<32x64xf32, #tpu.memory_space<vmem>>, %arg1: memref<16x8x8xf32, #tpu.memory_space<vmem>>, %arg2: memref<2x64xf32, #tpu.memory_space<vmem>>, %arg3: memref<2x64xf32, #tpu.memory_space<vmem>>, %arg4: memref<1x64xf32, #tpu.memory_space<vmem>>, %arg5: memref<2x12x64x16xbf16, #tpu.memory_space<vmem>>, %arg6: memref<2x64x64xbf16, #tpu.memory_space<vmem>>, %arg7: memref<2x64x128xbf16, #tpu.memory_space<vmem>>, %arg8: memref<2x128x64xbf16, #tpu.memory_space<vmem>>, %arg9: memref<1x512xf32, #tpu.memory_space<vmem>>, %arg10: memref<8x64x512xbf16, #tpu.memory_space<any>>, %arg11: memref<4x512xf32, #tpu.memory_space<vmem>>, %arg12: memref<8x64x512xbf16, #tpu.memory_space<vmem>>, %arg13: memref<!tpu.dma_semaphore, #tpu.memory_space<semaphore_mem>>) attributes {dimension_semantics = [], scalar_prefetch = 0 : i64, scratch_operands = 2 : i64, tpu.core_type = #tpu.core_type<tc>} {
    tpu.enqueue_dma source(%arg10 : memref<8x64x512xbf16, #tpu.memory_space<any>>) target(%arg12 : memref<8x64x512xbf16, #tpu.memory_space<vmem>>) target_semaphore(%arg13 : memref<!tpu.dma_semaphore, #tpu.memory_space<semaphore_mem>>)
    %c0 = arith.constant 0 : index
    %c0_0 = arith.constant 0 : index
    %0 = vector.load %arg0[%c0, %c0_0] : memref<32x64xf32, #tpu.memory_space<vmem>>, vector<32x64xf32>
    %c0_1 = arith.constant 0 : index
    %c0_2 = arith.constant 0 : index
    %c0_3 = arith.constant 0 : index
    %1 = vector.load %arg1[%c0_1, %c0_2, %c0_3] : memref<16x8x8xf32, #tpu.memory_space<vmem>>, vector<16x8x8xf32>
    %c0_4 = arith.constant 0 : index
    %c0_5 = arith.constant 0 : index
    %2 = vector.load %arg2[%c0_4, %c0_5] : memref<2x64xf32, #tpu.memory_space<vmem>>, vector<1x64xf32>
    %3 = arith.mulf %0, %0 : vector<32x64xf32>
    %cst = arith.constant dense<0.000000e+00> : vector<32xf32>
    %4 = vector.multi_reduction <add>, %3, %cst [1] : vector<32x64xf32> to vector<32xf32>
    %5 = vector.shape_cast %4 : vector<32xf32> to vector<32x1xf32>
    %cst_6 = arith.constant 6.400000e+01 : f32
    %6 = vector.broadcast %cst_6 : f32 to vector<32x1xf32>
    %7 = arith.divf %5, %6 : vector<32x1xf32>
    %cst_7 = arith.constant 9.99999997E-7 : f32
    %8 = vector.broadcast %cst_7 : f32 to vector<32x1xf32>
    %9 = arith.addf %7, %8 : vector<32x1xf32>
    %10 = math.rsqrt %9 : vector<32x1xf32>
    %11 = vector.broadcast %10 : vector<32x1xf32> to vector<32x64xf32>
    %12 = arith.mulf %0, %11 : vector<32x64xf32>
    %13 = vector.broadcast %2 : vector<1x64xf32> to vector<32x64xf32>
    %14 = arith.mulf %12, %13 : vector<32x64xf32>
    %15 = arith.truncf %14 : vector<32x64xf32> to vector<32x64xbf16>
    %16 = vector.shape_cast %15 : vector<32x64xbf16> to vector<1x32x64xbf16>
    %17 = vector.broadcast %16 : vector<1x32x64xbf16> to vector<12x32x64xbf16>
    %c0_8 = arith.constant 0 : index
    %c0_9 = arith.constant 0 : index
    %c0_10 = arith.constant 0 : index
    %c0_11 = arith.constant 0 : index
    %18 = vector.load %arg5[%c0_8, %c0_9, %c0_10, %c0_11] : memref<2x12x64x16xbf16, #tpu.memory_space<vmem>>, vector<1x12x64x16xbf16>
    %19 = vector.shape_cast %18 : vector<1x12x64x16xbf16> to vector<12x64x16xbf16>
    "tpu.trace_start"() <{level = 10 : i32, message = "nmd,ndk->nmk"}> : () -> ()
    %cst_12 = arith.constant dense<0.000000e+00> : vector<12x32x16xf32>
    %20 = tpu.matmul %17, %19, %cst_12 {dimension_numbers = #tpu.dot_dimension_numbers<[2], [1], [1], [2], [0, 0, 0, 1, 1, 2], [0], [0]>} : vector<12x32x64xbf16>, vector<12x64x16xbf16>, vector<12x32x16xf32> -> vector<12x32x16xf32>
    "tpu.trace_stop"() : () -> ()
    %21 = vector.extract_strided_slice %20 {offsets = [0, 0, 0], sizes = [4, 32, 16], strides = [1, 1, 1]} : vector<12x32x16xf32> to vector<4x32x16xf32>
    %22 = vector.shape_cast %21 : vector<4x32x16xf32> to vector<16x8x16xf32>
    %23 = arith.truncf %22 : vector<16x8x16xf32> to vector<16x8x16xbf16>
    %24 = vector.extract_strided_slice %20 {offsets = [4, 0, 0], sizes = [4, 32, 16], strides = [1, 1, 1]} : vector<12x32x16xf32> to vector<4x32x16xf32>
    %25 = vector.shape_cast %24 : vector<4x32x16xf32> to vector<16x8x16xf32>
    %26 = arith.truncf %25 : vector<16x8x16xf32> to vector<16x8x16xbf16>
    %27 = vector.extract_strided_slice %20 {offsets = [8, 0, 0], sizes = [4, 32, 16], strides = [1, 1, 1]} : vector<12x32x16xf32> to vector<4x32x16xf32>
    %28 = vector.shape_cast %27 : vector<4x32x16xf32> to vector<16x8x16xf32>
    %29 = arith.truncf %28 : vector<16x8x16xf32> to vector<16x8x16xbf16>
    "tpu.trace_start"() <{level = 10 : i32, message = "nqd,nkd->nqk"}> : () -> ()
    %cst_13 = arith.constant dense<0.000000e+00> : vector<16x8x8xf32>
    %30 = tpu.matmul %23, %26, %cst_13 {dimension_numbers = #tpu.dot_dimension_numbers<[2], [2], [1], [1], [0, 0, 0, 1, 1, 1], [0], [0]>} : vector<16x8x16xbf16>, vector<16x8x16xbf16>, vector<16x8x8xf32> -> vector<16x8x8xf32>
    "tpu.trace_stop"() : () -> ()
    %31 = arith.addf %30, %1 : vector<16x8x8xf32>
    %cst_14 = arith.constant dense<0xFF800000> : vector<16x8xf32>
    %32 = vector.multi_reduction <maximumf>, %31, %cst_14 [2] : vector<16x8x8xf32> to vector<16x8xf32>
    %33 = vector.shape_cast %32 : vector<16x8xf32> to vector<16x8x1xf32>
    %34 = vector.broadcast %33 : vector<16x8x1xf32> to vector<16x8x8xf32>
    %35 = arith.subf %31, %34 : vector<16x8x8xf32>
    %36 = math.exp %35 : vector<16x8x8xf32>
    %cst_15 = arith.constant dense<0.000000e+00> : vector<16x8xf32>
    %37 = vector.multi_reduction <add>, %36, %cst_15 [2] : vector<16x8x8xf32> to vector<16x8xf32>
    %38 = vector.shape_cast %37 : vector<16x8xf32> to vector<16x8x1xf32>
    %39 = tpu.reciprocal %38 {approx = true} : vector<16x8x1xf32> -> vector<16x8x1xf32>
    %40 = vector.broadcast %39 : vector<16x8x1xf32> to vector<16x8x8xf32>
    %41 = arith.mulf %36, %40 : vector<16x8x8xf32>
    %42 = arith.truncf %41 : vector<16x8x8xf32> to vector<16x8x8xbf16>
    "tpu.trace_start"() <{level = 10 : i32, message = "nqk,nkd->nqd"}> : () -> ()
    %cst_16 = arith.constant dense<0.000000e+00> : vector<16x8x16xf32>
    %43 = tpu.matmul %42, %29, %cst_16 {dimension_numbers = #tpu.dot_dimension_numbers<[2], [1], [1], [2], [0, 0, 0, 1, 1, 2], [0], [0]>} : vector<16x8x8xbf16>, vector<16x8x16xbf16>, vector<16x8x16xf32> -> vector<16x8x16xf32>
    "tpu.trace_stop"() : () -> ()
    %44 = vector.shape_cast %43 : vector<16x8x16xf32> to vector<4x32x16xf32>
    %c0_17 = arith.constant 0 : index
    %c0_18 = arith.constant 0 : index
    %c0_19 = arith.constant 0 : index
    %45 = vector.load %arg6[%c0_17, %c0_18, %c0_19] : memref<2x64x64xbf16, #tpu.memory_space<vmem>>, vector<1x64x64xbf16>
    %46 = vector.shape_cast %45 : vector<1x64x64xbf16> to vector<64x64xbf16>
    %cst_20 = arith.constant 0.000000e+00 : f32
    %47 = vector.broadcast %cst_20 : f32 to vector<32x64xf32>
    %48 = vector.extract_strided_slice %44 {offsets = [0, 0, 0], sizes = [1, 32, 16], strides = [1, 1, 1]} : vector<4x32x16xf32> to vector<1x32x16xf32>
    %49 = vector.shape_cast %48 : vector<1x32x16xf32> to vector<32x16xf32>
    %50 = arith.truncf %49 : vector<32x16xf32> to vector<32x16xbf16>
    %51 = vector.extract_strided_slice %46 {offsets = [0, 0], sizes = [16, 64], strides = [1, 1]} : vector<64x64xbf16> to vector<16x64xbf16>
    %cst_21 = arith.constant dense<0.000000e+00> : vector<32x64xf32>
    %52 = tpu.matmul %50, %51, %cst_21 {dimension_numbers = #tpu.dot_dimension_numbers<[1], [0], [0], [1], [0, 0, 1, 1], [], []>} : vector<32x16xbf16>, vector<16x64xbf16>, vector<32x64xf32> -> vector<32x64xf32>
    %53 = arith.addf %47, %52 : vector<32x64xf32>
    %54 = vector.extract_strided_slice %44 {offsets = [1, 0, 0], sizes = [1, 32, 16], strides = [1, 1, 1]} : vector<4x32x16xf32> to vector<1x32x16xf32>
    %55 = vector.shape_cast %54 : vector<1x32x16xf32> to vector<32x16xf32>
    %56 = arith.truncf %55 : vector<32x16xf32> to vector<32x16xbf16>
    %57 = vector.extract_strided_slice %46 {offsets = [16, 0], sizes = [16, 64], strides = [1, 1]} : vector<64x64xbf16> to vector<16x64xbf16>
    %cst_22 = arith.constant dense<0.000000e+00> : vector<32x64xf32>
    %58 = tpu.matmul %56, %57, %cst_22 {dimension_numbers = #tpu.dot_dimension_numbers<[1], [0], [0], [1], [0, 0, 1, 1], [], []>} : vector<32x16xbf16>, vector<16x64xbf16>, vector<32x64xf32> -> vector<32x64xf32>
    %59 = arith.addf %53, %58 : vector<32x64xf32>
    %60 = vector.extract_strided_slice %44 {offsets = [2, 0, 0], sizes = [1, 32, 16], strides = [1, 1, 1]} : vector<4x32x16xf32> to vector<1x32x16xf32>
    %61 = vector.shape_cast %60 : vector<1x32x16xf32> to vector<32x16xf32>
    %62 = arith.truncf %61 : vector<32x16xf32> to vector<32x16xbf16>
    %63 = vector.extract_strided_slice %46 {offsets = [32, 0], sizes = [16, 64], strides = [1, 1]} : vector<64x64xbf16> to vector<16x64xbf16>
    %cst_23 = arith.constant dense<0.000000e+00> : vector<32x64xf32>
    %64 = tpu.matmul %62, %63, %cst_23 {dimension_numbers = #tpu.dot_dimension_numbers<[1], [0], [0], [1], [0, 0, 1, 1], [], []>} : vector<32x16xbf16>, vector<16x64xbf16>, vector<32x64xf32> -> vector<32x64xf32>
    %65 = arith.addf %59, %64 : vector<32x64xf32>
    %66 = vector.extract_strided_slice %44 {offsets = [3, 0, 0], sizes = [1, 32, 16], strides = [1, 1, 1]} : vector<4x32x16xf32> to vector<1x32x16xf32>
    %67 = vector.shape_cast %66 : vector<1x32x16xf32> to vector<32x16xf32>
    %68 = arith.truncf %67 : vector<32x16xf32> to vector<32x16xbf16>
    %69 = vector.extract_strided_slice %46 {offsets = [48, 0], sizes = [16, 64], strides = [1, 1]} : vector<64x64xbf16> to vector<16x64xbf16>
    %cst_24 = arith.constant dense<0.000000e+00> : vector<32x64xf32>
    %70 = tpu.matmul %68, %69, %cst_24 {dimension_numbers = #tpu.dot_dimension_numbers<[1], [0], [0], [1], [0, 0, 1, 1], [], []>} : vector<32x16xbf16>, vector<16x64xbf16>, vector<32x64xf32> -> vector<32x64xf32>
    %71 = arith.addf %65, %70 : vector<32x64xf32>
    %72 = arith.addf %0, %71 : vector<32x64xf32>
    %c0_25 = arith.constant 0 : index
    %c0_26 = arith.constant 0 : index
    %73 = vector.load %arg3[%c0_25, %c0_26] : memref<2x64xf32, #tpu.memory_space<vmem>>, vector<1x64xf32>
    %74 = arith.mulf %72, %72 : vector<32x64xf32>
    %cst_27 = arith.constant dense<0.000000e+00> : vector<32xf32>
    %75 = vector.multi_reduction <add>, %74, %cst_27 [1] : vector<32x64xf32> to vector<32xf32>
    %76 = vector.shape_cast %75 : vector<32xf32> to vector<32x1xf32>
    %cst_28 = arith.constant 6.400000e+01 : f32
    %77 = vector.broadcast %cst_28 : f32 to vector<32x1xf32>
    %78 = arith.divf %76, %77 : vector<32x1xf32>
    %cst_29 = arith.constant 9.99999997E-7 : f32
    %79 = vector.broadcast %cst_29 : f32 to vector<32x1xf32>
    %80 = arith.addf %78, %79 : vector<32x1xf32>
    %81 = math.rsqrt %80 : vector<32x1xf32>
    %82 = vector.broadcast %81 : vector<32x1xf32> to vector<32x64xf32>
    %83 = arith.mulf %72, %82 : vector<32x64xf32>
    %84 = vector.broadcast %73 : vector<1x64xf32> to vector<32x64xf32>
    %85 = arith.mulf %83, %84 : vector<32x64xf32>
    %86 = arith.truncf %85 : vector<32x64xf32> to vector<32x64xbf16>
    %c0_30 = arith.constant 0 : index
    %c0_31 = arith.constant 0 : index
    %c0_32 = arith.constant 0 : index
    %87 = vector.load %arg7[%c0_30, %c0_31, %c0_32] : memref<2x64x128xbf16, #tpu.memory_space<vmem>>, vector<1x64x128xbf16>
    %88 = vector.shape_cast %87 : vector<1x64x128xbf16> to vector<64x128xbf16>
    %cst_33 = arith.constant dense<0.000000e+00> : vector<32x128xf32>
    %89 = tpu.matmul %86, %88, %cst_33 {dimension_numbers = #tpu.dot_dimension_numbers<[1], [0], [0], [1], [0, 0, 1, 1], [], []>} : vector<32x64xbf16>, vector<64x128xbf16>, vector<32x128xf32> -> vector<32x128xf32>
    %cst_34 = arith.constant 0.000000e+00 : f32
    %90 = vector.broadcast %cst_34 : f32 to vector<32x128xf32>
    %91 = arith.maximumf %89, %90 : vector<32x128xf32>
    %92 = arith.truncf %91 : vector<32x128xf32> to vector<32x128xbf16>
    %c0_35 = arith.constant 0 : index
    %c0_36 = arith.constant 0 : index
    %c0_37 = arith.constant 0 : index
    %93 = vector.load %arg8[%c0_35, %c0_36, %c0_37] : memref<2x128x64xbf16, #tpu.memory_space<vmem>>, vector<1x128x64xbf16>
    %94 = vector.shape_cast %93 : vector<1x128x64xbf16> to vector<128x64xbf16>
    %cst_38 = arith.constant dense<0.000000e+00> : vector<32x64xf32>
    %95 = tpu.matmul %92, %94, %cst_38 {dimension_numbers = #tpu.dot_dimension_numbers<[1], [0], [0], [1], [0, 0, 1, 1], [], []>} : vector<32x128xbf16>, vector<128x64xbf16>, vector<32x64xf32> -> vector<32x64xf32>
    %96 = arith.addf %72, %95 : vector<32x64xf32>
    %c1 = arith.constant 1 : index
    %c0_39 = arith.constant 0 : index
    %97 = vector.load %arg2[%c1, %c0_39] : memref<2x64xf32, #tpu.memory_space<vmem>>, vector<1x64xf32>
    %98 = arith.mulf %96, %96 : vector<32x64xf32>
    %cst_40 = arith.constant dense<0.000000e+00> : vector<32xf32>
    %99 = vector.multi_reduction <add>, %98, %cst_40 [1] : vector<32x64xf32> to vector<32xf32>
    %100 = vector.shape_cast %99 : vector<32xf32> to vector<32x1xf32>
    %cst_41 = arith.constant 6.400000e+01 : f32
    %101 = vector.broadcast %cst_41 : f32 to vector<32x1xf32>
    %102 = arith.divf %100, %101 : vector<32x1xf32>
    %cst_42 = arith.constant 9.99999997E-7 : f32
    %103 = vector.broadcast %cst_42 : f32 to vector<32x1xf32>
    %104 = arith.addf %102, %103 : vector<32x1xf32>
    %105 = math.rsqrt %104 : vector<32x1xf32>
    %106 = vector.broadcast %105 : vector<32x1xf32> to vector<32x64xf32>
    %107 = arith.mulf %96, %106 : vector<32x64xf32>
    %108 = vector.broadcast %97 : vector<1x64xf32> to vector<32x64xf32>
    %109 = arith.mulf %107, %108 : vector<32x64xf32>
    %110 = arith.truncf %109 : vector<32x64xf32> to vector<32x64xbf16>
    %111 = vector.shape_cast %110 : vector<32x64xbf16> to vector<1x32x64xbf16>
    %112 = vector.broadcast %111 : vector<1x32x64xbf16> to vector<12x32x64xbf16>
    %c1_43 = arith.constant 1 : index
    %c0_44 = arith.constant 0 : index
    %c0_45 = arith.constant 0 : index
    %c0_46 = arith.constant 0 : index
    %113 = vector.load %arg5[%c1_43, %c0_44, %c0_45, %c0_46] : memref<2x12x64x16xbf16, #tpu.memory_space<vmem>>, vector<1x12x64x16xbf16>
    %114 = vector.shape_cast %113 : vector<1x12x64x16xbf16> to vector<12x64x16xbf16>
    "tpu.trace_start"() <{level = 10 : i32, message = "nmd,ndk->nmk"}> : () -> ()
    %cst_47 = arith.constant dense<0.000000e+00> : vector<12x32x16xf32>
    %115 = tpu.matmul %112, %114, %cst_47 {dimension_numbers = #tpu.dot_dimension_numbers<[2], [1], [1], [2], [0, 0, 0, 1, 1, 2], [0], [0]>} : vector<12x32x64xbf16>, vector<12x64x16xbf16>, vector<12x32x16xf32> -> vector<12x32x16xf32>
    "tpu.trace_stop"() : () -> ()
    %116 = vector.extract_strided_slice %115 {offsets = [0, 0, 0], sizes = [4, 32, 16], strides = [1, 1, 1]} : vector<12x32x16xf32> to vector<4x32x16xf32>
    %117 = vector.shape_cast %116 : vector<4x32x16xf32> to vector<16x8x16xf32>
    %118 = arith.truncf %117 : vector<16x8x16xf32> to vector<16x8x16xbf16>
    %119 = vector.extract_strided_slice %115 {offsets = [4, 0, 0], sizes = [4, 32, 16], strides = [1, 1, 1]} : vector<12x32x16xf32> to vector<4x32x16xf32>
    %120 = vector.shape_cast %119 : vector<4x32x16xf32> to vector<16x8x16xf32>
    %121 = arith.truncf %120 : vector<16x8x16xf32> to vector<16x8x16xbf16>
    %122 = vector.extract_strided_slice %115 {offsets = [8, 0, 0], sizes = [4, 32, 16], strides = [1, 1, 1]} : vector<12x32x16xf32> to vector<4x32x16xf32>
    %123 = vector.shape_cast %122 : vector<4x32x16xf32> to vector<16x8x16xf32>
    %124 = arith.truncf %123 : vector<16x8x16xf32> to vector<16x8x16xbf16>
    "tpu.trace_start"() <{level = 10 : i32, message = "nqd,nkd->nqk"}> : () -> ()
    %cst_48 = arith.constant dense<0.000000e+00> : vector<16x8x8xf32>
    %125 = tpu.matmul %118, %121, %cst_48 {dimension_numbers = #tpu.dot_dimension_numbers<[2], [2], [1], [1], [0, 0, 0, 1, 1, 1], [0], [0]>} : vector<16x8x16xbf16>, vector<16x8x16xbf16>, vector<16x8x8xf32> -> vector<16x8x8xf32>
    "tpu.trace_stop"() : () -> ()
    %126 = arith.addf %125, %1 : vector<16x8x8xf32>
    %cst_49 = arith.constant dense<0xFF800000> : vector<16x8xf32>
    %127 = vector.multi_reduction <maximumf>, %126, %cst_49 [2] : vector<16x8x8xf32> to vector<16x8xf32>
    %128 = vector.shape_cast %127 : vector<16x8xf32> to vector<16x8x1xf32>
    %129 = vector.broadcast %128 : vector<16x8x1xf32> to vector<16x8x8xf32>
    %130 = arith.subf %126, %129 : vector<16x8x8xf32>
    %131 = math.exp %130 : vector<16x8x8xf32>
    %cst_50 = arith.constant dense<0.000000e+00> : vector<16x8xf32>
    %132 = vector.multi_reduction <add>, %131, %cst_50 [2] : vector<16x8x8xf32> to vector<16x8xf32>
    %133 = vector.shape_cast %132 : vector<16x8xf32> to vector<16x8x1xf32>
    %134 = tpu.reciprocal %133 {approx = true} : vector<16x8x1xf32> -> vector<16x8x1xf32>
    %135 = vector.broadcast %134 : vector<16x8x1xf32> to vector<16x8x8xf32>
    %136 = arith.mulf %131, %135 : vector<16x8x8xf32>
    %137 = arith.truncf %136 : vector<16x8x8xf32> to vector<16x8x8xbf16>
    "tpu.trace_start"() <{level = 10 : i32, message = "nqk,nkd->nqd"}> : () -> ()
    %cst_51 = arith.constant dense<0.000000e+00> : vector<16x8x16xf32>
    %138 = tpu.matmul %137, %124, %cst_51 {dimension_numbers = #tpu.dot_dimension_numbers<[2], [1], [1], [2], [0, 0, 0, 1, 1, 2], [0], [0]>} : vector<16x8x8xbf16>, vector<16x8x16xbf16>, vector<16x8x16xf32> -> vector<16x8x16xf32>
    "tpu.trace_stop"() : () -> ()
    %139 = vector.shape_cast %138 : vector<16x8x16xf32> to vector<4x32x16xf32>
    %c1_52 = arith.constant 1 : index
    %c0_53 = arith.constant 0 : index
    %c0_54 = arith.constant 0 : index
    %140 = vector.load %arg6[%c1_52, %c0_53, %c0_54] : memref<2x64x64xbf16, #tpu.memory_space<vmem>>, vector<1x64x64xbf16>
    %141 = vector.shape_cast %140 : vector<1x64x64xbf16> to vector<64x64xbf16>
    %cst_55 = arith.constant 0.000000e+00 : f32
    %142 = vector.broadcast %cst_55 : f32 to vector<32x64xf32>
    %143 = vector.extract_strided_slice %139 {offsets = [0, 0, 0], sizes = [1, 32, 16], strides = [1, 1, 1]} : vector<4x32x16xf32> to vector<1x32x16xf32>
    %144 = vector.shape_cast %143 : vector<1x32x16xf32> to vector<32x16xf32>
    %145 = arith.truncf %144 : vector<32x16xf32> to vector<32x16xbf16>
    %146 = vector.extract_strided_slice %141 {offsets = [0, 0], sizes = [16, 64], strides = [1, 1]} : vector<64x64xbf16> to vector<16x64xbf16>
    %cst_56 = arith.constant dense<0.000000e+00> : vector<32x64xf32>
    %147 = tpu.matmul %145, %146, %cst_56 {dimension_numbers = #tpu.dot_dimension_numbers<[1], [0], [0], [1], [0, 0, 1, 1], [], []>} : vector<32x16xbf16>, vector<16x64xbf16>, vector<32x64xf32> -> vector<32x64xf32>
    %148 = arith.addf %142, %147 : vector<32x64xf32>
    %149 = vector.extract_strided_slice %139 {offsets = [1, 0, 0], sizes = [1, 32, 16], strides = [1, 1, 1]} : vector<4x32x16xf32> to vector<1x32x16xf32>
    %150 = vector.shape_cast %149 : vector<1x32x16xf32> to vector<32x16xf32>
    %151 = arith.truncf %150 : vector<32x16xf32> to vector<32x16xbf16>
    %152 = vector.extract_strided_slice %141 {offsets = [16, 0], sizes = [16, 64], strides = [1, 1]} : vector<64x64xbf16> to vector<16x64xbf16>
    %cst_57 = arith.constant dense<0.000000e+00> : vector<32x64xf32>
    %153 = tpu.matmul %151, %152, %cst_57 {dimension_numbers = #tpu.dot_dimension_numbers<[1], [0], [0], [1], [0, 0, 1, 1], [], []>} : vector<32x16xbf16>, vector<16x64xbf16>, vector<32x64xf32> -> vector<32x64xf32>
    %154 = arith.addf %148, %153 : vector<32x64xf32>
    %155 = vector.extract_strided_slice %139 {offsets = [2, 0, 0], sizes = [1, 32, 16], strides = [1, 1, 1]} : vector<4x32x16xf32> to vector<1x32x16xf32>
    %156 = vector.shape_cast %155 : vector<1x32x16xf32> to vector<32x16xf32>
    %157 = arith.truncf %156 : vector<32x16xf32> to vector<32x16xbf16>
    %158 = vector.extract_strided_slice %141 {offsets = [32, 0], sizes = [16, 64], strides = [1, 1]} : vector<64x64xbf16> to vector<16x64xbf16>
    %cst_58 = arith.constant dense<0.000000e+00> : vector<32x64xf32>
    %159 = tpu.matmul %157, %158, %cst_58 {dimension_numbers = #tpu.dot_dimension_numbers<[1], [0], [0], [1], [0, 0, 1, 1], [], []>} : vector<32x16xbf16>, vector<16x64xbf16>, vector<32x64xf32> -> vector<32x64xf32>
    %160 = arith.addf %154, %159 : vector<32x64xf32>
    %161 = vector.extract_strided_slice %139 {offsets = [3, 0, 0], sizes = [1, 32, 16], strides = [1, 1, 1]} : vector<4x32x16xf32> to vector<1x32x16xf32>
    %162 = vector.shape_cast %161 : vector<1x32x16xf32> to vector<32x16xf32>
    %163 = arith.truncf %162 : vector<32x16xf32> to vector<32x16xbf16>
    %164 = vector.extract_strided_slice %141 {offsets = [48, 0], sizes = [16, 64], strides = [1, 1]} : vector<64x64xbf16> to vector<16x64xbf16>
    %cst_59 = arith.constant dense<0.000000e+00> : vector<32x64xf32>
    %165 = tpu.matmul %163, %164, %cst_59 {dimension_numbers = #tpu.dot_dimension_numbers<[1], [0], [0], [1], [0, 0, 1, 1], [], []>} : vector<32x16xbf16>, vector<16x64xbf16>, vector<32x64xf32> -> vector<32x64xf32>
    %166 = arith.addf %160, %165 : vector<32x64xf32>
    %167 = arith.addf %96, %166 : vector<32x64xf32>
    %c1_60 = arith.constant 1 : index
    %c0_61 = arith.constant 0 : index
    %168 = vector.load %arg3[%c1_60, %c0_61] : memref<2x64xf32, #tpu.memory_space<vmem>>, vector<1x64xf32>
    %169 = arith.mulf %167, %167 : vector<32x64xf32>
    %cst_62 = arith.constant dense<0.000000e+00> : vector<32xf32>
    %170 = vector.multi_reduction <add>, %169, %cst_62 [1] : vector<32x64xf32> to vector<32xf32>
    %171 = vector.shape_cast %170 : vector<32xf32> to vector<32x1xf32>
    %cst_63 = arith.constant 6.400000e+01 : f32
    %172 = vector.broadcast %cst_63 : f32 to vector<32x1xf32>
    %173 = arith.divf %171, %172 : vector<32x1xf32>
    %cst_64 = arith.constant 9.99999997E-7 : f32
    %174 = vector.broadcast %cst_64 : f32 to vector<32x1xf32>
    %175 = arith.addf %173, %174 : vector<32x1xf32>
    %176 = math.rsqrt %175 : vector<32x1xf32>
    %177 = vector.broadcast %176 : vector<32x1xf32> to vector<32x64xf32>
    %178 = arith.mulf %167, %177 : vector<32x64xf32>
    %179 = vector.broadcast %168 : vector<1x64xf32> to vector<32x64xf32>
    %180 = arith.mulf %178, %179 : vector<32x64xf32>
    %181 = arith.truncf %180 : vector<32x64xf32> to vector<32x64xbf16>
    %c1_65 = arith.constant 1 : index
    %c0_66 = arith.constant 0 : index
    %c0_67 = arith.constant 0 : index
    %182 = vector.load %arg7[%c1_65, %c0_66, %c0_67] : memref<2x64x128xbf16, #tpu.memory_space<vmem>>, vector<1x64x128xbf16>
    %183 = vector.shape_cast %182 : vector<1x64x128xbf16> to vector<64x128xbf16>
    %cst_68 = arith.constant dense<0.000000e+00> : vector<32x128xf32>
    %184 = tpu.matmul %181, %183, %cst_68 {dimension_numbers = #tpu.dot_dimension_numbers<[1], [0], [0], [1], [0, 0, 1, 1], [], []>} : vector<32x64xbf16>, vector<64x128xbf16>, vector<32x128xf32> -> vector<32x128xf32>
    %cst_69 = arith.constant 0.000000e+00 : f32
    %185 = vector.broadcast %cst_69 : f32 to vector<32x128xf32>
    %186 = arith.maximumf %184, %185 : vector<32x128xf32>
    %187 = arith.truncf %186 : vector<32x128xf32> to vector<32x128xbf16>
    %c1_70 = arith.constant 1 : index
    %c0_71 = arith.constant 0 : index
    %c0_72 = arith.constant 0 : index
    %188 = vector.load %arg8[%c1_70, %c0_71, %c0_72] : memref<2x128x64xbf16, #tpu.memory_space<vmem>>, vector<1x128x64xbf16>
    %189 = vector.shape_cast %188 : vector<1x128x64xbf16> to vector<128x64xbf16>
    %cst_73 = arith.constant dense<0.000000e+00> : vector<32x64xf32>
    %190 = tpu.matmul %187, %189, %cst_73 {dimension_numbers = #tpu.dot_dimension_numbers<[1], [0], [0], [1], [0, 0, 1, 1], [], []>} : vector<32x128xbf16>, vector<128x64xbf16>, vector<32x64xf32> -> vector<32x64xf32>
    %191 = arith.addf %167, %190 : vector<32x64xf32>
    %c0_74 = arith.constant 0 : index
    %c0_75 = arith.constant 0 : index
    %192 = vector.load %arg4[%c0_74, %c0_75] : memref<1x64xf32, #tpu.memory_space<vmem>>, vector<1x64xf32>
    %193 = arith.mulf %191, %191 : vector<32x64xf32>
    %cst_76 = arith.constant dense<0.000000e+00> : vector<32xf32>
    %194 = vector.multi_reduction <add>, %193, %cst_76 [1] : vector<32x64xf32> to vector<32xf32>
    %195 = vector.shape_cast %194 : vector<32xf32> to vector<32x1xf32>
    %cst_77 = arith.constant 6.400000e+01 : f32
    %196 = vector.broadcast %cst_77 : f32 to vector<32x1xf32>
    %197 = arith.divf %195, %196 : vector<32x1xf32>
    %cst_78 = arith.constant 9.99999997E-7 : f32
    %198 = vector.broadcast %cst_78 : f32 to vector<32x1xf32>
    %199 = arith.addf %197, %198 : vector<32x1xf32>
    %200 = math.rsqrt %199 : vector<32x1xf32>
    %201 = vector.broadcast %200 : vector<32x1xf32> to vector<32x64xf32>
    %202 = arith.mulf %191, %201 : vector<32x64xf32>
    %203 = vector.broadcast %192 : vector<1x64xf32> to vector<32x64xf32>
    %204 = arith.mulf %202, %203 : vector<32x64xf32>
    %205 = vector.shape_cast %204 : vector<32x64xf32> to vector<4x8x64xf32>
    tpu.wait_dma2 semaphore(%arg13 : memref<!tpu.dma_semaphore, #tpu.memory_space<semaphore_mem>>) src(%arg10 : memref<8x64x512xbf16, #tpu.memory_space<any>>) dst(%arg12 : memref<8x64x512xbf16, #tpu.memory_space<vmem>>)
    %cst_79 = arith.constant 0.000000e+00 : f32
    %206 = vector.broadcast %cst_79 : f32 to vector<4x512xf32>
    %207 = vector.extract_strided_slice %205 {offsets = [0, 0, 0], sizes = [4, 1, 64], strides = [1, 1, 1]} : vector<4x8x64xf32> to vector<4x1x64xf32>
    %208 = vector.shape_cast %207 : vector<4x1x64xf32> to vector<4x64xf32>
    %209 = arith.truncf %208 : vector<4x64xf32> to vector<4x64xbf16>
    %c0_80 = arith.constant 0 : index
    %c0_81 = arith.constant 0 : index
    %c0_82 = arith.constant 0 : index
    %210 = vector.load %arg12[%c0_80, %c0_81, %c0_82] : memref<8x64x512xbf16, #tpu.memory_space<vmem>>, vector<1x64x512xbf16>
    %211 = vector.shape_cast %210 : vector<1x64x512xbf16> to vector<64x512xbf16>
    %cst_83 = arith.constant dense<0.000000e+00> : vector<4x512xf32>
    %212 = tpu.matmul %209, %211, %cst_83 {dimension_numbers = #tpu.dot_dimension_numbers<[1], [0], [0], [1], [0, 0, 1, 1], [], []>} : vector<4x64xbf16>, vector<64x512xbf16>, vector<4x512xf32> -> vector<4x512xf32>
    %213 = arith.addf %206, %212 : vector<4x512xf32>
    %214 = vector.extract_strided_slice %205 {offsets = [0, 1, 0], sizes = [4, 1, 64], strides = [1, 1, 1]} : vector<4x8x64xf32> to vector<4x1x64xf32>
    %215 = vector.shape_cast %214 : vector<4x1x64xf32> to vector<4x64xf32>
    %216 = arith.truncf %215 : vector<4x64xf32> to vector<4x64xbf16>
    %c1_84 = arith.constant 1 : index
    %c0_85 = arith.constant 0 : index
    %c0_86 = arith.constant 0 : index
    %217 = vector.load %arg12[%c1_84, %c0_85, %c0_86] : memref<8x64x512xbf16, #tpu.memory_space<vmem>>, vector<1x64x512xbf16>
    %218 = vector.shape_cast %217 : vector<1x64x512xbf16> to vector<64x512xbf16>
    %cst_87 = arith.constant dense<0.000000e+00> : vector<4x512xf32>
    %219 = tpu.matmul %216, %218, %cst_87 {dimension_numbers = #tpu.dot_dimension_numbers<[1], [0], [0], [1], [0, 0, 1, 1], [], []>} : vector<4x64xbf16>, vector<64x512xbf16>, vector<4x512xf32> -> vector<4x512xf32>
    %220 = arith.addf %213, %219 : vector<4x512xf32>
    %221 = vector.extract_strided_slice %205 {offsets = [0, 2, 0], sizes = [4, 1, 64], strides = [1, 1, 1]} : vector<4x8x64xf32> to vector<4x1x64xf32>
    %222 = vector.shape_cast %221 : vector<4x1x64xf32> to vector<4x64xf32>
    %223 = arith.truncf %222 : vector<4x64xf32> to vector<4x64xbf16>
    %c2 = arith.constant 2 : index
    %c0_88 = arith.constant 0 : index
    %c0_89 = arith.constant 0 : index
    %224 = vector.load %arg12[%c2, %c0_88, %c0_89] : memref<8x64x512xbf16, #tpu.memory_space<vmem>>, vector<1x64x512xbf16>
    %225 = vector.shape_cast %224 : vector<1x64x512xbf16> to vector<64x512xbf16>
    %cst_90 = arith.constant dense<0.000000e+00> : vector<4x512xf32>
    %226 = tpu.matmul %223, %225, %cst_90 {dimension_numbers = #tpu.dot_dimension_numbers<[1], [0], [0], [1], [0, 0, 1, 1], [], []>} : vector<4x64xbf16>, vector<64x512xbf16>, vector<4x512xf32> -> vector<4x512xf32>
    %227 = arith.addf %220, %226 : vector<4x512xf32>
    %228 = vector.extract_strided_slice %205 {offsets = [0, 3, 0], sizes = [4, 1, 64], strides = [1, 1, 1]} : vector<4x8x64xf32> to vector<4x1x64xf32>
    %229 = vector.shape_cast %228 : vector<4x1x64xf32> to vector<4x64xf32>
    %230 = arith.truncf %229 : vector<4x64xf32> to vector<4x64xbf16>
    %c3 = arith.constant 3 : index
    %c0_91 = arith.constant 0 : index
    %c0_92 = arith.constant 0 : index
    %231 = vector.load %arg12[%c3, %c0_91, %c0_92] : memref<8x64x512xbf16, #tpu.memory_space<vmem>>, vector<1x64x512xbf16>
    %232 = vector.shape_cast %231 : vector<1x64x512xbf16> to vector<64x512xbf16>
    %cst_93 = arith.constant dense<0.000000e+00> : vector<4x512xf32>
    %233 = tpu.matmul %230, %232, %cst_93 {dimension_numbers = #tpu.dot_dimension_numbers<[1], [0], [0], [1], [0, 0, 1, 1], [], []>} : vector<4x64xbf16>, vector<64x512xbf16>, vector<4x512xf32> -> vector<4x512xf32>
    %234 = arith.addf %227, %233 : vector<4x512xf32>
    %235 = vector.extract_strided_slice %205 {offsets = [0, 4, 0], sizes = [4, 1, 64], strides = [1, 1, 1]} : vector<4x8x64xf32> to vector<4x1x64xf32>
    %236 = vector.shape_cast %235 : vector<4x1x64xf32> to vector<4x64xf32>
    %237 = arith.truncf %236 : vector<4x64xf32> to vector<4x64xbf16>
    %c4 = arith.constant 4 : index
    %c0_94 = arith.constant 0 : index
    %c0_95 = arith.constant 0 : index
    %238 = vector.load %arg12[%c4, %c0_94, %c0_95] : memref<8x64x512xbf16, #tpu.memory_space<vmem>>, vector<1x64x512xbf16>
    %239 = vector.shape_cast %238 : vector<1x64x512xbf16> to vector<64x512xbf16>
    %cst_96 = arith.constant dense<0.000000e+00> : vector<4x512xf32>
    %240 = tpu.matmul %237, %239, %cst_96 {dimension_numbers = #tpu.dot_dimension_numbers<[1], [0], [0], [1], [0, 0, 1, 1], [], []>} : vector<4x64xbf16>, vector<64x512xbf16>, vector<4x512xf32> -> vector<4x512xf32>
    %241 = arith.addf %234, %240 : vector<4x512xf32>
    %242 = vector.extract_strided_slice %205 {offsets = [0, 5, 0], sizes = [4, 1, 64], strides = [1, 1, 1]} : vector<4x8x64xf32> to vector<4x1x64xf32>
    %243 = vector.shape_cast %242 : vector<4x1x64xf32> to vector<4x64xf32>
    %244 = arith.truncf %243 : vector<4x64xf32> to vector<4x64xbf16>
    %c5 = arith.constant 5 : index
    %c0_97 = arith.constant 0 : index
    %c0_98 = arith.constant 0 : index
    %245 = vector.load %arg12[%c5, %c0_97, %c0_98] : memref<8x64x512xbf16, #tpu.memory_space<vmem>>, vector<1x64x512xbf16>
    %246 = vector.shape_cast %245 : vector<1x64x512xbf16> to vector<64x512xbf16>
    %cst_99 = arith.constant dense<0.000000e+00> : vector<4x512xf32>
    %247 = tpu.matmul %244, %246, %cst_99 {dimension_numbers = #tpu.dot_dimension_numbers<[1], [0], [0], [1], [0, 0, 1, 1], [], []>} : vector<4x64xbf16>, vector<64x512xbf16>, vector<4x512xf32> -> vector<4x512xf32>
    %248 = arith.addf %241, %247 : vector<4x512xf32>
    %249 = vector.extract_strided_slice %205 {offsets = [0, 6, 0], sizes = [4, 1, 64], strides = [1, 1, 1]} : vector<4x8x64xf32> to vector<4x1x64xf32>
    %250 = vector.shape_cast %249 : vector<4x1x64xf32> to vector<4x64xf32>
    %251 = arith.truncf %250 : vector<4x64xf32> to vector<4x64xbf16>
    %c6 = arith.constant 6 : index
    %c0_100 = arith.constant 0 : index
    %c0_101 = arith.constant 0 : index
    %252 = vector.load %arg12[%c6, %c0_100, %c0_101] : memref<8x64x512xbf16, #tpu.memory_space<vmem>>, vector<1x64x512xbf16>
    %253 = vector.shape_cast %252 : vector<1x64x512xbf16> to vector<64x512xbf16>
    %cst_102 = arith.constant dense<0.000000e+00> : vector<4x512xf32>
    %254 = tpu.matmul %251, %253, %cst_102 {dimension_numbers = #tpu.dot_dimension_numbers<[1], [0], [0], [1], [0, 0, 1, 1], [], []>} : vector<4x64xbf16>, vector<64x512xbf16>, vector<4x512xf32> -> vector<4x512xf32>
    %255 = arith.addf %248, %254 : vector<4x512xf32>
    %256 = vector.extract_strided_slice %205 {offsets = [0, 7, 0], sizes = [4, 1, 64], strides = [1, 1, 1]} : vector<4x8x64xf32> to vector<4x1x64xf32>
    %257 = vector.shape_cast %256 : vector<4x1x64xf32> to vector<4x64xf32>
    %258 = arith.truncf %257 : vector<4x64xf32> to vector<4x64xbf16>
    %c7 = arith.constant 7 : index
    %c0_103 = arith.constant 0 : index
    %c0_104 = arith.constant 0 : index
    %259 = vector.load %arg12[%c7, %c0_103, %c0_104] : memref<8x64x512xbf16, #tpu.memory_space<vmem>>, vector<1x64x512xbf16>
    %260 = vector.shape_cast %259 : vector<1x64x512xbf16> to vector<64x512xbf16>
    %cst_105 = arith.constant dense<0.000000e+00> : vector<4x512xf32>
    %261 = tpu.matmul %258, %260, %cst_105 {dimension_numbers = #tpu.dot_dimension_numbers<[1], [0], [0], [1], [0, 0, 1, 1], [], []>} : vector<4x64xbf16>, vector<64x512xbf16>, vector<4x512xf32> -> vector<4x512xf32>
    %262 = arith.addf %255, %261 : vector<4x512xf32>
    %c0_106 = arith.constant 0 : index
    %c0_107 = arith.constant 0 : index
    %263 = vector.load %arg9[%c0_106, %c0_107] : memref<1x512xf32, #tpu.memory_space<vmem>>, vector<1x512xf32>
    %264 = vector.broadcast %263 : vector<1x512xf32> to vector<4x512xf32>
    %265 = arith.addf %262, %264 : vector<4x512xf32>
    %266 = arith.negf %265 : vector<4x512xf32>
    %267 = math.exp %266 : vector<4x512xf32>
    %cst_108 = arith.constant 1.000000e+00 : f32
    %268 = vector.broadcast %cst_108 : f32 to vector<4x512xf32>
    %269 = arith.addf %268, %267 : vector<4x512xf32>
    %270 = arith.divf %268, %269 : vector<4x512xf32>
    %c0_109 = arith.constant 0 : index
    %c0_110 = arith.constant 0 : index
    %271 = vector.load %arg11[%c0_109, %c0_110] : memref<4x512xf32, #tpu.memory_space<vmem>>, vector<4x512xf32>
    tpu.vector_store %arg11[%c0_109, %c0_110], %270 {strides = array<i32>} : memref<4x512xf32, #tpu.memory_space<vmem>>, vector<4x512xf32>,
    return
  }
}

</mosaic_0001>

<bundles_post_ra>
// kernel: forward.1
= control target key start
LH: loop header
LB: loop body
LE: loop exit
PB: predicated region body
PF: predicated region fallthrough
CT: control target
= control target key end

     0   :  { %vm334_vm0 = vcmask 523264   ;;  %s9558_s0 = inlined_call_operand.vmem [shape: f32[32,64], index: 0, kind: input, shape index: {}]   ;;  %s9559_s1 = inlined_call_operand.vmem [shape: f32[16,8,8], index: 1, kind: input, shape index: {}]   ;;  %s9560_s2 = inlined_call_operand.vmem [shape: f32[2,64], index: 2, kind: input, shape index: {}]   ;;  %s9561_s3 = inlined_call_operand.vmem [shape: f32[2,64], index: 3, kind: input, shape index: {}]   ;;  %s9562_s4 = inlined_call_operand.vmem [shape: f32[1,64], index: 4, kind: input, shape index: {}]   ;;  %s9563_s5 = inlined_call_operand.vmem [shape: bf16[2,12,64,16], index: 5, kind: input, shape index: {}]   ;;  %s9564_s6 = inlined_call_operand.vmem [shape: bf16[2,64,64], index: 6, kind: input, shape index: {}]   ;;  %s9565_s7 = inlined_call_operand.vmem [shape: bf16[2,64,128], index: 7, kind: input, shape index: {}]   ;;  %s9566_s8 = inlined_call_operand.vmem [shape: bf16[2,128,64], index: 8, kind: input, shape index: {}]   ;;  %s9567_s9 = inlined_call_operand.vmem [shape: f32[1,512], index: 9, kind: input, shape index: {}]   ;;  %s9568_s10 = inlined_call_operand.vmem [shape: bf16[8,64,512], index: 10, kind: input, shape index: {}]   ;;  %s9569_s11 = inlined_call_operand.vmem [shape: f32[4,512], index: 11, kind: output, shape index: {}]  }
   0x1   :  { %v47_v0 = vld [vmem:[%s9568_s10] sm:$0xff]  ;;  %v49_v1 = vld [vmem:[%s9568_s10 + $0x8] sm:$0xff]  ;;  %v51_v2 = vld [vmem:[%s9568_s10 + $0x10] sm:$0xff] }
   0x2   :  { %48 = vst [vmem:[#allocation2] sm:$0xff] %v47_v0  ;;  %v53_v3 = vld [vmem:[%s9568_s10 + $0x18] sm:$0xff]  ;;  %v55_v4 = vld [vmem:[%s9568_s10 + $0x20] sm:$0xff]  ;;  %v57_v5 = vld [vmem:[%s9568_s10 + $0x28] sm:$0xff] }
   0x3   :  { %50 = vst [vmem:[#allocation2 + $0x8] sm:$0xff] %v49_v1  ;;  %v59_v6 = vld [vmem:[%s9568_s10 + $0x30] sm:$0xff]  ;;  %v61_v7 = vld [vmem:[%s9568_s10 + $0x38] sm:$0xff]  ;;  %v63_v8 = vld [vmem:[%s9568_s10 + $0x40] sm:$0xff] }
   0x4   :  { %52 = vst [vmem:[#allocation2 + $0x10] sm:$0xff] %v51_v2  ;;  %v65_v9 = vld [vmem:[%s9568_s10 + $0x48] sm:$0xff]  ;;  %v67_v10 = vld [vmem:[%s9568_s10 + $0x50] sm:$0xff]  ;;  %v69_v11 = vld [vmem:[%s9568_s10 + $0x58] sm:$0xff] }
   0x5   :  { %54 = vst [vmem:[#allocation2 + $0x18] sm:$0xff] %v53_v3  ;;  %v71_v12 = vld [vmem:[%s9568_s10 + $0x60] sm:$0xff]  ;;  %v73_v13 = vld [vmem:[%s9568_s10 + $0x68] sm:$0xff]  ;;  %v75_v14 = vld [vmem:[%s9568_s10 + $0x70] sm:$0xff] }
   0x6   :  { %56 = vst [vmem:[#allocation2 + $0x20] sm:$0xff] %v55_v4  ;;  %v77_v15 = vld [vmem:[%s9568_s10 + $0x78] sm:$0xff]  ;;  %v79_v16 = vld [vmem:[%s9568_s10 + $0x80] sm:$0xff]  ;;  %v81_v17 = vld [vmem:[%s9568_s10 + $0x88] sm:$0xff] }
   0x7   :  { %58 = vst [vmem:[#allocation2 + $0x28] sm:$0xff] %v57_v5  ;;  %v83_v18 = vld [vmem:[%s9568_s10 + $0x90] sm:$0xff]  ;;  %v85_v19 = vld [vmem:[%s9568_s10 + $0x98] sm:$0xff]  ;;  %v87_v20 = vld [vmem:[%s9568_s10 + $0xa0] sm:$0xff] }
   0x8   :  { %60 = vst [vmem:[#allocation2 + $0x30] sm:$0xff] %v59_v6  ;;  %v89_v21 = vld [vmem:[%s9568_s10 + $0xa8] sm:$0xff]  ;;  %v91_v22 = vld [vmem:[%s9568_s10 + $0xb0] sm:$0xff]  ;;  %v93_v23 = vld [vmem:[%s9568_s10 + $0xb8] sm:$0xff] }
   0x9   :  { %62 = vst [vmem:[#allocation2 + $0x38] sm:$0xff] %v61_v7  ;;  %v95_v24 = vld [vmem:[%s9568_s10 + $0xc0] sm:$0xff]  ;;  %v97_v25 = vld [vmem:[%s9568_s10 + $0xc8] sm:$0xff]  ;;  %v99_v26 = vld [vmem:[%s9568_s10 + $0xd0] sm:$0xff] }
   0xa   :  { %64 = vst [vmem:[#allocation2 + $0x40] sm:$0xff] %v63_v8  ;;  %v101_v27 = vld [vmem:[%s9568_s10 + $0xd8] sm:$0xff]  ;;  %v103_v28 = vld [vmem:[%s9568_s10 + $0xe0] sm:$0xff]  ;;  %v105_v29 = vld [vmem:[%s9568_s10 + $0xe8] sm:$0xff] }
   0xb   :  { %66 = vst [vmem:[#allocation2 + $0x48] sm:$0xff] %v65_v9  ;;  %v107_v30 = vld [vmem:[%s9568_s10 + $0xf0] sm:$0xff]  ;;  %v109_v31 = vld [vmem:[%s9568_s10 + $0xf8] sm:$0xff]  ;;  %v111_v32 = vld [vmem:[%s9568_s10 + $0x100] sm:$0xff] }
   0xc   :  { %68 = vst [vmem:[#allocation2 + $0x50] sm:$0xff] %v67_v10  ;;  %v113_v33 = vld [vmem:[%s9568_s10 + $0x108] sm:$0xff]  ;;  %v115_v34 = vld [vmem:[%s9568_s10 + $0x110] sm:$0xff]  ;;  %v117_v35 = vld [vmem:[%s9568_s10 + $0x118] sm:$0xff] }
   0xd   :  { %70 = vst [vmem:[#allocation2 + $0x58] sm:$0xff] %v69_v11  ;;  %v119_v36 = vld [vmem:[%s9568_s10 + $0x120] sm:$0xff]  ;;  %v121_v37 = vld [vmem:[%s9568_s10 + $0x128] sm:$0xff]  ;;  %v123_v38 = vld [vmem:[%s9568_s10 + $0x130] sm:$0xff] }
   0xe   :  { %72 = vst [vmem:[#allocation2 + $0x60] sm:$0xff] %v71_v12  ;;  %v125_v39 = vld [vmem:[%s9568_s10 + $0x138] sm:$0xff]  ;;  %v127_v40 = vld [vmem:[%s9568_s10 + $0x140] sm:$0xff]  ;;  %v129_v41 = vld [vmem:[%s9568_s10 + $0x148] sm:$0xff] }
   0xf   :  { %74 = vst [vmem:[#allocation2 + $0x68] sm:$0xff] %v73_v13  ;;  %v131_v42 = vld [vmem:[%s9568_s10 + $0x150] sm:$0xff]  ;;  %v133_v43 = vld [vmem:[%s9568_s10 + $0x158] sm:$0xff]  ;;  %v135_v44 = vld [vmem:[%s9568_s10 + $0x160] sm:$0xff] }
  0x10   :  { %76 = vst [vmem:[#allocation2 + $0x70] sm:$0xff] %v75_v14  ;;  %v137_v45 = vld [vmem:[%s9568_s10 + $0x168] sm:$0xff]  ;;  %v139_v46 = vld [vmem:[%s9568_s10 + $0x170] sm:$0xff]  ;;  %v141_v47 = vld [vmem:[%s9568_s10 + $0x178] sm:$0xff] }
  0x11   :  { %78 = vst [vmem:[#allocation2 + $0x78] sm:$0xff] %v77_v15  ;;  %v143_v48 = vld [vmem:[%s9568_s10 + $0x180] sm:$0xff]  ;;  %v145_v49 = vld [vmem:[%s9568_s10 + $0x188] sm:$0xff]  ;;  %v147_v50 = vld [vmem:[%s9568_s10 + $0x190] sm:$0xff] }
  0x12   :  { %80 = vst [vmem:[#allocation2 + $0x80] sm:$0xff] %v79_v16  ;;  %v149_v51 = vld [vmem:[%s9568_s10 + $0x198] sm:$0xff]  ;;  %v151_v52 = vld [vmem:[%s9568_s10 + $0x1a0] sm:$0xff]  ;;  %v153_v53 = vld [vmem:[%s9568_s10 + $0x1a8] sm:$0xff] }
  0x13   :  { %82 = vst [vmem:[#allocation2 + $0x88] sm:$0xff] %v81_v17  ;;  %v155_v54 = vld [vmem:[%s9568_s10 + $0x1b0] sm:$0xff]  ;;  %v157_v55 = vld [vmem:[%s9568_s10 + $0x1b8] sm:$0xff]  ;;  %v159_v56 = vld [vmem:[%s9568_s10 + $0x1c0] sm:$0xff] }
  0x14   :  { %84 = vst [vmem:[#allocation2 + $0x90] sm:$0xff] %v83_v18  ;;  %v161_v57 = vld [vmem:[%s9568_s10 + $0x1c8] sm:$0xff]  ;;  %v163_v58 = vld [vmem:[%s9568_s10 + $0x1d0] sm:$0xff]  ;;  %v165_v59 = vld [vmem:[%s9568_s10 + $0x1d8] sm:$0xff] }
  0x15   :  { %86 = vst [vmem:[#allocation2 + $0x98] sm:$0xff] %v85_v19  ;;  %v167_v60 = vld [vmem:[%s9568_s10 + $0x1e0] sm:$0xff]  ;;  %v169_v61 = vld [vmem:[%s9568_s10 + $0x1e8] sm:$0xff]  ;;  %v171_v62 = vld [vmem:[%s9568_s10 + $0x1f0] sm:$0xff] }
  0x16   :  { %88 = vst [vmem:[#allocation2 + $0xa0] sm:$0xff] %v87_v20  ;;  %v173_v63 = vld [vmem:[%s9568_s10 + $0x1f8] sm:$0xff]  ;;  %v175_v0 = vld [vmem:[%s9568_s10 + $0x200] sm:$0xff]  ;;  %v177_v1 = vld [vmem:[%s9568_s10 + $0x208] sm:$0xff] }
  0x17   :  { %90 = vst [vmem:[#allocation2 + $0xa8] sm:$0xff] %v89_v21  ;;  %v179_v2 = vld [vmem:[%s9568_s10 + $0x210] sm:$0xff]  ;;  %v181_v3 = vld [vmem:[%s9568_s10 + $0x218] sm:$0xff]  ;;  %v183_v4 = vld [vmem:[%s9568_s10 + $0x220] sm:$0xff] }
  0x18   :  { %92 = vst [vmem:[#allocation2 + $0xb0] sm:$0xff] %v91_v22  ;;  %v185_v5 = vld [vmem:[%s9568_s10 + $0x228] sm:$0xff]  ;;  %v187_v6 = vld [vmem:[%s9568_s10 + $0x230] sm:$0xff]  ;;  %v189_v7 = vld [vmem:[%s9568_s10 + $0x238] sm:$0xff] }
  0x19   :  { %94 = vst [vmem:[#allocation2 + $0xb8] sm:$0xff] %v93_v23  ;;  %v191_v8 = vld [vmem:[%s9568_s10 + $0x240] sm:$0xff]  ;;  %v193_v9 = vld [vmem:[%s9568_s10 + $0x248] sm:$0xff]  ;;  %v195_v10 = vld [vmem:[%s9568_s10 + $0x250] sm:$0xff] }
  0x1a   :  { %96 = vst [vmem:[#allocation2 + $0xc0] sm:$0xff] %v95_v24  ;;  %v197_v11 = vld [vmem:[%s9568_s10 + $0x258] sm:$0xff]  ;;  %v199_v12 = vld [vmem:[%s9568_s10 + $0x260] sm:$0xff]  ;;  %v201_v13 = vld [vmem:[%s9568_s10 + $0x268] sm:$0xff] }
  0x1b   :  { %98 = vst [vmem:[#allocation2 + $0xc8] sm:$0xff] %v97_v25  ;;  %v203_v14 = vld [vmem:[%s9568_s10 + $0x270] sm:$0xff]  ;;  %v205_v15 = vld [vmem:[%s9568_s10 + $0x278] sm:$0xff]  ;;  %v207_v16 = vld [vmem:[%s9568_s10 + $0x280] sm:$0xff] }
  0x1c   :  { %100 = vst [vmem:[#allocation2 + $0xd0] sm:$0xff] %v99_v26  ;;  %v209_v17 = vld [vmem:[%s9568_s10 + $0x288] sm:$0xff]  ;;  %v211_v18 = vld [vmem:[%s9568_s10 + $0x290] sm:$0xff]  ;;  %v213_v19 = vld [vmem:[%s9568_s10 + $0x298] sm:$0xff] }
  0x1d   :  { %102 = vst [vmem:[#allocation2 + $0xd8] sm:$0xff] %v101_v27  ;;  %v215_v20 = vld [vmem:[%s9568_s10 + $0x2a0] sm:$0xff]  ;;  %v217_v21 = vld [vmem:[%s9568_s10 + $0x2a8] sm:$0xff]  ;;  %v219_v22 = vld [vmem:[%s9568_s10 + $0x2b0] sm:$0xff] }
  0x1e   :  { %104 = vst [vmem:[#allocation2 + $0xe0] sm:$0xff] %v103_v28  ;;  %v221_v23 = vld [vmem:[%s9568_s10 + $0x2b8] sm:$0xff]  ;;  %v223_v24 = vld [vmem:[%s9568_s10 + $0x2c0] sm:$0xff]  ;;  %v225_v25 = vld [vmem:[%s9568_s10 + $0x2c8] sm:$0xff] }
  0x1f   :  { %106 = vst [vmem:[#allocation2 + $0xe8] sm:$0xff] %v105_v29  ;;  %v227_v26 = vld [vmem:[%s9568_s10 + $0x2d0] sm:$0xff]  ;;  %v229_v27 = vld [vmem:[%s9568_s10 + $0x2d8] sm:$0xff]  ;;  %v231_v28 = vld [vmem:[%s9568_s10 + $0x2e0] sm:$0xff] }
  0x20   :  { %108 = vst [vmem:[#allocation2 + $0xf0] sm:$0xff] %v107_v30  ;;  %v233_v29 = vld [vmem:[%s9568_s10 + $0x2e8] sm:$0xff]  ;;  %v235_v30 = vld [vmem:[%s9568_s10 + $0x2f0] sm:$0xff] }
  0x21   :  { %110 = vst [vmem:[#allocation2 + $0xf8] sm:$0xff] %v109_v31  ;;  %v237_v31 = vld [vmem:[%s9568_s10 + $0x2f8] sm:$0xff] }
  0x22   :  { %112 = vst [vmem:[#allocation2 + $0x100] sm:$0xff] %v111_v32  ;;  %v239_v32 = vld [vmem:[%s9568_s10 + $0x300] sm:$0xff] }
  0x23   :  { %114 = vst [vmem:[#allocation2 + $0x108] sm:$0xff] %v113_v33  ;;  %v241_v33 = vld [vmem:[%s9568_s10 + $0x308] sm:$0xff] }
  0x24   :  { %116 = vst [vmem:[#allocation2 + $0x110] sm:$0xff] %v115_v34  ;;  %v243_v34 = vld [vmem:[%s9568_s10 + $0x310] sm:$0xff] }
  0x25   :  { %118 = vst [vmem:[#allocation2 + $0x118] sm:$0xff] %v117_v35  ;;  %v245_v35 = vld [vmem:[%s9568_s10 + $0x318] sm:$0xff] }
  0x26   :  { %120 = vst [vmem:[#allocation2 + $0x120] sm:$0xff] %v119_v36  ;;  %v247_v36 = vld [vmem:[%s9568_s10 + $0x320] sm:$0xff] }
  0x27   :  { %122 = vst [vmem:[#allocation2 + $0x128] sm:$0xff] %v121_v37  ;;  %v249_v37 = vld [vmem:[%s9568_s10 + $0x328] sm:$0xff] }
  0x28   :  { %124 = vst [vmem:[#allocation2 + $0x130] sm:$0xff] %v123_v38  ;;  %v251_v38 = vld [vmem:[%s9568_s10 + $0x330] sm:$0xff] }
  0x29   :  { %126 = vst [vmem:[#allocation2 + $0x138] sm:$0xff] %v125_v39  ;;  %v253_v39 = vld [vmem:[%s9568_s10 + $0x338] sm:$0xff] }
  0x2a   :  { %128 = vst [vmem:[#allocation2 + $0x140] sm:$0xff] %v127_v40  ;;  %v255_v40 = vld [vmem:[%s9568_s10 + $0x340] sm:$0xff] }
  0x2b   :  { %130 = vst [vmem:[#allocation2 + $0x148] sm:$0xff] %v129_v41  ;;  %v257_v41 = vld [vmem:[%s9568_s10 + $0x348] sm:$0xff] }
  0x2c   :  { %132 = vst [vmem:[#allocation2 + $0x150] sm:$0xff] %v131_v42  ;;  %v259_v42 = vld [vmem:[%s9568_s10 + $0x350] sm:$0xff] }
  0x2d   :  { %134 = vst [vmem:[#allocation2 + $0x158] sm:$0xff] %v133_v43  ;;  %v261_v43 = vld [vmem:[%s9568_s10 + $0x358] sm:$0xff] }
  0x2e   :  { %136 = vst [vmem:[#allocation2 + $0x160] sm:$0xff] %v135_v44  ;;  %v263_v44 = vld [vmem:[%s9568_s10 + $0x360] sm:$0xff] }
  0x2f   :  { %138 = vst [vmem:[#allocation2 + $0x168] sm:$0xff] %v137_v45  ;;  %v265_v45 = vld [vmem:[%s9568_s10 + $0x368] sm:$0xff] }
  0x30   :  { %140 = vst [vmem:[#allocation2 + $0x170] sm:$0xff] %v139_v46  ;;  %v267_v46 = vld [vmem:[%s9568_s10 + $0x370] sm:$0xff] }
  0x31   :  { %142 = vst [vmem:[#allocation2 + $0x178] sm:$0xff] %v141_v47  ;;  %v269_v47 = vld [vmem:[%s9568_s10 + $0x378] sm:$0xff] }
  0x32   :  { %144 = vst [vmem:[#allocation2 + $0x180] sm:$0xff] %v143_v48  ;;  %v271_v48 = vld [vmem:[%s9568_s10 + $0x380] sm:$0xff] }
  0x33   :  { %146 = vst [vmem:[#allocation2 + $0x188] sm:$0xff] %v145_v49  ;;  %v273_v49 = vld [vmem:[%s9568_s10 + $0x388] sm:$0xff] }
  0x34   :  { %148 = vst [vmem:[#allocation2 + $0x190] sm:$0xff] %v147_v50  ;;  %v275_v50 = vld [vmem:[%s9568_s10 + $0x390] sm:$0xff] }
  0x35   :  { %150 = vst [vmem:[#allocation2 + $0x198] sm:$0xff] %v149_v51  ;;  %v277_v51 = vld [vmem:[%s9568_s10 + $0x398] sm:$0xff] }
  0x36   :  { %152 = vst [vmem:[#allocation2 + $0x1a0] sm:$0xff] %v151_v52  ;;  %v279_v52 = vld [vmem:[%s9568_s10 + $0x3a0] sm:$0xff] }
  0x37   :  { %154 = vst [vmem:[#allocation2 + $0x1a8] sm:$0xff] %v153_v53  ;;  %v281_v53 = vld [vmem:[%s9568_s10 + $0x3a8] sm:$0xff] }
  0x38   :  { %156 = vst [vmem:[#allocation2 + $0x1b0] sm:$0xff] %v155_v54  ;;  %v283_v54 = vld [vmem:[%s9568_s10 + $0x3b0] sm:$0xff] }
  0x39   :  { %158 = vst [vmem:[#allocation2 + $0x1b8] sm:$0xff] %v157_v55  ;;  %v285_v55 = vld [vmem:[%s9568_s10 + $0x3b8] sm:$0xff] }
  0x3a   :  { %160 = vst [vmem:[#allocation2 + $0x1c0] sm:$0xff] %v159_v56  ;;  %v287_v56 = vld [vmem:[%s9568_s10 + $0x3c0] sm:$0xff] }
  0x3b   :  { %162 = vst [vmem:[#allocation2 + $0x1c8] sm:$0xff] %v161_v57  ;;  %v289_v57 = vld [vmem:[%s9568_s10 + $0x3c8] sm:$0xff] }
  0x3c   :  { %164 = vst [vmem:[#allocation2 + $0x1d0] sm:$0xff] %v163_v58  ;;  %v291_v58 = vld [vmem:[%s9568_s10 + $0x3d0] sm:$0xff] }
  0x3d   :  { %166 = vst [vmem:[#allocation2 + $0x1d8] sm:$0xff] %v165_v59  ;;  %v293_v59 = vld [vmem:[%s9568_s10 + $0x3d8] sm:$0xff] }
  0x3e   :  { %168 = vst [vmem:[#allocation2 + $0x1e0] sm:$0xff] %v167_v60  ;;  %v295_v60 = vld [vmem:[%s9568_s10 + $0x3e0] sm:$0xff] }
  0x3f   :  { %170 = vst [vmem:[#allocation2 + $0x1e8] sm:$0xff] %v169_v61  ;;  %v297_v61 = vld [vmem:[%s9568_s10 + $0x3e8] sm:$0xff] }
  0x40   :  { %172 = vst [vmem:[#allocation2 + $0x1f0] sm:$0xff] %v171_v62  ;;  %v299_v62 = vld [vmem:[%s9568_s10 + $0x3f0] sm:$0xff] }
  0x41   :  { %174 = vst [vmem:[#allocation2 + $0x1f8] sm:$0xff] %v173_v63  ;;  %v301_v63 = vld [vmem:[%s9568_s10 + $0x3f8] sm:$0xff] }
  0x42   :  { %176 = vst [vmem:[#allocation2 + $0x200] sm:$0xff] %v175_v0  ;;  %v7958_v0 = vld [vmem:[%s9558_s0 + $0x10] sm:$0xff] }
  0x43   :  { %178 = vst [vmem:[#allocation2 + $0x208] sm:$0xff] %v177_v1  ;;  %v7963_v1 = vld [vmem:[%s9558_s0] sm:$0xff] }
  0x44   :  { %180 = vst [vmem:[#allocation2 + $0x210] sm:$0xff] %v179_v2  ;;  %v332_v2 = vmul.f32 %v7958_v0, %v7958_v0 }
  0x45   :  { %182 = vst [vmem:[#allocation2 + $0x218] sm:$0xff] %v181_v3  ;;  %v330_v3 = vmul.f32 %v7963_v1, %v7963_v1 }
  0x46   :  { %184 = vst [vmem:[#allocation2 + $0x220] sm:$0xff] %v183_v4  ;;  %v7972_v4 = vld [vmem:[%s9558_s0 + $0x18] sm:$0xff] }
  0x47   :  { %186 = vst [vmem:[#allocation2 + $0x228] sm:$0xff] %v185_v5  ;;  %v7977_v5 = vld [vmem:[%s9558_s0 + $0x8] sm:$0xff] }
  0x48   :  { %188 = vst [vmem:[#allocation2 + $0x230] sm:$0xff] %v187_v6 }
  0x49   :  { %190 = vst [vmem:[#allocation2 + $0x238] sm:$0xff] %v189_v7 }
  0x4a   :  { %192 = vst [vmem:[#allocation2 + $0x240] sm:$0xff] %v191_v8 }
  0x4b   :  { %194 = vst [vmem:[#allocation2 + $0x248] sm:$0xff] %v193_v9 }
  0x4c   :  { %196 = vst [vmem:[#allocation2 + $0x250] sm:$0xff] %v195_v10 }
  0x4d   :  { %198 = vst [vmem:[#allocation2 + $0x258] sm:$0xff] %v197_v11 }
  0x4e   :  { %200 = vst [vmem:[#allocation2 + $0x260] sm:$0xff] %v199_v12 }
  0x4f   :  { %202 = vst [vmem:[#allocation2 + $0x268] sm:$0xff] %v201_v13 }
  0x50   :  { %204 = vst [vmem:[#allocation2 + $0x270] sm:$0xff] %v203_v14 }
  0x51   :  { %206 = vst [vmem:[#allocation2 + $0x278] sm:$0xff] %v205_v15 }
  0x52   :  { %208 = vst [vmem:[#allocation2 + $0x280] sm:$0xff] %v207_v16 }
  0x53   :  { %210 = vst [vmem:[#allocation2 + $0x288] sm:$0xff] %v209_v17 }
  0x54   :  { %212 = vst [vmem:[#allocation2 + $0x290] sm:$0xff] %v211_v18 }
  0x55   :  { %214 = vst [vmem:[#allocation2 + $0x298] sm:$0xff] %v213_v19 }
  0x56   :  { %216 = vst [vmem:[#allocation2 + $0x2a0] sm:$0xff] %v215_v20 }
  0x57   :  { %218 = vst [vmem:[#allocation2 + $0x2a8] sm:$0xff] %v217_v21 }
  0x58   :  { %220 = vst [vmem:[#allocation2 + $0x2b0] sm:$0xff] %v219_v22 }
  0x59   :  { %222 = vst [vmem:[#allocation2 + $0x2b8] sm:$0xff] %v221_v23 }
  0x5a   :  { %224 = vst [vmem:[#allocation2 + $0x2c0] sm:$0xff] %v223_v24 }
  0x5b   :  { %226 = vst [vmem:[#allocation2 + $0x2c8] sm:$0xff] %v225_v25 }
  0x5c   :  { %228 = vst [vmem:[#allocation2 + $0x2d0] sm:$0xff] %v227_v26 }
  0x5d   :  { %230 = vst [vmem:[#allocation2 + $0x2d8] sm:$0xff] %v229_v27 }
  0x5e   :  { %232 = vst [vmem:[#allocation2 + $0x2e0] sm:$0xff] %v231_v28 }
  0x5f   :  { %234 = vst [vmem:[#allocation2 + $0x2e8] sm:$0xff] %v233_v29 }
  0x60   :  { %236 = vst [vmem:[#allocation2 + $0x2f0] sm:$0xff] %v235_v30 }
  0x61   :  { %238 = vst [vmem:[#allocation2 + $0x2f8] sm:$0xff] %v237_v31 }
  0x62   :  { %240 = vst [vmem:[#allocation2 + $0x300] sm:$0xff] %v239_v32 }
  0x63   :  { %242 = vst [vmem:[#allocation2 + $0x308] sm:$0xff] %v241_v33 }
  0x64   :  { %244 = vst [vmem:[#allocation2 + $0x310] sm:$0xff] %v243_v34 }
  0x65   :  { %246 = vst [vmem:[#allocation2 + $0x318] sm:$0xff] %v245_v35 }
  0x66   :  { %248 = vst [vmem:[#allocation2 + $0x320] sm:$0xff] %v247_v36 }
  0x67   :  { %250 = vst [vmem:[#allocation2 + $0x328] sm:$0xff] %v249_v37 }
  0x68   :  { %252 = vst [vmem:[#allocation2 + $0x330] sm:$0xff] %v251_v38 }
  0x69   :  { %254 = vst [vmem:[#allocation2 + $0x338] sm:$0xff] %v253_v39 }
  0x6a   :  { %256 = vst [vmem:[#allocation2 + $0x340] sm:$0xff] %v255_v40 }
  0x6b   :  { %258 = vst [vmem:[#allocation2 + $0x348] sm:$0xff] %v257_v41 }
  0x6c   :  { %260 = vst [vmem:[#allocation2 + $0x350] sm:$0xff] %v259_v42 }
  0x6d   :  { %262 = vst [vmem:[#allocation2 + $0x358] sm:$0xff] %v261_v43 }
  0x6e   :  { %264 = vst [vmem:[#allocation2 + $0x360] sm:$0xff] %v263_v44 }
  0x6f   :  { %266 = vst [vmem:[#allocation2 + $0x368] sm:$0xff] %v265_v45 }
  0x70   :  { %268 = vst [vmem:[#allocation2 + $0x370] sm:$0xff] %v267_v46 }
  0x71   :  { %270 = vst [vmem:[#allocation2 + $0x378] sm:$0xff] %v269_v47 }
  0x72   :  { %272 = vst [vmem:[#allocation2 + $0x380] sm:$0xff] %v271_v48 }
  0x73   :  { %274 = vst [vmem:[#allocation2 + $0x388] sm:$0xff] %v273_v49 }
  0x74   :  { %276 = vst [vmem:[#allocation2 + $0x390] sm:$0xff] %v275_v50 }
  0x75   :  { %278 = vst [vmem:[#allocation2 + $0x398] sm:$0xff] %v277_v51 }
  0x76   :  { %280 = vst [vmem:[#allocation2 + $0x3a0] sm:$0xff] %v279_v52 }
  0x77   :  { %282 = vst [vmem:[#allocation2 + $0x3a8] sm:$0xff] %v281_v53 }
  0x78   :  { %284 = vst [vmem:[#allocation2 + $0x3b0] sm:$0xff] %v283_v54 }
  0x79   :  { %286 = vst [vmem:[#allocation2 + $0x3b8] sm:$0xff] %v285_v55 }
  0x7a   :  { %288 = vst [vmem:[#allocation2 + $0x3c0] sm:$0xff] %v287_v56 }
  0x7b   :  { %290 = vst [vmem:[#allocation2 + $0x3c8] sm:$0xff] %v289_v57 }
  0x7c   :  { %292 = vst [vmem:[#allocation2 + $0x3d0] sm:$0xff] %v291_v58 }
  0x7d   :  { %294 = vst [vmem:[#allocation2 + $0x3d8] sm:$0xff] %v293_v59 }
  0x7e   :  { %296 = vst [vmem:[#allocation2 + $0x3e0] sm:$0xff] %v295_v60 }
  0x7f   :  { %298 = vst [vmem:[#allocation2 + $0x3e8] sm:$0xff] %v297_v61 }
  0x80   :  { %300 = vst [vmem:[#allocation2 + $0x3f0] sm:$0xff] %v299_v62 }
  0x81   :  { %302 = vst [vmem:[#allocation2 + $0x3f8] sm:$0xff] %v301_v63 }
  0x82   :  { %308 = vsyncadd [#allocation3], 16384  ;;  %v341_v6 = vsel %vm334_vm0, %v332_v2, 0.0  ;;  %v335_v7 = vsel %vm334_vm0, %v330_v3, 0.0  ;;  %v333_v8 = vmul.f32 %v7972_v4, %v7972_v4  ;;  %v331_v9 = vmul.f32 %v7977_v5, %v7977_v5  ;;  %v7043_v17 = vld [vmem:[%s9563_s5 + $0x18] sm:$0xff]  ;;  %v7042_v22 = vld [vmem:[%s9563_s5 + $0x10] sm:$0xff] }
  0x83   :  { %342 = vadd.xlane.f32.xlu1 %v341_v6  ;;  %336 = vadd.xlane.f32.xlu0 %v335_v7  ;;  %v7510_v12 = vmov 64.0   ;;  %v7047_v18 = vld [vmem:[%s9563_s5 + $0x38] sm:$0xff]  ;;  %v7046_v23 = vld [vmem:[%s9563_s5 + $0x30] sm:$0xff]  ;;  %v7041_v30 = vld [vmem:[%s9563_s5 + $0x8] sm:$0xff]  ;;  %vm1091_vm14 = vcmask 130048   ;;  %vm1592_vm15 = vcmask 1043456  }
  0x84   :  { %v344_v10 = vsel %vm334_vm0, %v333_v8, 0.0  ;;  %v338_v11 = vsel %vm334_vm0, %v331_v9, 0.0  ;;  %7302 = vrcp.f32 %v7510_v12  ;;  %v7051_v19 = vld [vmem:[%s9563_s5 + $0x58] sm:$0xff]  ;;  %555 = vmatpush.bf16.msra.mxu0 %v7043_v17  ;;  %598 = vmatpush.bf16.msra.mxu1 %v7047_v18  ;;  %v7050_v24 = vld [vmem:[%s9563_s5 + $0x50] sm:$0xff]  ;;  %v7045_v31 = vld [vmem:[%s9563_s5 + $0x28] sm:$0xff] }
  0x85   :  { %v7055_v21 = vld [vmem:[%s9563_s5 + $0x78] sm:$0xff]  ;;  %641 = vmatpush.bf16.msra.mxu2 %v7051_v19  ;;  %v7054_v26 = vld [vmem:[%s9563_s5 + $0x70] sm:$0xff]  ;;  %v7049_v32 = vld [vmem:[%s9563_s5 + $0x48] sm:$0xff] }
  0x86   :  { %684 = vmatpush.bf16.msra.mxu3 %v7055_v21  ;;  %v7053_v34 = vld [vmem:[%s9563_s5 + $0x68] sm:$0xff]  ;;  %v7040_v36 = vld [vmem:[%s9563_s5] sm:$0xff]  ;;  %v7059_v7 = vld [vmem:[%s9563_s5 + $0x98] sm:$0xff] }
  0x87   :  { %v7044_v37 = vld [vmem:[%s9563_s5 + $0x20] sm:$0xff]  ;;  %v7063_v8 = vld [vmem:[%s9563_s5 + $0xb8] sm:$0xff]  ;;  %v7070_v17 = vld [vmem:[%s9563_s5 + $0xf0] sm:$0xff] }
  0x88   :  { %556 = vmatpush.bf16.msra.mxu0 %v7042_v22  ;;  %599 = vmatpush.bf16.msra.mxu1 %v7046_v23  ;;  %v7048_v38 = vld [vmem:[%s9563_s5 + $0x40] sm:$0xff]  ;;  %v7067_v9 = vld [vmem:[%s9563_s5 + $0xd8] sm:$0xff]  ;;  %v7057_v22 = vld [vmem:[%s9563_s5 + $0x88] sm:$0xff] }
  0x89   :  { %642 = vmatpush.bf16.msra.mxu2 %v7050_v24  ;;  %v7052_v40 = vld [vmem:[%s9563_s5 + $0x60] sm:$0xff]  ;;  %v7071_v12 = vld [vmem:[%s9563_s5 + $0xf8] sm:$0xff]  ;;  %v7061_v23 = vld [vmem:[%s9563_s5 + $0xa8] sm:$0xff] }
  0x8a   :  { %v7303_v13 = vpop.eup %7302  ;;  %685 = vmatpush.bf16.msra.mxu3 %v7054_v26  ;;  %v8060_v63 = vld [vmem:[%s9560_s2] ss:$0 sm:$0xff]  ;;  %v7069_v26 = vld [vmem:[%s9563_s5 + $0xe8] sm:$0xff] }
  0x8b   :  { %345 = vadd.xlane.f32.xlu1 %v344_v10  ;;  %339 = vadd.xlane.f32.xlu0 %v338_v11  ;;  %v348_v14 = vmul.f32 64.0, %v7303_v13  ;;  %vm352_vm1 = vweird.f32 %v7303_v13 }
  0x8c   :  { %557 = vmatpush.bf16.msra.mxu0 %v7041_v30  ;;  %600 = vmatpush.bf16.msra.mxu1 %v7045_v31 }
  0x8d   :  { %v349_v15 = vsub.f32 1.0, %v348_v14  ;;  %643 = vmatpush.bf16.msra.mxu2 %v7049_v32 }
  0x8e   :  { %686 = vmatpush.bf16.msra.mxu3 %v7053_v34  ;;  %v7060_v34 = vld [vmem:[%s9563_s5 + $0xa0] sm:$0xff] }
  0x8f   :  { %v350_v16 = vmul.f32 %v7303_v13, %v349_v15 }
  0x90   :  { %558 = vmatpush.bf16.msra.mxu0 %v7040_v36  ;;  %601 = vmatpush.bf16.msra.mxu1 %v7044_v37  ;;  %v7064_v36 = vld [vmem:[%s9563_s5 + $0xc0] sm:$0xff] }
  0x91   :  { %v351_v20 = vadd.f32 %v7303_v13, %v350_v16  ;;  %644 = vmatpush.bf16.msra.mxu2 %v7048_v38  ;;  %v7066_v16 = vld [vmem:[%s9563_s5 + $0xd0] sm:$0xff]  ;;  %v7068_v37 = vld [vmem:[%s9563_s5 + $0xe0] sm:$0xff] }
  0x92   :  { %687 = vmatpush.bf16.msra.mxu3 %v7052_v40 }
  0x93   :  { %v8008_v25 = vsel %vm352_vm1, %v7303_v13, %v351_v20  ;;  %v7062_v13 = vld [vmem:[%s9563_s5 + $0xb0] sm:$0xff]  ;;  %vm1396_vm1 = vcmask 64512  }
  0x94   :  { %727 = vmatpush.bf16.msrb.mxu0 %v7059_v7  ;;  %770 = vmatpush.bf16.msrb.mxu1 %v7063_v8 }
  0x95   :  { %813 = vmatpush.bf16.msrb.mxu2 %v7067_v9 }
  0x96   :  { %856 = vmatpush.bf16.msrb.mxu3 %v7071_v12 }
  0x98   :  { %771 = vmatpush.bf16.msrb.mxu1 %v7062_v13 }
  0x99   :  { %814 = vmatpush.bf16.msrb.mxu2 %v7066_v16 }
  0x9a   :  { %857 = vmatpush.bf16.msrb.mxu3 %v7070_v17 }
  0x9c   :  { %772 = vmatpush.bf16.msrb.mxu1 %v7061_v23 }
  0x9e   :  { %858 = vmatpush.bf16.msrb.mxu3 %v7069_v26 }
  0xa0   :  { %773 = vmatpush.bf16.msrb.mxu1 %v7060_v34 }
  0xa2   :  { %859 = vmatpush.bf16.msrb.mxu3 %v7068_v37 }
  0xf6   :  { %v343_v27 = vpop.xlane.xlu1 %342  ;;  %v337_v28 = vpop.xlane.xlu0 %336 }
  0xf7   :  { %v354_v29 = vmul.f32 %v8008_v25, %v337_v28  ;;  %v356_v33 = vmul.f32 %v8008_v25, %v343_v27 }
  0xf9   :  { %v358_v35 = vadd.f32 1e-06, %v354_v29  ;;  %v8036_v39 = vadd.f32 1e-06, %v356_v33  ;;  %v7056_v33 = vld [vmem:[%s9563_s5 + $0x80] sm:$0xff] }
  0xfb   :  { %7304 = vrsqrt.f32 %v358_v35  ;;  %vm368_vm3 = vweird.f32 %v358_v35  ;;  %vm388_vm10 = vweird.f32 %v8036_v39 }
  0xfc   :  { %7306 = vrsqrt.f32 %v8036_v39 }
  0xfe   :  { %v346_v41 = vpop.xlane.xlu1 %345  ;;  %v340_v42 = vpop.xlane.xlu0 %339 }
  0xff   :  { %v357_v43 = vmul.f32 %v8008_v25, %v346_v41  ;;  %v355_v44 = vmul.f32 %v8008_v25, %v340_v42 }
 0x101   :  { %v8044_v45 = vadd.f32 1e-06, %v357_v43  ;;  %v359_v46 = vadd.f32 1e-06, %v355_v44  ;;  %v7305_v47 = vpop.eup %7304 }
 0x102   :  { %v363_v48 = vmul.f32 %v7305_v47, %v358_v35  ;;  %v8047_v50 = vpop.eup %7306  ;;  %vm369_vm2 = vweird.f32 %v7305_v47 }
 0x103   :  { %7308 = vrsqrt.f32 %v8044_v45  ;;  %v383_v53 = vmul.f32 %v8047_v50, %v8036_v39  ;;  %vm370_vm4 = vmor %vm368_vm3, %vm369_vm2  ;;  %vm378_vm6 = vweird.f32 %v359_v46  ;;  %vm398_vm8 = vweird.f32 %v8044_v45 }
 0x104   :  { %7310 = vrsqrt.f32 %v359_v46  ;;  %v364_v49 = vmul.f32 %v7305_v47, %v363_v48  ;;  %vm389_vm11 = vweird.f32 %v8047_v50 }
 0x105   :  { %v384_v60 = vmul.f32 %v8047_v50, %v383_v53  ;;  %vm8116_vm13 = vmor %vm388_vm10, %vm389_vm11  ;;  %v7074_v53 = vld [vmem:[%s9563_s5 + $0x110] sm:$0xff] }
 0x106   :  { %v365_v51 = vmul.f32 0.5, %v364_v49  ;;  %v7075_v49 = vld [vmem:[%s9563_s5 + $0x118] sm:$0xff] }
 0x107   :  { %v385_v10 = vmul.f32 0.5, %v384_v60  ;;  %v7085_v60 = vld [vmem:[%s9563_s5 + $0x168] sm:$0xff] }
 0x108   :  { %v366_v54 = vsub.f32 1.5, %v365_v51  ;;  %v7083_v51 = vld [vmem:[%s9563_s5 + $0x158] sm:$0xff] }
 0x109   :  { %v8049_v52 = vpop.eup %7308  ;;  %v386_v19 = vsub.f32 1.5, %v385_v10 }
 0x10a   :  { %v7311_v55 = vpop.eup %7310  ;;  %v393_v56 = vmul.f32 %v8049_v52, %v8044_v45  ;;  %v367_v57 = vmul.f32 %v7305_v47, %v366_v54  ;;  %vm399_vm9 = vweird.f32 %v8049_v52  ;;  %v7078_v54 = vld [vmem:[%s9563_s5 + $0x130] sm:$0xff] }
 0x10b   :  { %v373_v58 = vmul.f32 %v7311_v55, %v359_v46  ;;  %vm379_vm5 = vweird.f32 %v7311_v55  ;;  %vm8110_vm12 = vmor %vm398_vm8, %vm399_vm9  ;;  %v387_v30 = vmul.f32 %v8047_v50, %v386_v19 }
 0x10c   :  { %v394_v59 = vmul.f32 %v8049_v52, %v393_v56  ;;  %v371_v61 = vsel %vm370_vm4, %v7305_v47, %v367_v57  ;;  %vm380_vm7 = vmor %vm378_vm6, %vm379_vm5  ;;  %v7086_v56 = vld [vmem:[%s9563_s5 + $0x170] sm:$0xff]  ;;  %v7073_v57 = vld [vmem:[%s9563_s5 + $0x108] sm:$0xff] }
 0x10d   :  { %v374_v62 = vmul.f32 %v7311_v55, %v373_v58  ;;  %v402_v6 = vmul.f32 %v371_v61, %v7963_v1  ;;  %v7058_v1 = vld [vmem:[%s9563_s5 + $0x90] sm:$0xff]  ;;  %v391_v40 = vsel %vm8116_vm13, %v8047_v50, %v387_v30  ;;  %v7079_v50 = vld [vmem:[%s9563_s5 + $0x138] sm:$0xff]  ;;  %v7077_v58 = vld [vmem:[%s9563_s5 + $0x128] sm:$0xff] }
 0x10e   :  { %v395_v2 = vmul.f32 0.5, %v394_v59  ;;  %728 = vmatpush.bf16.msrb.mxu0 %v7058_v1  ;;  %v404_v43 = vmul.f32 %v391_v40, %v7958_v0  ;;  %v7081_v59 = vld [vmem:[%s9563_s5 + $0x148] sm:$0xff]  ;;  %v7072_v61 = vld [vmem:[%s9563_s5 + $0x100] sm:$0xff] }
 0x10f   :  { %v375_v3 = vmul.f32 0.5, %v374_v62  ;;  %v407_v18 = vmul.f32 %v8060_v63, %v402_v6  ;;  %v7076_v62 = vld [vmem:[%s9563_s5 + $0x120] sm:$0xff] }
 0x110   :  { %v396_v14 = vsub.f32 1.5, %v395_v2  ;;  %v409_v44 = vmul.f32 %v8060_v63, %v404_v43  ;;  %v7084_v2 = vld [vmem:[%s9563_s5 + $0x160] sm:$0xff] }
 0x111   :  { %v376_v11 = vsub.f32 1.5, %v375_v3  ;;  %v411_v27 = vpack.c.bf16 %v407_v18, %v407_v18 }
 0x112   :  { %v397_v24 = vmul.f32 %v8049_v52, %v396_v14  ;;  %729 = vmatpush.bf16.msrb.mxu0 %v7057_v22  ;;  %v413_v46 = vpack.c.bf16 %v409_v44, %v409_v44 }
 0x113   :  { %v377_v15 = vmul.f32 %v7311_v55, %v376_v11  ;;  %v515_v38 = vunpack.c.l.b16 %v411_v27 }
 0x114   :  { %v401_v35 = vsel %vm8110_vm12, %v8049_v52, %v397_v24  ;;  %v517_v0 = vunpack.c.l.b16 %v413_v46  ;;  %v7087_v52 = vld [vmem:[%s9563_s5 + $0x178] sm:$0xff] }
 0x115   :  { %v381_v20 = vsel %vm380_vm7, %v7311_v55, %v377_v15  ;;  %v405_v41 = vmul.f32 %v401_v35, %v7972_v4  ;;  %v7082_v55 = vld [vmem:[%s9563_s5 + $0x150] sm:$0xff] }
 0x116   :  { %v403_v21 = vmul.f32 %v381_v20, %v7977_v5  ;;  %v7065_v5 = vld [vmem:[%s9563_s5 + $0xc8] sm:$0xff]  ;;  %730 = vmatpush.bf16.msrb.mxu0 %v7056_v33 }
 0x117   :  { %815 = vmatpush.bf16.msrb.mxu2 %v7065_v5  ;;  %v410_v4 = vmul.f32 %v8060_v63, %v405_v41 }
 0x118   :  { %v408_v29 = vmul.f32 %v8060_v63, %v403_v21  ;;  %v7080_v63 = vld [vmem:[%s9563_s5 + $0x140] sm:$0xff] }
 0x119   :  { %v414_v45 = vpack.c.bf16 %v410_v4, %v410_v4 }
 0x11a   :  { %v412_v32 = vpack.c.bf16 %v408_v29, %v408_v29 }
 0x11b   :  { %816 = vmatpush.bf16.msrb.mxu2 %v7064_v36  ;;  %v518_v47 = vunpack.c.l.b16 %v414_v45 }
 0x11c   :  { %v516_v39 = vunpack.c.l.b16 %v412_v32 }
 0x11d   :  { %v520_v48 = vpack.c.b16 %v518_v47, %v517_v0 }
 0x11e   :  { %v8139_v42 = vpack.c.b16 %v516_v39, %v515_v38 }
 0x120   :  { %5735 = vmatmul.msk.bf16.vlgmr.msra.gmra.mxu0 %vm334_vm0, %v8139_v42  ;;  %5753 = vmatmul.msk.bf16.vlgmr.msra.gmra.mxu1 %vm334_vm0, %v8139_v42 }
 0x121   :  { %5771 = vmatmul.msk.bf16.vlgmr.msra.gmra.mxu2 %vm334_vm0, %v8139_v42  ;;  %5789 = vmatmul.msk.bf16.vlgmr.msra.gmra.mxu3 %vm334_vm0, %v8139_v42 }
 0x122   :  { %899 = vmatpush.bf16.msra.mxu0 %v7075_v49  ;;  %942 = vmatpush.bf16.msra.mxu1 %v7079_v50 }
 0x123   :  { %985 = vmatpush.bf16.msra.mxu2 %v7083_v51  ;;  %1028 = vmatpush.bf16.msra.mxu3 %v7087_v52 }
 0x126   :  { %900 = vmatpush.bf16.msra.mxu0 %v7074_v53  ;;  %943 = vmatpush.bf16.msra.mxu1 %v7078_v54 }
 0x127   :  { %986 = vmatpush.bf16.msra.mxu2 %v7082_v55  ;;  %1029 = vmatpush.bf16.msra.mxu3 %v7086_v56 }
 0x12a   :  { %901 = vmatpush.bf16.msra.mxu0 %v7073_v57  ;;  %944 = vmatpush.bf16.msra.mxu1 %v7077_v58 }
 0x12b   :  { %987 = vmatpush.bf16.msra.mxu2 %v7081_v59  ;;  %1030 = vmatpush.bf16.msra.mxu3 %v7085_v60 }
 0x12e   :  { %902 = vmatpush.bf16.msra.mxu0 %v7072_v61  ;;  %945 = vmatpush.bf16.msra.mxu1 %v7076_v62 }
 0x12f   :  { %988 = vmatpush.bf16.msra.mxu2 %v7080_v63  ;;  %1031 = vmatpush.bf16.msra.mxu3 %v7084_v2 }
 0x130   :  { %5736 = vmatmul.msk.bf16.gmra.mxu0 %vm334_vm0, %v520_v48  ;;  %5754 = vmatmul.msk.bf16.gmra.mxu1 %vm334_vm0, %v520_v48 }
 0x131   :  { %5772 = vmatmul.msk.bf16.gmra.mxu2 %vm334_vm0, %v520_v48  ;;  %5790 = vmatmul.msk.bf16.gmra.mxu3 %vm334_vm0, %v520_v48 }
 0x140   :  { %5807 = vmatmul.msk.bf16.vlgmr.msrb.gmra.mxu0 %vm334_vm0, %v8139_v42  ;;  %5825 = vmatmul.msk.bf16.vlgmr.msrb.gmra.mxu1 %vm334_vm0, %v8139_v42 }
 0x141   :  { %5843 = vmatmul.msk.bf16.vlgmr.msrb.gmra.mxu2 %vm334_vm0, %v8139_v42  ;;  %5861 = vmatmul.msk.bf16.vlgmr.msrb.gmra.mxu3 %vm334_vm0, %v8139_v42 }
 0x150   :  { %5808 = vmatmul.msk.bf16.gmra.mxu0 %vm334_vm0, %v520_v48  ;;  %5826 = vmatmul.msk.bf16.gmra.mxu1 %vm334_vm0, %v520_v48 }
 0x151   :  { %5844 = vmatmul.msk.bf16.gmra.mxu2 %vm334_vm0, %v520_v48  ;;  %5862 = vmatmul.msk.bf16.gmra.mxu3 %vm334_vm0, %v520_v48 }
 0x160   :  { %5879 = vmatmul.msk.bf16.vlgmr.msra.gmra.mxu0 %vm334_vm0, %v8139_v42  ;;  %5897 = vmatmul.msk.bf16.vlgmr.msra.gmra.mxu1 %vm334_vm0, %v8139_v42 }
 0x161   :  { %5915 = vmatmul.msk.bf16.vlgmr.msra.gmra.mxu2 %vm334_vm0, %v8139_v42  ;;  %5933 = vmatmul.msk.bf16.vlgmr.msra.gmra.mxu3 %vm334_vm0, %v8139_v42 }
 0x170   :  { %5880 = vmatmul.msk.bf16.gmra.mxu0 %vm334_vm0, %v520_v48  ;;  %5898 = vmatmul.msk.bf16.gmra.mxu1 %vm334_vm0, %v520_v48 }
 0x171   :  { %5916 = vmatmul.msk.bf16.gmra.mxu2 %vm334_vm0, %v520_v48  ;;  %5934 = vmatmul.msk.bf16.gmra.mxu3 %vm334_vm0, %v520_v48 }
 0x19d   :  { %v560_v3 = vpop.f32.mrf.mxu0  ;;  %v8228_v6 = vpop.f32.mrf.mxu1 }
 0x19e   :  { %v1043_v30 = vpack.c.bf16 %v560_v3, %v560_v3  ;;  %v1047_v51 = vpack.c.bf16 %v8228_v6, %v8228_v6 }
 0x1a4   :  { %v8230_v7 = vpop.f32.mrf.mxu2  ;;  %v8232_v8 = vpop.f32.mrf.mxu3 }
 0x1a5   :  { %v562_v9 = vpop.f32.mrf.mxu0  ;;  %v8234_v10 = vpop.f32.mrf.mxu1 }
 0x1a6   :  { %v1044_v41 = vpack.c.bf16 %v562_v9, %v562_v9  ;;  %v1048_v63 = vpack.c.bf16 %v8234_v10, %v8234_v10  ;;  %v1051_v10 = vpack.c.bf16 %v8230_v7, %v8230_v7 }
 0x1ac   :  { %v8236_v11 = vpop.f32.mrf.mxu2  ;;  %v8238_v12 = vpop.f32.mrf.mxu3 }
 0x1ad   :  { %v565_v1 = vpop.f32.mrf.mxu0  ;;  %v8240_v13 = vpop.f32.mrf.mxu1  ;;  %v1052_v7 = vpack.c.bf16 %v8236_v11, %v8236_v11  ;;  %v1055_v11 = vpack.c.bf16 %v8232_v8, %v8232_v8 }
 0x1ae   :  { %v1045_v52 = vpack.c.bf16 %v565_v1, %v565_v1 }
 0x1b4   :  { %v8242_v14 = vpop.f32.mrf.mxu2  ;;  %v8248_v17 = vpop.f32.mrf.mxu3 }
 0x1b5   :  { %v8244_v15 = vpop.f32.mrf.mxu0  ;;  %v8246_v16 = vpop.f32.mrf.mxu1 }
 0x1b6   :  { %v1046_v2 = vpack.c.bf16 %v8244_v15, %v8244_v15  ;;  %v1049_v15 = vpack.c.bf16 %v8240_v13, %v8240_v13  ;;  %v1050_v13 = vpack.c.bf16 %v8246_v16, %v8246_v16  ;;  %v1053_v16 = vpack.c.bf16 %v8242_v14, %v8242_v14 }
 0x1bc   :  { %v8250_v18 = vpop.f32.mrf.mxu2  ;;  %v8252_v23 = vpop.f32.mrf.mxu3 }
 0x1bd   :  { %v732_v19 = vpop.f32.mrf.mxu0  ;;  %v775_v20 = vpop.f32.mrf.mxu1  ;;  %v1054_v8 = vpack.c.bf16 %v8250_v18, %v8250_v18 }
 0x1be   :  { %v1059_v21 = vpack.c.bf16 %v732_v19, %v732_v19  ;;  %v1063_v22 = vpack.c.bf16 %v775_v20, %v775_v20 }
 0x1c0   :  { %v1096_v24 = vsel %vm1091_vm14, %v1059_v21, 0  ;;  %v1172_v5 = vsel %vm1091_vm14, %v1063_v22, 0 }
 0x1c1   :  { %1105 = vmatpush.bf16.xpose.msrb.mxu0 %v1096_v24 }
 0x1c4   :  { %v818_v26 = vpop.f32.mrf.mxu2  ;;  %v861_v36 = vpop.f32.mrf.mxu3 }
 0x1c5   :  { %v1067_v27 = vpack.c.bf16 %v818_v26, %v818_v26  ;;  %v734_v28 = vpop.f32.mrf.mxu0  ;;  %v777_v29 = vpop.f32.mrf.mxu1  ;;  %v1071_v46 = vpack.c.bf16 %v861_v36, %v861_v36 }
 0x1c6   :  { %v1060_v31 = vpack.c.bf16 %v734_v28, %v734_v28  ;;  %v1064_v32 = vpack.c.bf16 %v777_v29, %v777_v29 }
 0x1c7   :  { %v1248_v33 = vsel %vm1091_vm14, %v1067_v27, 0  ;;  %v1324_v55 = vsel %vm1091_vm14, %v1071_v46, 0 }
 0x1c8   :  { %5935 = vmatmul.msk.bf16.vlgmr.msrb.gmra.mxu0 %vm1091_vm14, %v1043_v30  ;;  %v1115_v34 = vsel %vm1091_vm14, %v1060_v31, 0  ;;  %v1191_v35 = vsel %vm1091_vm14, %v1064_v32, 0 }
 0x1c9   :  { %1181 = vmatpush.bf16.xpose.msra.mxu0 %v1172_v5  ;;  %1124 = vmatpush.bf16.xpose.msrb.mxu1 %v1115_v34 }
 0x1cc   :  { %v820_v37 = vpop.f32.mrf.mxu2  ;;  %v863_v47 = vpop.f32.mrf.mxu3 }
 0x1cd   :  { %v1068_v38 = vpack.c.bf16 %v820_v37, %v820_v37  ;;  %v737_v39 = vpop.f32.mrf.mxu0  ;;  %v780_v40 = vpop.f32.mrf.mxu1  ;;  %v1072_v59 = vpack.c.bf16 %v863_v47, %v863_v47 }
 0x1ce   :  { %v1061_v42 = vpack.c.bf16 %v737_v39, %v737_v39  ;;  %v1065_v43 = vpack.c.bf16 %v780_v40, %v780_v40  ;;  %v1056_v39 = vpack.c.bf16 %v8238_v12, %v8238_v12 }
 0x1cf   :  { %v1267_v45 = vsel %vm1091_vm14, %v1068_v38, 0  ;;  %v1343_v6 = vsel %vm1091_vm14, %v1072_v59, 0  ;;  %v317_v59 = vld [vmem:[%s9559_s1 + $0x20] sm:$0xff] }
 0x1d0   :  { %v1134_v4 = vsel %vm1091_vm14, %v1061_v42, 0  ;;  %v1210_v44 = vsel %vm1091_vm14, %v1065_v43, 0  ;;  %5936 = vmatmul.msk.bf16.vlgmr.msrb.gmra.mxu1 %vm1091_vm14, %v1044_v41  ;;  %v1057_v43 = vpack.c.bf16 %v8248_v17, %v8248_v17 }
 0x1d1   :  { %1257 = vmatpush.bf16.xpose.msrb.mxu0 %v1248_v33  ;;  %1200 = vmatpush.bf16.xpose.msra.mxu1 %v1191_v35 }
 0x1d2   :  { %1143 = vmatpush.bf16.xpose.msrb.mxu2 %v1134_v4 }
 0x1d4   :  { %v823_v0 = vpop.f32.mrf.mxu2  ;;  %v866_v3 = vpop.f32.mrf.mxu3 }
 0x1d5   :  { %v1069_v48 = vpack.c.bf16 %v823_v0, %v823_v0  ;;  %v739_v49 = vpop.f32.mrf.mxu0  ;;  %v782_v50 = vpop.f32.mrf.mxu1  ;;  %v1073_v1 = vpack.c.bf16 %v866_v3, %v866_v3  ;;  %v313_v0 = vld [vmem:[%s9559_s1] sm:$0xff] }
 0x1d6   :  { %v1062_v53 = vpack.c.bf16 %v739_v49, %v739_v49  ;;  %v1066_v54 = vpack.c.bf16 %v782_v50, %v782_v50 }
 0x1d7   :  { %v1286_v58 = vsel %vm1091_vm14, %v1069_v48, 0  ;;  %v1362_v21 = vsel %vm1091_vm14, %v1073_v1, 0 }
 0x1d8   :  { %5939 = vmatmul.msk.bf16.vlgmr.msra.gmra.mxu0 %vm1091_vm14, %v1047_v51  ;;  %v1153_v56 = vsel %vm1091_vm14, %v1062_v53, 0  ;;  %v1229_v57 = vsel %vm1091_vm14, %v1066_v54, 0 }
 0x1d9   :  { %1276 = vmatpush.bf16.xpose.msrb.mxu1 %v1267_v45  ;;  %5937 = vmatmul.msk.bf16.vlgmr.msrb.gmra.mxu2 %vm1091_vm14, %v1045_v52  ;;  %v314_v52 = vld [vmem:[%s9559_s1 + $0x8] sm:$0xff] }
 0x1da   :  { %1219 = vmatpush.bf16.xpose.msra.mxu2 %v1210_v44  ;;  %1333 = vmatpush.bf16.xpose.msra.mxu0 %v1324_v55  ;;  %v1058_v44 = vpack.c.bf16 %v8252_v23, %v8252_v23 }
 0x1db   :  { %1162 = vmatpush.bf16.xpose.msrb.mxu3 %v1153_v56 }
 0x1dc   :  { %v825_v60 = vpop.f32.mrf.mxu2  ;;  %v868_v24 = vpop.f32.mrf.mxu3 }
 0x1dd   :  { %v1070_v61 = vpack.c.bf16 %v825_v60, %v825_v60  ;;  %v904_v62 = vpop.f32.mrf.mxu0  ;;  %v947_v5 = vpop.f32.mrf.mxu1  ;;  %v1074_v26 = vpack.c.bf16 %v868_v24, %v868_v24 }
 0x1de   :  { %v1075_v19 = vpack.c.bf16 %v904_v62, %v904_v62  ;;  %v1079_v31 = vpack.c.bf16 %v947_v5, %v947_v5 }
 0x1df   :  { %v1305_v9 = vsel %vm1091_vm14, %v1070_v61, 0  ;;  %v1381_v29 = vsel %vm1091_vm14, %v1074_v26, 0 }
 0x1e0   :  { %5940 = vmatmul.msk.bf16.vlgmr.msra.gmra.mxu1 %vm1091_vm14, %v1048_v63  ;;  %v1594_v22 = vsel %vm1592_vm15, %v1075_v19, 0  ;;  %v1670_v34 = vsel %vm1592_vm15, %v1079_v31, 0 }
 0x1e1   :  { %1352 = vmatpush.bf16.xpose.msra.mxu1 %v1343_v6 }
 0x1e2   :  { %1295 = vmatpush.bf16.xpose.msrb.mxu2 %v1286_v58  ;;  %5938 = vmatmul.msk.bf16.vlgmr.msrb.gmra.mxu3 %vm1091_vm14, %v1046_v2  ;;  %v315_v2 = vld [vmem:[%s9559_s1 + $0x10] sm:$0xff] }
 0x1e3   :  { %1238 = vmatpush.bf16.xpose.msra.mxu3 %v1229_v57 }
 0x1e4   :  { %v8320_v46 = vpop.f32.mrf.mxu2  ;;  %v8322_v47 = vpop.f32.mrf.mxu3 }
 0x1e5   :  { %v906_v20 = vpop.f32.mrf.mxu0  ;;  %v949_v33 = vpop.f32.mrf.mxu1 }
 0x1e6   :  { %v1076_v27 = vpack.c.bf16 %v906_v20, %v906_v20  ;;  %v1080_v37 = vpack.c.bf16 %v949_v33, %v949_v33 }
 0x1e8   :  { %5943 = vmatmul.msk.bf16.vlgmr.msrb.gmra.mxu0 %vm1091_vm14, %v1051_v10  ;;  %v1613_v30 = vsel %vm1592_vm15, %v1076_v27, 0  ;;  %v1689_v41 = vsel %vm1592_vm15, %v1080_v37, 0  ;;  %v318_v10 = vld [vmem:[%s9559_s1 + $0x28] sm:$0xff]  ;;  %v320_v37 = vld [vmem:[%s9559_s1 + $0x38] sm:$0xff] }
 0x1e9   :  { %5941 = vmatmul.msk.bf16.vlgmr.msra.gmra.mxu2 %vm1091_vm14, %v1049_v15  ;;  %1603 = vmatpush.bf16.msrb.mxu0 %v1594_v22  ;;  %v316_v15 = vld [vmem:[%s9559_s1 + $0x18] sm:$0xff] }
 0x1ea   :  { %1371 = vmatpush.bf16.xpose.msra.mxu2 %v1362_v21 }
 0x1eb   :  { %1314 = vmatpush.bf16.xpose.msrb.mxu3 %v1305_v9 }
 0x1ec   :  { %v8324_v17 = vpop.f32.mrf.mxu2  ;;  %v8331_v23 = vpop.f32.mrf.mxu3 }
 0x1ed   :  { %v909_v28 = vpop.f32.mrf.mxu0  ;;  %v952_v14 = vpop.f32.mrf.mxu1 }
 0x1ee   :  { %v1077_v32 = vpack.c.bf16 %v909_v28, %v909_v28  ;;  %v1081_v42 = vpack.c.bf16 %v952_v14, %v952_v14  ;;  %v321_v28 = vld [vmem:[%s9559_s1 + $0x40] sm:$0xff] }
 0x1f0   :  { %5944 = vmatmul.msk.bf16.vlgmr.msrb.gmra.mxu1 %vm1091_vm14, %v1052_v7  ;;  %v1632_v35 = vsel %vm1592_vm15, %v1077_v32, 0  ;;  %v1708_v12 = vsel %vm1592_vm15, %v1081_v42, 0 }
 0x1f1   :  { %1622 = vmatpush.bf16.msrb.mxu1 %v1613_v30 }
 0x1f2   :  { %5942 = vmatmul.msk.bf16.vlgmr.msra.gmra.mxu3 %vm1091_vm14, %v1050_v13 }
 0x1f3   :  { %1390 = vmatpush.bf16.xpose.msra.mxu3 %v1381_v29  ;;  %v319_v29 = vld [vmem:[%s9559_s1 + $0x30] sm:$0xff] }
 0x1f4   :  { %v8335_v51 = vpop.f32.mrf.mxu2  ;;  %v8344_v57 = vpop.f32.mrf.mxu3 }
 0x1f5   :  { %v911_v36 = vpop.f32.mrf.mxu0  ;;  %v954_v18 = vpop.f32.mrf.mxu1 }
 0x1f6   :  { %v1078_v38 = vpack.c.bf16 %v911_v36, %v911_v36  ;;  %v1082_v4 = vpack.c.bf16 %v954_v18, %v954_v18  ;;  %v322_v36 = vld [vmem:[%s9559_s1 + $0x48] sm:$0xff]  ;;  %v323_v18 = vld [vmem:[%s9559_s1 + $0x50] sm:$0xff] }
 0x1f8   :  { %5947 = vmatmul.msk.bf16.vlgmr.msra.gmra.mxu0 %vm1091_vm14, %v1055_v11  ;;  %v1651_v40 = vsel %vm1592_vm15, %v1078_v38, 0  ;;  %v1727_v45 = vsel %vm1592_vm15, %v1082_v4, 0 }
 0x1f9   :  { %5945 = vmatmul.msk.bf16.vlgmr.msrb.gmra.mxu2 %vm1091_vm14, %v1053_v16  ;;  %1679 = vmatpush.bf16.msra.mxu0 %v1670_v34 }
 0x1fa   :  { %1641 = vmatpush.bf16.msrb.mxu2 %v1632_v35 }
 0x1fc   :  { %v8346_v58 = vpop.f32.mrf.mxu2  ;;  %v8358_v3 = vpop.f32.mrf.mxu3 }
 0x200   :  { %5948 = vmatmul.msk.bf16.vlgmr.msra.gmra.mxu1 %vm1091_vm14, %v1056_v39 }
 0x201   :  { %1698 = vmatpush.bf16.msra.mxu1 %v1689_v41 }
 0x202   :  { %5946 = vmatmul.msk.bf16.vlgmr.msrb.gmra.mxu3 %vm1091_vm14, %v1054_v8 }
 0x203   :  { %1660 = vmatpush.bf16.msrb.mxu3 %v1651_v40 }
 0x209   :  { %5949 = vmatmul.msk.bf16.vlgmr.msra.gmra.mxu2 %vm1091_vm14, %v1057_v43 }
 0x20a   :  { %1717 = vmatpush.bf16.msra.mxu2 %v1708_v12  ;;  %v325_v12 = vld [vmem:[%s9559_s1 + $0x60] sm:$0xff] }
 0x212   :  { %5950 = vmatmul.msk.bf16.vlgmr.msra.gmra.mxu3 %vm1091_vm14, %v1058_v44 }
 0x213   :  { %1736 = vmatpush.bf16.msra.mxu3 %v1727_v45 }
 0x245   :  { %v1107_v48 = vpop.f32.mrf.mxu0 }
 0x246   :  { %v8329_v49 = vadd.f32 %v1107_v48, %v313_v0 }
 0x248   :  { %v1397_v50 = vsel %vm1396_vm1, %v8329_v49, -inf }
 0x249   :  { %1398 = vmax.xlane.f32.xlu2 %v1397_v50 }
 0x24d   :  { %v1109_v53 = vpop.f32.mrf.mxu0  ;;  %v1126_v54 = vpop.f32.mrf.mxu1 }
 0x24e   :  { %v8340_v55 = vadd.f32 %v1126_v54, %v314_v52  ;;  %v326_v54 = vld [vmem:[%s9559_s1 + $0x68] sm:$0xff] }
 0x250   :  { %v1400_v56 = vsel %vm1396_vm1, %v8340_v55, -inf }
 0x251   :  { %1401 = vmax.xlane.f32.xlu2 %v1400_v56  ;;  %v324_v56 = vld [vmem:[%s9559_s1 + $0x58] sm:$0xff] }
 0x255   :  { %v1128_v60 = vpop.f32.mrf.mxu1  ;;  %v1183_v61 = vpop.f32.mrf.mxu0 }
 0x256   :  { %v8351_v62 = vadd.f32 %v1183_v61, %v317_v59 }
 0x258   :  { %v1409_v63 = vsel %vm1396_vm1, %v8351_v62, -inf }
 0x259   :  { %1410 = vmax.xlane.f32.xlu2 %v1409_v63 }
 0x25c   :  { %v1145_v6 = vpop.f32.mrf.mxu2 }
 0x25d   :  { %v8360_v9 = vadd.f32 %v1145_v6, %v315_v2  ;;  %v1185_v1 = vpop.f32.mrf.mxu0  ;;  %v1202_v19 = vpop.f32.mrf.mxu1 }
 0x25e   :  { %v8370_v21 = vadd.f32 %v1202_v19, %v318_v10  ;;  %v327_v19 = vld [vmem:[%s9559_s1 + $0x70] sm:$0xff] }
 0x25f   :  { %v1403_v20 = vsel %vm1396_vm1, %v8360_v9, -inf }
 0x260   :  { %1404 = vmax.xlane.f32.xlu0 %v1403_v20  ;;  %v1412_v7 = vsel %vm1396_vm1, %v8370_v21, -inf }
 0x264   :  { %v1147_v22 = vpop.f32.mrf.mxu2 }
 0x265   :  { %v1164_v24 = vpop.f32.mrf.mxu3  ;;  %v1204_v26 = vpop.f32.mrf.mxu1 }
 0x266   :  { %v8372_v5 = vadd.f32 %v1164_v24, %v316_v15  ;;  %v1259_v27 = vpop.f32.mrf.mxu0 }
 0x267   :  { %v8384_v30 = vadd.f32 %v1259_v27, %v321_v28 }
 0x268   :  { %v1406_v13 = vsel %vm1396_vm1, %v8372_v5, -inf  ;;  %1413 = vmax.xlane.f32.xlu0 %v1412_v7 }
 0x269   :  { %1407 = vmax.xlane.f32.xlu1 %v1406_v13  ;;  %v1421_v35 = vsel %vm1396_vm1, %v8384_v30, -inf }
 0x26c   :  { %v1221_v32 = vpop.f32.mrf.mxu2 }
 0x26d   :  { %v1166_v31 = vpop.f32.mrf.mxu3  ;;  %v8386_v33 = vadd.f32 %v1221_v32, %v319_v29  ;;  %v1278_v16 = vpop.f32.mrf.mxu1 }
 0x26e   :  { %v1261_v11 = vpop.f32.mrf.mxu0  ;;  %v8398_v38 = vadd.f32 %v1278_v16, %v322_v36 }
 0x26f   :  { %v1415_v34 = vsel %vm1396_vm1, %v8386_v33, -inf }
 0x270   :  { %1422 = vmax.xlane.f32.xlu0 %v1421_v35  ;;  %v1424_v42 = vsel %vm1396_vm1, %v8398_v38, -inf }
 0x271   :  { %1416 = vmax.xlane.f32.xlu1 %v1415_v34  ;;  %v328_v34 = vld [vmem:[%s9559_s1 + $0x78] sm:$0xff] }
 0x274   :  { %v1223_v39 = vpop.f32.mrf.mxu2 }
 0x275   :  { %v1240_v8 = vpop.f32.mrf.mxu3  ;;  %v1280_v40 = vpop.f32.mrf.mxu1 }
 0x276   :  { %v8400_v14 = vadd.f32 %v1240_v8, %v320_v37  ;;  %v1335_v41 = vpop.f32.mrf.mxu0 }
 0x277   :  { %v8412_v4 = vadd.f32 %v1335_v41, %v325_v12 }
 0x278   :  { %v1418_v43 = vsel %vm1396_vm1, %v8400_v14, -inf }
 0x279   :  { %1425 = vmax.xlane.f32.xlu1 %v1424_v42  ;;  %1419 = vmax.xlane.f32.xlu2 %v1418_v43  ;;  %v1433_v52 = vsel %vm1396_vm1, %v8412_v4, -inf }
 0x27c   :  { %v1297_v45 = vpop.f32.mrf.mxu2 }
 0x27d   :  { %v1242_v44 = vpop.f32.mrf.mxu3  ;;  %v8414_v0 = vadd.f32 %v1297_v45, %v323_v18  ;;  %v1354_v50 = vpop.f32.mrf.mxu1 }
 0x27e   :  { %v1337_v48 = vpop.f32.mrf.mxu0  ;;  %v8426_v59 = vadd.f32 %v1354_v50, %v326_v54 }
 0x27f   :  { %v1427_v53 = vsel %vm1396_vm1, %v8414_v0, -inf }
 0x280   :  { %v1436_v1 = vsel %vm1396_vm1, %v8426_v59, -inf }
 0x281   :  { %1434 = vmax.xlane.f32.xlu1 %v1433_v52  ;;  %1428 = vmax.xlane.f32.xlu2 %v1427_v53 }
 0x284   :  { %v1299_v60 = vpop.f32.mrf.mxu2 }
 0x285   :  { %v1316_v61 = vpop.f32.mrf.mxu3  ;;  %v1356_v2 = vpop.f32.mrf.mxu1 }
 0x286   :  { %v8428_v63 = vadd.f32 %v1316_v61, %v324_v56 }
 0x288   :  { %v1430_v6 = vsel %vm1396_vm1, %v8428_v63, -inf }
 0x289   :  { %1431 = vmax.xlane.f32.xlu0 %v1430_v6  ;;  %1437 = vmax.xlane.f32.xlu2 %v1436_v1 }
 0x28c   :  { %v1373_v10 = vpop.f32.mrf.mxu2 }
 0x28d   :  { %v1318_v20 = vpop.f32.mrf.mxu3  ;;  %v8437_v15 = vadd.f32 %v1373_v10, %v327_v19 }
 0x28f   :  { %v1439_v22 = vsel %vm1396_vm1, %v8437_v15, -inf }
 0x291   :  { %1440 = vmax.xlane.f32.xlu2 %v1439_v22 }
 0x294   :  { %v1375_v24 = vpop.f32.mrf.mxu2 }
 0x295   :  { %v1392_v26 = vpop.f32.mrf.mxu3 }
 0x296   :  { %v8450_v35 = vadd.f32 %v1392_v26, %v328_v34 }
 0x298   :  { %v1442_v39 = vsel %vm1396_vm1, %v8450_v35, -inf }
 0x29d   :  { %v1394_v27 = vpop.f32.mrf.mxu3 }
 0x2bc   :  { %v1399_v7 = vpop.xlane.xlu2 %1398 }
 0x2bd   :  { %v1445_v13 = vsub.f32 %v8329_v49, %v1399_v7 }
 0x2bf   :  { %v1461_v28 = vmul.f32 1.442695, %v1445_v13 }
 0x2c1   :  { %7312 = vpow2.f32 %v1461_v28 }
 0x2c4   :  { %v1402_v29 = vpop.xlane.xlu2 %1401 }
 0x2c5   :  { %v1446_v31 = vsub.f32 %v8340_v55, %v1402_v29 }
 0x2c7   :  { %v8443_v32 = vpop.eup %7312  ;;  %v1463_v11 = vmul.f32 1.442695, %v1446_v31 }
 0x2c8   :  { %v1493_v16 = vsel %vm1396_vm1, %v8443_v32, 0.0 }
 0x2c9   :  { %7314 = vpow2.f32 %v1463_v11  ;;  %1494 = vadd.xlane.f32.xlu0 %v1493_v16 }
 0x2cc   :  { %v1411_v49 = vpop.xlane.xlu2 %1410 }
 0x2cd   :  { %v1449_v36 = vsub.f32 %v8351_v62, %v1411_v49 }
 0x2cf   :  { %v8453_v37 = vpop.eup %7314  ;;  %v1469_v55 = vmul.f32 1.442695, %v1449_v36 }
 0x2d0   :  { %v1496_v8 = vsel %vm1396_vm1, %v8453_v37, 0.0 }
 0x2d1   :  { %7316 = vpow2.f32 %v1469_v55  ;;  %1443 = vmax.xlane.f32.xlu0 %v1442_v39  ;;  %1497 = vadd.xlane.f32.xlu1 %v1496_v8 }
 0x2d3   :  { %v1405_v40 = vpop.xlane.xlu0 %1404 }
 0x2d4   :  { %v1447_v41 = vsub.f32 %v8360_v9, %v1405_v40 }
 0x2d6   :  { %v1465_v42 = vmul.f32 1.442695, %v1447_v41 }
 0x2d7   :  { %v8460_v43 = vpop.eup %7316 }
 0x2d8   :  { %7318 = vpow2.f32 %v1465_v42  ;;  %v1505_v62 = vsel %vm1396_vm1, %v8460_v43, 0.0 }
 0x2d9   :  { %1506 = vadd.xlane.f32.xlu0 %v1505_v62 }
 0x2db   :  { %v1414_v12 = vpop.xlane.xlu0 %1413 }
 0x2dc   :  { %v1408_v18 = vpop.xlane.xlu1 %1407  ;;  %v1450_v44 = vsub.f32 %v8370_v21, %v1414_v12 }
 0x2dd   :  { %v1448_v45 = vsub.f32 %v8372_v5, %v1408_v18 }
 0x2de   :  { %v8466_v48 = vpop.eup %7318  ;;  %v1471_v50 = vmul.f32 1.442695, %v1450_v44 }
 0x2df   :  { %v1467_v52 = vmul.f32 1.442695, %v1448_v45  ;;  %v1499_v9 = vsel %vm1396_vm1, %v8466_v48, 0.0 }
 0x2e0   :  { %7320 = vpow2.f32 %v1471_v50  ;;  %1500 = vadd.xlane.f32.xlu1 %v1499_v9 }
 0x2e1   :  { %7322 = vpow2.f32 %v1467_v52 }
 0x2e3   :  { %v1423_v54 = vpop.xlane.xlu0 %1422 }
 0x2e4   :  { %v1417_v53 = vpop.xlane.xlu1 %1416  ;;  %v1453_v60 = vsub.f32 %v8384_v30, %v1423_v54  ;;  %v1083_v54 = vpack.c.bf16 %v8320_v46, %v8320_v46 }
 0x2e5   :  { %v1451_v56 = vsub.f32 %v8386_v33, %v1417_v53 }
 0x2e6   :  { %v8472_v61 = vpop.eup %7320  ;;  %v1477_v5 = vmul.f32 1.442695, %v1453_v60 }
 0x2e7   :  { %v1473_v21 = vmul.f32 1.442695, %v1451_v56  ;;  %v8474_v2 = vpop.eup %7322  ;;  %v1508_v6 = vsel %vm1396_vm1, %v8472_v61, 0.0 }
 0x2e8   :  { %v1502_v1 = vsel %vm1396_vm1, %v8474_v2, 0.0  ;;  %1509 = vadd.xlane.f32.xlu1 %v1508_v6 }
 0x2e9   :  { %7324 = vpow2.f32 %v1473_v21  ;;  %1503 = vadd.xlane.f32.xlu2 %v1502_v1 }
 0x2ea   :  { %7326 = vpow2.f32 %v1477_v5 }
 0x2ec   :  { %v1426_v19 = vpop.xlane.xlu1 %1425  ;;  %v1420_v33 = vpop.xlane.xlu2 %1419 }
 0x2ed   :  { %v1454_v30 = vsub.f32 %v8398_v38, %v1426_v19  ;;  %v1452_v20 = vsub.f32 %v8400_v14, %v1420_v33  ;;  %v1746_v19 = vsel %vm1592_vm15, %v1083_v54, 0  ;;  %v1090_v54 = vpack.c.bf16 %v8358_v3, %v8358_v3 }
 0x2ef   :  { %v8482_v10 = vpop.eup %7324  ;;  %v1479_v22 = vmul.f32 1.442695, %v1454_v30  ;;  %v1475_v24 = vmul.f32 1.442695, %v1452_v20  ;;  %v1084_v30 = vpack.c.bf16 %v8324_v17, %v8324_v17  ;;  %v1087_v17 = vpack.c.bf16 %v8322_v47, %v8322_v47 }
 0x2f0   :  { %v8484_v26 = vpop.eup %7326  ;;  %v1511_v27 = vsel %vm1396_vm1, %v8482_v10, 0.0 }
 0x2f1   :  { %7328 = vpow2.f32 %v1479_v22  ;;  %v1517_v7 = vsel %vm1396_vm1, %v8484_v26, 0.0  ;;  %1512 = vadd.xlane.f32.xlu2 %v1511_v27 }
 0x2f2   :  { %7330 = vpow2.f32 %v1475_v24  ;;  %1518 = vadd.xlane.f32.xlu1 %v1517_v7 }
 0x2f4   :  { %v1435_v13 = vpop.xlane.xlu1 %1434  ;;  %v1429_v38 = vpop.xlane.xlu2 %1428 }
 0x2f5   :  { %v1457_v14 = vsub.f32 %v8412_v4, %v1435_v13  ;;  %v1455_v28 = vsub.f32 %v8414_v0, %v1429_v38  ;;  %v1822_v38 = vsel %vm1592_vm15, %v1087_v17, 0 }
 0x2f7   :  { %v8492_v29 = vpop.eup %7328  ;;  %v1485_v31 = vmul.f32 1.442695, %v1457_v14  ;;  %v1481_v11 = vmul.f32 1.442695, %v1455_v28  ;;  %v1085_v28 = vpack.c.bf16 %v8335_v51, %v8335_v51  ;;  %v1086_v51 = vpack.c.bf16 %v8346_v58, %v8346_v58 }
 0x2f8   :  { %v8494_v16 = vpop.eup %7330  ;;  %v1520_v34 = vsel %vm1396_vm1, %v8492_v29, 0.0 }
 0x2f9   :  { %7332 = vpow2.f32 %v1485_v31  ;;  %v1514_v49 = vsel %vm1396_vm1, %v8494_v16, 0.0  ;;  %1521 = vadd.xlane.f32.xlu2 %v1520_v34  ;;  %v1784_v47 = vsel %vm1592_vm15, %v1085_v28, 0 }
 0x2fa   :  { %7334 = vpow2.f32 %v1481_v11  ;;  %1515 = vadd.xlane.f32.xlu0 %v1514_v49 }
 0x2fc   :  { %v1432_v36 = vpop.xlane.xlu0 %1431  ;;  %v1438_v4 = vpop.xlane.xlu2 %1437 }
 0x2fd   :  { %v1456_v0 = vsub.f32 %v8428_v63, %v1432_v36  ;;  %v1458_v55 = vsub.f32 %v8426_v59, %v1438_v4  ;;  %v1088_v4 = vpack.c.bf16 %v8331_v23, %v8331_v23  ;;  %v1803_v23 = vsel %vm1592_vm15, %v1086_v51, 0 }
 0x2ff   :  { %v8502_v39 = vpop.eup %7332  ;;  %v1483_v8 = vmul.f32 1.442695, %v1456_v0  ;;  %v1487_v40 = vmul.f32 1.442695, %v1458_v55 }
 0x300   :  { %v8504_v41 = vpop.eup %7334  ;;  %v1529_v42 = vsel %vm1396_vm1, %v8502_v39, 0.0 }
 0x301   :  { %7336 = vpow2.f32 %v1483_v8  ;;  %v1523_v62 = vsel %vm1396_vm1, %v8504_v41, 0.0  ;;  %1530 = vadd.xlane.f32.xlu2 %v1529_v42 }
 0x302   :  { %7338 = vpow2.f32 %v1487_v40  ;;  %1524 = vadd.xlane.f32.xlu0 %v1523_v62  ;;  %v1841_v62 = vsel %vm1592_vm15, %v1088_v4, 0 }
 0x304   :  { %v1441_v12 = vpop.xlane.xlu2 %1440 }
 0x305   :  { %v1459_v63 = vsub.f32 %v8437_v15, %v1441_v12 }
 0x307   :  { %v8511_v59 = vpop.eup %7336  ;;  %v1489_v18 = vmul.f32 1.442695, %v1459_v63 }
 0x308   :  { %v8513_v44 = vpop.eup %7338  ;;  %v1526_v45 = vsel %vm1396_vm1, %v8511_v59, 0.0 }
 0x309   :  { %7340 = vpow2.f32 %v1489_v18  ;;  %1527 = vadd.xlane.f32.xlu1 %v1526_v45  ;;  %v1532_v50 = vsel %vm1396_vm1, %v8513_v44, 0.0  ;;  %v1089_v18 = vpack.c.bf16 %v8344_v57, %v8344_v57 }
 0x30a   :  { %1533 = vadd.xlane.f32.xlu0 %v1532_v50 }
 0x30f   :  { %v8519_v52 = vpop.eup %7340 }
 0x310   :  { %v1535_v9 = vsel %vm1396_vm1, %v8519_v52, 0.0 }
 0x311   :  { %1536 = vadd.xlane.f32.xlu1 %v1535_v9 }
 0x33c   :  { %v1495_v15 = vpop.xlane.xlu0 %1494 }
 0x33d   :  { %7342 = vrcp.f32 %v1495_v15  ;;  %v1860_v15 = vsel %vm1592_vm15, %v1089_v18, 0 }
 0x343   :  { %v7343_v53 = vpop.eup %7342 }
 0x344   :  { %v1557_v56 = vmul.f32 %v7343_v53, %v8443_v32  ;;  %v1444_v60 = vpop.xlane.xlu0 %1443  ;;  %v1498_v21 = vpop.xlane.xlu1 %1497 }
 0x345   :  { %v1460_v5 = vsub.f32 %v8450_v35, %v1444_v60  ;;  %7344 = vrcp.f32 %v1498_v21  ;;  %v1765_v35 = vsel %vm1592_vm15, %v1084_v30, 0 }
 0x346   :  { %v1573_v6 = vpack.c.bf16 %v1557_v56, %v1557_v56 }
 0x347   :  { %v1491_v1 = vmul.f32 1.442695, %v1460_v5 }
 0x348   :  { %5951 = vmatmul.msk.bf16.vlgmr.msrb.gmra.mxu0 %vm1396_vm1, %v1573_v6  ;;  %v1879_v6 = vsel %vm1592_vm15, %v1090_v54, 0 }
 0x349   :  { %7346 = vpow2.f32 %v1491_v1  ;;  %1755 = vmatpush.bf16.msrb.mxu0 %v1746_v19 }
 0x34b   :  { %v7345_v33 = vpop.eup %7344 }
 0x34c   :  { %v1558_v46 = vmul.f32 %v7345_v33, %v8453_v37  ;;  %v1507_v32 = vpop.xlane.xlu0 %1506 }
 0x34d   :  { %7348 = vrcp.f32 %v1507_v32 }
 0x34e   :  { %v1574_v20 = vpack.c.bf16 %v1558_v46, %v1558_v46 }
 0x34f   :  { %v8532_v22 = vpop.eup %7346 }
 0x350   :  { %5952 = vmatmul.msk.bf16.vlgmr.msrb.gmra.mxu1 %vm1396_vm1, %v1574_v20  ;;  %v1538_v24 = vsel %vm1396_vm1, %v8532_v22, 0.0 }
 0x351   :  { %1774 = vmatpush.bf16.msrb.mxu1 %v1765_v35  ;;  %1539 = vadd.xlane.f32.xlu2 %v1538_v24 }
 0x353   :  { %v1501_v27 = vpop.xlane.xlu1 %1500  ;;  %v7349_v7 = vpop.eup %7348 }
 0x354   :  { %7350 = vrcp.f32 %v1501_v27  ;;  %v1561_v37 = vmul.f32 %v7349_v7, %v8460_v43 }
 0x356   :  { %v1577_v13 = vpack.c.bf16 %v1561_v37, %v1561_v37 }
 0x358   :  { %5955 = vmatmul.msk.bf16.vlgmr.msra.gmra.mxu0 %vm1396_vm1, %v1577_v13 }
 0x359   :  { %1831 = vmatpush.bf16.msra.mxu0 %v1822_v38 }
 0x35a   :  { %v7351_v14 = vpop.eup %7350 }
 0x35b   :  { %v1559_v31 = vmul.f32 %v7351_v14, %v8466_v48  ;;  %v1510_v11 = vpop.xlane.xlu1 %1509 }
 0x35c   :  { %7352 = vrcp.f32 %v1510_v11  ;;  %v1504_v34 = vpop.xlane.xlu2 %1503 }
 0x35d   :  { %v1575_v49 = vpack.c.bf16 %v1559_v31, %v1559_v31  ;;  %7354 = vrcp.f32 %v1504_v34 }
 0x35f   :  { %5953 = vmatmul.msk.bf16.vlgmr.msrb.gmra.mxu2 %vm1396_vm1, %v1575_v49  ;;  %v7090_v49 = vld [vmem:[%s9564_s6 + $0x10] sm:$0xff] }
 0x360   :  { %1793 = vmatpush.bf16.msrb.mxu2 %v1784_v47 }
 0x362   :  { %v7353_v43 = vpop.eup %7352 }
 0x363   :  { %v7355_v36 = vpop.eup %7354  ;;  %v1562_v0 = vmul.f32 %v7353_v43, %v8472_v61 }
 0x364   :  { %v1560_v48 = vmul.f32 %v7355_v36, %v8474_v2  ;;  %v1513_v8 = vpop.xlane.xlu2 %1512 }
 0x365   :  { %v1519_v55 = vpop.xlane.xlu1 %1518  ;;  %v1578_v40 = vpack.c.bf16 %v1562_v0, %v1562_v0 }
 0x366   :  { %7356 = vrcp.f32 %v1519_v55  ;;  %v1576_v42 = vpack.c.bf16 %v1560_v48, %v1560_v48 }
 0x367   :  { %7358 = vrcp.f32 %v1513_v8  ;;  %5956 = vmatmul.msk.bf16.vlgmr.msra.gmra.mxu1 %vm1396_vm1, %v1578_v40 }
 0x368   :  { %5954 = vmatmul.msk.bf16.vlgmr.msrb.gmra.mxu3 %vm1396_vm1, %v1576_v42  ;;  %1850 = vmatpush.bf16.msra.mxu1 %v1841_v62 }
 0x369   :  { %1812 = vmatpush.bf16.msrb.mxu3 %v1803_v23 }
 0x36c   :  { %v7357_v61 = vpop.eup %7356  ;;  %v1522_v63 = vpop.xlane.xlu2 %1521 }
 0x36d   :  { %v7359_v58 = vpop.eup %7358  ;;  %v1565_v2 = vmul.f32 %v7357_v61, %v8484_v26  ;;  %v1516_v12 = vpop.xlane.xlu0 %1515 }
 0x36e   :  { %v1563_v45 = vmul.f32 %v7359_v58, %v8482_v10  ;;  %7360 = vrcp.f32 %v1516_v12 }
 0x36f   :  { %v1581_v50 = vpack.c.bf16 %v1565_v2, %v1565_v2  ;;  %7362 = vrcp.f32 %v1522_v63 }
 0x370   :  { %v1579_v9 = vpack.c.bf16 %v1563_v45, %v1563_v45 }
 0x371   :  { %5959 = vmatmul.msk.bf16.vlgmr.msrb.gmra.mxu0 %vm1396_vm1, %v1581_v50 }
 0x372   :  { %5957 = vmatmul.msk.bf16.vlgmr.msra.gmra.mxu2 %vm1396_vm1, %v1579_v9 }
 0x373   :  { %1869 = vmatpush.bf16.msra.mxu2 %v1860_v15 }
 0x374   :  { %v7361_v53 = vpop.eup %7360  ;;  %v1531_v10 = vpop.xlane.xlu2 %1530 }
 0x375   :  { %v7363_v26 = vpop.eup %7362  ;;  %v1564_v57 = vmul.f32 %v7361_v53, %v8494_v16  ;;  %v1525_v56 = vpop.xlane.xlu0 %1524 }
 0x376   :  { %v1566_v60 = vmul.f32 %v7363_v26, %v8492_v29  ;;  %7364 = vrcp.f32 %v1525_v56 }
 0x377   :  { %v1580_v21 = vpack.c.bf16 %v1564_v57, %v1564_v57  ;;  %7366 = vrcp.f32 %v1531_v10 }
 0x378   :  { %v1582_v5 = vpack.c.bf16 %v1566_v60, %v1566_v60 }
 0x379   :  { %5958 = vmatmul.msk.bf16.vlgmr.msra.gmra.mxu3 %vm1396_vm1, %v1580_v21 }
 0x37a   :  { %5960 = vmatmul.msk.bf16.vlgmr.msrb.gmra.mxu1 %vm1396_vm1, %v1582_v5  ;;  %1888 = vmatpush.bf16.msra.mxu3 %v1879_v6 }
 0x37c   :  { %v7365_v1 = vpop.eup %7364  ;;  %v1528_v19 = vpop.xlane.xlu1 %1527 }
 0x37d   :  { %v7367_v3 = vpop.eup %7366  ;;  %v1567_v16 = vmul.f32 %v7365_v1, %v8504_v41  ;;  %7368 = vrcp.f32 %v1528_v19  ;;  %v1534_v33 = vpop.xlane.xlu0 %1533 }
 0x37e   :  { %v1569_v29 = vmul.f32 %v7367_v3, %v8502_v39  ;;  %7370 = vrcp.f32 %v1534_v33 }
 0x37f   :  { %v1583_v30 = vpack.c.bf16 %v1567_v16, %v1567_v16 }
 0x380   :  { %v1585_v46 = vpack.c.bf16 %v1569_v29, %v1569_v29 }
 0x382   :  { %5961 = vmatmul.msk.bf16.vlgmr.msrb.gmra.mxu2 %vm1396_vm1, %v1583_v30  ;;  %5963 = vmatmul.msk.bf16.vlgmr.msra.gmra.mxu0 %vm1396_vm1, %v1585_v46 }
 0x383   :  { %v7369_v32 = vpop.eup %7368  ;;  %1989 = vmatpush.bf16.msrb.mxu2 %v7090_v49 }
 0x384   :  { %v7371_v20 = vpop.eup %7370  ;;  %v1568_v35 = vmul.f32 %v7369_v32, %v8511_v59  ;;  %v1537_v24 = vpop.xlane.xlu1 %1536  ;;  %v7088_v59 = vld [vmem:[%s9564_s6] sm:$0xff] }
 0x385   :  { %v1570_v27 = vmul.f32 %v7371_v20, %v8513_v44  ;;  %7372 = vrcp.f32 %v1537_v24  ;;  %1956 = vmatpush.bf16.msrb.mxu1 %v7088_v59  ;;  %v7089_v44 = vld [vmem:[%s9564_s6 + $0x8] sm:$0xff]  ;;  %v7472_v24 = vld [vmem:[%s9558_s0] sm:$0xff] }
 0x386   :  { %v1584_v41 = vpack.c.bf16 %v1568_v35, %v1568_v35  ;;  %1925 = vmatpush.bf16.msrb.mxu0 %v7089_v44 }
 0x387   :  { %v1586_v7 = vpack.c.bf16 %v1570_v27, %v1570_v27 }
 0x389   :  { %5962 = vmatmul.msk.bf16.vlgmr.msrb.gmra.mxu3 %vm1396_vm1, %v1584_v41 }
 0x38a   :  { %5964 = vmatmul.msk.bf16.vlgmr.msra.gmra.mxu1 %vm1396_vm1, %v1586_v7 }
 0x38b   :  { %v7373_v39 = vpop.eup %7372 }
 0x38c   :  { %v1571_v17 = vmul.f32 %v7373_v39, %v8519_v52 }
 0x38e   :  { %v1587_v37 = vpack.c.bf16 %v1571_v17, %v1571_v17 }
 0x392   :  { %5965 = vmatmul.msk.bf16.vlgmr.msra.gmra.mxu2 %vm1396_vm1, %v1587_v37 }
 0x3c4   :  { %v1540_v13 = vpop.xlane.xlu2 %1539 }
 0x3c5   :  { %7374 = vrcp.f32 %v1540_v13  ;;  %v1605_v38 = vpop.f32.mrf.mxu0 }
 0x3cb   :  { %v7375_v14 = vpop.eup %7374 }
 0x3cc   :  { %v1572_v28 = vmul.f32 %v7375_v14, %v8532_v22  ;;  %v7091_v22 = vld [vmem:[%s9564_s6 + $0x18] sm:$0xff] }
 0x3cd   :  { %v1607_v52 = vpop.f32.mrf.mxu0  ;;  %v1624_v31 = vpop.f32.mrf.mxu1  ;;  %2026 = vmatpush.bf16.msrb.mxu3 %v7091_v22 }
 0x3ce   :  { %v1588_v11 = vpack.c.bf16 %v1572_v28, %v1572_v28  ;;  %v1902_v34 = vpack.c.bf16 %v1624_v31, %v1605_v38  ;;  %v7473_v38 = vld [vmem:[%s9558_s0 + $0x8] sm:$0xff] }
 0x3d0   :  { %5966 = vmatmul.msk.bf16.vlgmr.msra.gmra.mxu3 %vm1396_vm1, %v1588_v11  ;;  %5977 = vmatmul.msk.bf16.vlgmr.msrb.gmra.mxu1 %vm1091_vm14, %v1902_v34 }
 0x3d5   :  { %v1626_v47 = vpop.f32.mrf.mxu1  ;;  %v1681_v43 = vpop.f32.mrf.mxu0 }
 0x3dd   :  { %v1683_v36 = vpop.f32.mrf.mxu0 }
 0x3e2   :  { %v1643_v4 = vpop.f32.mrf.mxu2 }
 0x3e4   :  { %v1700_v0 = vpop.f32.mrf.mxu1 }
 0x3e5   :  { %v1904_v51 = vpack.c.bf16 %v1700_v0, %v1681_v43  ;;  %v7474_v0 = vld [vmem:[%s9558_s0 + $0x10] sm:$0xff] }
 0x3e7   :  { %5971 = vmatmul.msk.bf16.vlgmr.msrb.gmra.mxu0 %vm1091_vm14, %v1904_v51 }
 0x3ea   :  { %v1645_v48 = vpop.f32.mrf.mxu2 }
 0x3eb   :  { %v1662_v55 = vpop.f32.mrf.mxu3 }
 0x3ec   :  { %v1903_v8 = vpack.c.bf16 %v1662_v55, %v1643_v4  ;;  %v1702_v40 = vpop.f32.mrf.mxu1 }
 0x3ee   :  { %v1757_v42 = vpop.f32.mrf.mxu0  ;;  %5978 = vmatmul.msk.bf16.gmra.mxu1 %vm1091_vm14, %v1903_v8 }
 0x3f3   :  { %v1664_v62 = vpop.f32.mrf.mxu3 }
 0x3f5   :  { %v1719_v23 = vpop.f32.mrf.mxu2 }
 0x3f6   :  { %v1759_v61 = vpop.f32.mrf.mxu0 }
 0x3f7   :  { %v1776_v58 = vpop.f32.mrf.mxu1  ;;  %v7475_v61 = vld [vmem:[%s9558_s0 + $0x18] sm:$0xff] }
 0x3f8   :  { %v1968_v2 = vpack.c.bf16 %v1776_v58, %v1757_v42 }
 0x3fa   :  { %5983 = vmatmul.msk.bf16.vlgmr.msrb.gmra.mxu2 %vm1091_vm14, %v1968_v2 }
 0x3fc   :  { %v1738_v12 = vpop.f32.mrf.mxu3 }
 0x3fd   :  { %v1721_v63 = vpop.f32.mrf.mxu2  ;;  %v1905_v18 = vpack.c.bf16 %v1738_v12, %v1719_v23 }
 0x3fe   :  { %v7095_v63 = vld [vmem:[%s9565_s7 + $0x18] sm:$0xff] }
 0x3ff   :  { %v1778_v45 = vpop.f32.mrf.mxu1  ;;  %v1833_v50 = vpop.f32.mrf.mxu0  ;;  %5972 = vmatmul.msk.bf16.gmra.mxu0 %vm1091_vm14, %v1905_v18  ;;  %v7094_v18 = vld [vmem:[%s9565_s7 + $0x10] sm:$0xff] }
 0x400   :  { %2164 = vmatpush.bf16.msra.mxu0 %v7095_v63  ;;  %v7093_v45 = vld [vmem:[%s9565_s7 + $0x8] sm:$0xff] }
 0x404   :  { %v1740_v9 = vpop.f32.mrf.mxu3  ;;  %2165 = vmatpush.bf16.msra.mxu0 %v7094_v18  ;;  %v7098_v18 = vld [vmem:[%s9566_s8 + $0x10] sm:$0xff] }
 0x405   :  { %v1795_v15 = vpop.f32.mrf.mxu2 }
 0x407   :  { %v1835_v53 = vpop.f32.mrf.mxu0  ;;  %v1852_v26 = vpop.f32.mrf.mxu1 }
 0x408   :  { %v2005_v54 = vpack.c.bf16 %v1852_v26, %v1833_v50  ;;  %2166 = vmatpush.bf16.msra.mxu0 %v7093_v45  ;;  %v7097_v45 = vld [vmem:[%s9566_s8 + $0x8] sm:$0xff] }
 0x40a   :  { %5989 = vmatmul.msk.bf16.vlgmr.msrb.gmra.mxu3 %vm1091_vm14, %v2005_v54 }
 0x40c   :  { %v1814_v57 = vpop.f32.mrf.mxu3 }
 0x40d   :  { %v1797_v56 = vpop.f32.mrf.mxu2  ;;  %v1969_v10 = vpack.c.bf16 %v1814_v57, %v1795_v15  ;;  %v7092_v15 = vld [vmem:[%s9565_s7] sm:$0xff] }
 0x40e   :  { %2167 = vmatpush.bf16.msra.mxu0 %v7092_v15 }
 0x40f   :  { %v1854_v60 = vpop.f32.mrf.mxu1  ;;  %5984 = vmatmul.msk.bf16.gmra.mxu2 %vm1091_vm14, %v1969_v10 }
 0x414   :  { %v1816_v21 = vpop.f32.mrf.mxu3 }
 0x415   :  { %v1871_v5 = vpop.f32.mrf.mxu2 }
 0x41d   :  { %v1873_v6 = vpop.f32.mrf.mxu2 }
 0x44d   :  { %v1958_v33 = vpop.f32.mrf.mxu1 }
 0x453   :  { %v1890_v1 = vpop.f32.mrf.mxu3 }
 0x454   :  { %v2006_v19 = vpack.c.bf16 %v1890_v1, %v1871_v5 }
 0x455   :  { %v1960_v41 = vpop.f32.mrf.mxu1 }
 0x456   :  { %5990 = vmatmul.msk.bf16.gmra.mxu3 %vm1091_vm14, %v2006_v19 }
 0x45b   :  { %v1892_v3 = vpop.f32.mrf.mxu3 }
 0x464   :  { %v1927_v16 = vpop.f32.mrf.mxu0 }
 0x465   :  { %v1959_v30 = vadd.f32 %v1958_v33, %v1927_v16 }
 0x46b   :  { %v1963_v11 = vpop.f32.mrf.mxu1 }
 0x46c   :  { %v1929_v35 = vpop.f32.mrf.mxu0 }
 0x46d   :  { %v1961_v39 = vadd.f32 %v1960_v41, %v1929_v35 }
 0x473   :  { %v1965_v22 = vpop.f32.mrf.mxu1 }
 0x47c   :  { %v1932_v31 = vpop.f32.mrf.mxu0 }
 0x47d   :  { %v1991_v29 = vpop.f32.mrf.mxu2  ;;  %v1964_v49 = vadd.f32 %v1963_v11, %v1932_v31  ;;  %v7101_v31 = vld [vmem:[%s9566_s8 + $0x28] sm:$0xff] }
 0x47e   :  { %v2001_v46 = vadd.f32 %v1991_v29, %v1959_v30 }
 0x484   :  { %v1934_v4 = vpop.f32.mrf.mxu0 }
 0x485   :  { %v1993_v7 = vpop.f32.mrf.mxu2  ;;  %v1966_v55 = vadd.f32 %v1965_v22, %v1934_v4  ;;  %v7099_v4 = vld [vmem:[%s9566_s8 + $0x18] sm:$0xff] }
 0x486   :  { %v2002_v37 = vadd.f32 %v1993_v7, %v1961_v39 }
 0x48d   :  { %v2028_v32 = vpop.f32.mrf.mxu3 }
 0x48e   :  { %v2038_v20 = vadd.f32 %v2028_v32, %v2001_v46  ;;  %v7298_v46 = vld [vmem:[%s9561_s3] ss:$0 sm:$0xff] }
 0x490   :  { %v8607_v27 = vadd.f32 %v7472_v24, %v2038_v20 }
 0x492   :  { %v2047_v17 = vmul.f32 %v8607_v27, %v8607_v27  ;;  %v1996_v34 = vpop.f32.mrf.mxu2 }
 0x493   :  { %v2003_v47 = vadd.f32 %v1996_v34, %v1964_v49  ;;  %v7100_v49 = vld [vmem:[%s9566_s8 + $0x20] sm:$0xff] }
 0x494   :  { %v2051_v59 = vsel %vm334_vm0, %v2047_v17, 0.0 }
 0x495   :  { %2052 = vadd.xlane.f32.xlu0 %v2051_v59  ;;  %v2030_v13 = vpop.f32.mrf.mxu3  ;;  %v7103_v59 = vld [vmem:[%s9566_s8 + $0x38] sm:$0xff] }
 0x496   :  { %v2039_v44 = vadd.f32 %v2030_v13, %v2002_v37  ;;  %2249 = vmatpush.bf16.msra.mxu1 %v7103_v59  ;;  %v7102_v13 = vld [vmem:[%s9566_s8 + $0x30] sm:$0xff] }
 0x497   :  { %v7118_v59 = vld [vmem:[%s9563_s5 + $0x1f0] sm:$0xff] }
 0x498   :  { %v8615_v14 = vadd.f32 %v7473_v38, %v2039_v44 }
 0x49a   :  { %v2048_v28 = vmul.f32 %v8615_v14, %v8615_v14  ;;  %v1998_v48 = vpop.f32.mrf.mxu2  ;;  %2250 = vmatpush.bf16.msra.mxu1 %v7102_v13 }
 0x49b   :  { %v2004_v40 = vadd.f32 %v1998_v48, %v1966_v55 }
 0x49c   :  { %v2054_v52 = vsel %vm334_vm0, %v2048_v28, 0.0 }
 0x49d   :  { %2055 = vadd.xlane.f32.xlu1 %v2054_v52 }
 0x49e   :  { %2251 = vmatpush.bf16.msra.mxu1 %v7101_v31  ;;  %v7117_v31 = vld [vmem:[%s9563_s5 + $0x1e8] sm:$0xff] }
 0x4a2   :  { %2252 = vmatpush.bf16.msra.mxu1 %v7100_v49  ;;  %v7108_v49 = vld [vmem:[%s9563_s5 + $0x1a0] sm:$0xff] }
 0x4a6   :  { %2253 = vmatpush.bf16.msra.mxu1 %v7099_v4 }
 0x4aa   :  { %2254 = vmatpush.bf16.msra.mxu1 %v7098_v18 }
 0x4ae   :  { %2255 = vmatpush.bf16.msra.mxu1 %v7097_v45 }
 0x4d9   :  { %v2033_v43 = vpop.f32.mrf.mxu3 }
 0x4da   :  { %v2040_v36 = vadd.f32 %v2033_v43, %v2003_v47 }
 0x4dc   :  { %v8623_v51 = vadd.f32 %v7474_v0, %v2040_v36 }
 0x4de   :  { %v2049_v8 = vmul.f32 %v8623_v51, %v8623_v51 }
 0x4e0   :  { %v2057_v42 = vsel %vm334_vm0, %v2049_v8, 0.0 }
 0x4e1   :  { %2058 = vadd.xlane.f32.xlu2 %v2057_v42  ;;  %v2035_v62 = vpop.f32.mrf.mxu3 }
 0x4e2   :  { %v2041_v23 = vadd.f32 %v2035_v62, %v2004_v40 }
 0x4e4   :  { %v8631_v58 = vadd.f32 %v7475_v61, %v2041_v23 }
 0x4e6   :  { %v2050_v2 = vmul.f32 %v8631_v58, %v8631_v58 }
 0x4e8   :  { %v2060_v12 = vsel %vm334_vm0, %v2050_v2, 0.0 }
 0x4e9   :  { %2061 = vadd.xlane.f32.xlu0 %v2060_v12 }
 0x508   :  { %v2053_v50 = vpop.xlane.xlu0 %2052 }
 0x509   :  { %v2063_v9 = vmul.f32 %v2053_v50, %v8008_v25  ;;  %v7096_v50 = vld [vmem:[%s9566_s8] sm:$0xff] }
 0x50a   :  { %2256 = vmatpush.bf16.msra.mxu1 %v7096_v50 }
 0x50b   :  { %v2067_v53 = vadd.f32 1e-06, %v2063_v9 }
 0x50d   :  { %7376 = vrsqrt.f32 %v2067_v53  ;;  %vm2077_vm3 = vweird.f32 %v2067_v53 }
 0x510   :  { %v2056_v26 = vpop.xlane.xlu1 %2055 }
 0x511   :  { %v2064_v54 = vmul.f32 %v2056_v26, %v8008_v25 }
 0x513   :  { %v7377_v57 = vpop.eup %7376  ;;  %v2068_v56 = vadd.f32 1e-06, %v2064_v54 }
 0x514   :  { %v2072_v10 = vmul.f32 %v7377_v57, %v2067_v53  ;;  %vm2078_vm2 = vweird.f32 %v7377_v57 }
 0x515   :  { %7378 = vrsqrt.f32 %v2068_v56  ;;  %vm2079_vm4 = vmor %vm2077_vm3, %vm2078_vm2  ;;  %vm2087_vm6 = vweird.f32 %v2068_v56 }
 0x516   :  { %v2073_v60 = vmul.f32 %v7377_v57, %v2072_v10 }
 0x518   :  { %v2074_v21 = vmul.f32 0.5, %v2073_v60 }
 0x51a   :  { %v2075_v5 = vsub.f32 1.5, %v2074_v21 }
 0x51b   :  { %v7379_v6 = vpop.eup %7378 }
 0x51c   :  { %v2082_v1 = vmul.f32 %v7379_v6, %v2068_v56  ;;  %v2076_v19 = vmul.f32 %v7377_v57, %v2075_v5  ;;  %vm2088_vm5 = vweird.f32 %v7379_v6 }
 0x51d   :  { %vm2089_vm7 = vmor %vm2087_vm6, %vm2088_vm5 }
 0x51e   :  { %v2083_v3 = vmul.f32 %v7379_v6, %v2082_v1  ;;  %v2080_v33 = vsel %vm2079_vm4, %v7377_v57, %v2076_v19 }
 0x51f   :  { %v2111_v32 = vmul.f32 %v2080_v33, %v8607_v27 }
 0x520   :  { %v2084_v16 = vmul.f32 0.5, %v2083_v3 }
 0x521   :  { %v2116_v24 = vmul.f32 %v7298_v46, %v2111_v32 }
 0x522   :  { %v2085_v29 = vsub.f32 1.5, %v2084_v16 }
 0x524   :  { %v2086_v30 = vmul.f32 %v7379_v6, %v2085_v29 }
 0x526   :  { %v2090_v20 = vsel %vm2089_vm7, %v7379_v6, %v2086_v30 }
 0x527   :  { %v2112_v35 = vmul.f32 %v2090_v20, %v8615_v14 }
 0x529   :  { %v2117_v41 = vmul.f32 %v7298_v46, %v2112_v35 }
 0x52b   :  { %v2120_v7 = vpack.c.bf16 %v2117_v41, %v2116_v24  ;;  %v7111_v41 = vld [vmem:[%s9563_s5 + $0x1b8] sm:$0xff] }
 0x52c   :  { %2534 = vmatpush.bf16.msra.mxu3 %v7111_v41  ;;  %v7130_v41 = vld [vmem:[%s9563_s5 + $0x250] sm:$0xff] }
 0x52d   :  { %6007 = vmatmul.msk.bf16.vlgmr.msra.gmra.mxu0 %vm334_vm0, %v2120_v7  ;;  %v7115_v7 = vld [vmem:[%s9563_s5 + $0x1d8] sm:$0xff] }
 0x52e   :  { %2577 = vmatpush.bf16.msrb.mxu0 %v7115_v7  ;;  %v7134_v7 = vld [vmem:[%s9563_s5 + $0x270] sm:$0xff] }
 0x554   :  { %v2059_v39 = vpop.xlane.xlu2 %2058 }
 0x555   :  { %v2065_v17 = vmul.f32 %v2059_v39, %v8008_v25  ;;  %v7106_v39 = vld [vmem:[%s9563_s5 + $0x190] sm:$0xff] }
 0x557   :  { %v2069_v37 = vadd.f32 1e-06, %v2065_v17  ;;  %v7110_v17 = vld [vmem:[%s9563_s5 + $0x1b0] sm:$0xff] }
 0x558   :  { %2535 = vmatpush.bf16.msra.mxu3 %v7110_v17  ;;  %v7121_v17 = vld [vmem:[%s9563_s5 + $0x208] sm:$0xff] }
 0x559   :  { %7380 = vrsqrt.f32 %v2069_v37  ;;  %vm2097_vm9 = vweird.f32 %v2069_v37 }
 0x55c   :  { %v2062_v44 = vpop.xlane.xlu0 %2061 }
 0x55d   :  { %v2066_v38 = vmul.f32 %v2062_v44, %v8008_v25 }
 0x55f   :  { %v7381_v28 = vpop.eup %7380  ;;  %v2070_v52 = vadd.f32 1e-06, %v2066_v38  ;;  %v7105_v38 = vld [vmem:[%s9563_s5 + $0x188] sm:$0xff] }
 0x560   :  { %v2092_v11 = vmul.f32 %v7381_v28, %v2069_v37  ;;  %vm2098_vm8 = vweird.f32 %v7381_v28  ;;  %v7114_v37 = vld [vmem:[%s9563_s5 + $0x1d0] sm:$0xff] }
 0x561   :  { %7382 = vrsqrt.f32 %v2070_v52  ;;  %vm2099_vm10 = vmor %vm2097_vm9, %vm2098_vm8  ;;  %vm2107_vm12 = vweird.f32 %v2070_v52  ;;  %2578 = vmatpush.bf16.msrb.mxu0 %v7114_v37  ;;  %v7125_v37 = vld [vmem:[%s9563_s5 + $0x228] sm:$0xff] }
 0x562   :  { %v2093_v34 = vmul.f32 %v7381_v28, %v2092_v11 }
 0x564   :  { %v2094_v47 = vmul.f32 0.5, %v2093_v34  ;;  %v7104_v34 = vld [vmem:[%s9563_s5 + $0x180] sm:$0xff] }
 0x566   :  { %v2095_v43 = vsub.f32 1.5, %v2094_v47  ;;  %v7112_v47 = vld [vmem:[%s9563_s5 + $0x1c0] sm:$0xff] }
 0x567   :  { %v7383_v36 = vpop.eup %7382 }
 0x568   :  { %v2102_v0 = vmul.f32 %v7383_v36, %v2070_v52  ;;  %v2096_v22 = vmul.f32 %v7381_v28, %v2095_v43  ;;  %vm2108_vm11 = vweird.f32 %v7383_v36  ;;  %v7113_v52 = vld [vmem:[%s9563_s5 + $0x1c8] sm:$0xff]  ;;  %v7116_v43 = vld [vmem:[%s9563_s5 + $0x1e0] sm:$0xff] }
 0x569   :  { %vm2109_vm13 = vmor %vm2107_vm12, %vm2108_vm11  ;;  %2579 = vmatpush.bf16.msrb.mxu0 %v7113_v52 }
 0x56a   :  { %v2103_v48 = vmul.f32 %v7383_v36, %v2102_v0  ;;  %v2100_v8 = vsel %vm2099_vm10, %v7381_v28, %v2096_v22  ;;  %v7109_v28 = vld [vmem:[%s9563_s5 + $0x1a8] sm:$0xff] }
 0x56b   :  { %v2113_v62 = vmul.f32 %v2100_v8, %v8623_v51  ;;  %2536 = vmatpush.bf16.msra.mxu3 %v7109_v28 }
 0x56c   :  { %v2104_v55 = vmul.f32 0.5, %v2103_v48 }
 0x56d   :  { %v2118_v2 = vmul.f32 %v7298_v46, %v2113_v62  ;;  %2580 = vmatpush.bf16.msrb.mxu0 %v7112_v47 }
 0x56e   :  { %v2105_v40 = vsub.f32 1.5, %v2104_v55 }
 0x56f   :  { %2537 = vmatpush.bf16.msra.mxu3 %v7108_v49  ;;  %v7132_v49 = vld [vmem:[%s9563_s5 + $0x260] sm:$0xff] }
 0x570   :  { %v2106_v42 = vmul.f32 %v7383_v36, %v2105_v40 }
 0x572   :  { %v2110_v23 = vsel %vm2109_vm13, %v7383_v36, %v2106_v42 }
 0x573   :  { %v2114_v61 = vmul.f32 %v2110_v23, %v8631_v58 }
 0x575   :  { %v2119_v12 = vmul.f32 %v7298_v46, %v2114_v61 }
 0x577   :  { %v2121_v63 = vpack.c.bf16 %v2119_v12, %v2118_v2 }
 0x579   :  { %6008 = vmatmul.msk.bf16.gmra.mxu0 %vm334_vm0, %v2121_v63  ;;  %v8762_v63 = vld [vmem:[%s9560_s2 + $0x1] ss:$0 sm:$0xff] }
 0x5aa   :  { %v2169_v9 = vpop.f32.mrf.mxu0 }
 0x5ab   :  { %v2179_v53 = vmax.f32 %v2169_v9, 0.0 }
 0x5b2   :  { %v2171_v15 = vpop.f32.mrf.mxu0 }
 0x5b3   :  { %v2180_v26 = vmax.f32 %v2171_v15, 0.0 }
 0x5b5   :  { %v2183_v54 = vpack.c.bf16 %v2180_v26, %v2179_v53 }
 0x5b7   :  { %2257 = vmatmul.bf16.vlgmr.msra.gmra.mxu1 %v2183_v54 }
 0x5f6   :  { %v2174_v57 = vpop.f32.mrf.mxu0 }
 0x5f7   :  { %v2181_v10 = vmax.f32 %v2174_v57, 0.0 }
 0x5fe   :  { %v2176_v56 = vpop.f32.mrf.mxu0 }
 0x5ff   :  { %v2182_v60 = vmax.f32 %v2176_v56, 0.0 }
 0x601   :  { %v2184_v21 = vpack.c.bf16 %v2182_v60, %v2181_v10 }
 0x603   :  { %2262 = vmatmul.bf16.gmra.mxu1 %v2184_v21 }
 0x634   :  { %v2258_v5 = vpop.f32.mrf.mxu1 }
 0x635   :  { %v8686_v6 = vadd.f32 %v2258_v5, %v8607_v27 }
 0x637   :  { %v2273_v1 = vmul.f32 %v8686_v6, %v8686_v6 }
 0x639   :  { %v2277_v19 = vsel %vm334_vm0, %v2273_v1, 0.0 }
 0x63a   :  { %2278 = vadd.xlane.f32.xlu1 %v2277_v19 }
 0x63c   :  { %v2260_v3 = vpop.f32.mrf.mxu1 }
 0x63d   :  { %v8692_v16 = vadd.f32 %v2260_v3, %v8615_v14 }
 0x63f   :  { %v2274_v33 = vmul.f32 %v8692_v16, %v8692_v16 }
 0x641   :  { %v2280_v29 = vsel %vm334_vm0, %v2274_v33, 0.0  ;;  %v7123_v33 = vld [vmem:[%s9563_s5 + $0x218] sm:$0xff] }
 0x642   :  { %2281 = vadd.xlane.f32.xlu2 %v2280_v29  ;;  %v7127_v29 = vld [vmem:[%s9563_s5 + $0x238] sm:$0xff] }
 0x643   :  { %2706 = vmatpush.bf16.msrb.mxu3 %v7127_v29 }
 0x680   :  { %v2263_v30 = vpop.f32.mrf.mxu1 }
 0x681   :  { %v8698_v27 = vadd.f32 %v2263_v30, %v8623_v51  ;;  %v7107_v51 = vld [vmem:[%s9563_s5 + $0x198] sm:$0xff] }
 0x682   :  { %2491 = vmatpush.bf16.msra.mxu2 %v7107_v51  ;;  %v7131_v30 = vld [vmem:[%s9563_s5 + $0x258] sm:$0xff]  ;;  %v7126_v51 = vld [vmem:[%s9563_s5 + $0x230] sm:$0xff] }
 0x683   :  { %v2275_v46 = vmul.f32 %v8698_v27, %v8698_v27  ;;  %2749 = vmatpush.bf16.msra.mxu0 %v7131_v30  ;;  %2707 = vmatpush.bf16.msrb.mxu3 %v7126_v51 }
 0x685   :  { %v2283_v32 = vsel %vm334_vm0, %v2275_v46, 0.0 }
 0x686   :  { %2284 = vadd.xlane.f32.xlu0 %v2283_v32  ;;  %2492 = vmatpush.bf16.msra.mxu2 %v7106_v39 }
 0x687   :  { %2750 = vmatpush.bf16.msra.mxu0 %v7130_v41  ;;  %2708 = vmatpush.bf16.msrb.mxu3 %v7125_v37 }
 0x688   :  { %v2265_v20 = vpop.f32.mrf.mxu1 }
 0x689   :  { %v8704_v14 = vadd.f32 %v2265_v20, %v8631_v58  ;;  %v7119_v58 = vld [vmem:[%s9563_s5 + $0x1f8] sm:$0xff] }
 0x68a   :  { %2620 = vmatpush.bf16.msrb.mxu1 %v7119_v58  ;;  %2493 = vmatpush.bf16.msra.mxu2 %v7105_v38  ;;  %v7135_v20 = vld [vmem:[%s9563_s5 + $0x278] sm:$0xff] }
 0x68b   :  { %v2276_v35 = vmul.f32 %v8704_v14, %v8704_v14 }
 0x68d   :  { %v2286_v24 = vsel %vm334_vm0, %v2276_v35, 0.0 }
 0x68e   :  { %2287 = vadd.xlane.f32.xlu1 %v2286_v24  ;;  %2621 = vmatpush.bf16.msrb.mxu1 %v7118_v59  ;;  %v7122_v24 = vld [vmem:[%s9563_s5 + $0x210] sm:$0xff]  ;;  %v7129_v59 = vld [vmem:[%s9563_s5 + $0x248] sm:$0xff] }
 0x68f   :  { %2494 = vmatpush.bf16.msra.mxu2 %v7104_v34  ;;  %2751 = vmatpush.bf16.msra.mxu0 %v7129_v59  ;;  %v7128_v34 = vld [vmem:[%s9563_s5 + $0x240] sm:$0xff] }
 0x692   :  { %2622 = vmatpush.bf16.msrb.mxu1 %v7117_v31  ;;  %v7120_v31 = vld [vmem:[%s9563_s5 + $0x200] sm:$0xff] }
 0x693   :  { %2663 = vmatpush.bf16.msrb.mxu2 %v7123_v33  ;;  %2752 = vmatpush.bf16.msra.mxu0 %v7128_v34 }
 0x696   :  { %2623 = vmatpush.bf16.msrb.mxu1 %v7116_v43 }
 0x697   :  { %2664 = vmatpush.bf16.msrb.mxu2 %v7122_v24 }
 0x69a   :  { %2792 = vmatpush.bf16.msra.mxu1 %v7135_v20 }
 0x69b   :  { %2665 = vmatpush.bf16.msrb.mxu2 %v7121_v17 }
 0x69e   :  { %2793 = vmatpush.bf16.msra.mxu1 %v7134_v7 }
 0x69f   :  { %2666 = vmatpush.bf16.msrb.mxu2 %v7120_v31 }
 0x6ad   :  { %v2279_v13 = vpop.xlane.xlu1 %2278 }
 0x6ae   :  { %v2289_v44 = vmul.f32 %v2279_v13, %v8008_v25  ;;  %v7133_v13 = vld [vmem:[%s9563_s5 + $0x268] sm:$0xff] }
 0x6af   :  { %2794 = vmatpush.bf16.msra.mxu1 %v7133_v13 }
 0x6b0   :  { %v2293_v11 = vadd.f32 1e-06, %v2289_v44 }
 0x6b2   :  { %7384 = vrsqrt.f32 %v2293_v11  ;;  %vm2303_vm3 = vweird.f32 %v2293_v11 }
 0x6b3   :  { %2795 = vmatpush.bf16.msra.mxu1 %v7132_v49 }
 0x6b5   :  { %v2282_v36 = vpop.xlane.xlu2 %2281 }
 0x6b6   :  { %v2290_v4 = vmul.f32 %v2282_v36, %v8008_v25 }
 0x6b8   :  { %v7385_v0 = vpop.eup %7384  ;;  %v2294_v22 = vadd.f32 1e-06, %v2290_v4 }
 0x6b9   :  { %v2298_v48 = vmul.f32 %v7385_v0, %v2293_v11  ;;  %vm2304_vm2 = vweird.f32 %v7385_v0  ;;  %v7124_v11 = vld [vmem:[%s9563_s5 + $0x220] sm:$0xff] }
 0x6ba   :  { %7386 = vrsqrt.f32 %v2294_v22  ;;  %vm2305_vm4 = vmor %vm2303_vm3, %vm2304_vm2  ;;  %vm2313_vm6 = vweird.f32 %v2294_v22  ;;  %2709 = vmatpush.bf16.msrb.mxu3 %v7124_v11 }
 0x6bb   :  { %v2299_v55 = vmul.f32 %v7385_v0, %v2298_v48 }
 0x6bd   :  { %v2300_v8 = vmul.f32 0.5, %v2299_v55 }
 0x6bf   :  { %v2301_v40 = vsub.f32 1.5, %v2300_v8 }
 0x6c0   :  { %v7387_v42 = vpop.eup %7386 }
 0x6c1   :  { %v2302_v62 = vmul.f32 %v7385_v0, %v2301_v40  ;;  %v2308_v23 = vmul.f32 %v7387_v42, %v2294_v22  ;;  %vm2314_vm5 = vweird.f32 %v7387_v42 }
 0x6c2   :  { %vm2315_vm7 = vmor %vm2313_vm6, %vm2314_vm5 }
 0x6c3   :  { %v2306_v61 = vsel %vm2305_vm4, %v7385_v0, %v2302_v62  ;;  %v2309_v2 = vmul.f32 %v7387_v42, %v2308_v23 }
 0x6c4   :  { %v2337_v18 = vmul.f32 %v2306_v61, %v8686_v6 }
 0x6c5   :  { %v2310_v12 = vmul.f32 0.5, %v2309_v2 }
 0x6c6   :  { %v2342_v9 = vmul.f32 %v8762_v63, %v2337_v18  ;;  %v7147_v18 = vld [vmem:[%s9563_s5 + $0x2d8] sm:$0xff] }
 0x6c7   :  { %v2311_v45 = vsub.f32 1.5, %v2310_v12  ;;  %v7139_v12 = vld [vmem:[%s9563_s5 + $0x298] sm:$0xff] }
 0x6c8   :  { %v2346_v26 = vpack.c.bf16 %v2342_v9, %v2342_v9  ;;  %v7142_v9 = vld [vmem:[%s9563_s5 + $0x2b0] sm:$0xff] }
 0x6c9   :  { %v2312_v50 = vmul.f32 %v7387_v42, %v2311_v45  ;;  %v7151_v45 = vld [vmem:[%s9563_s5 + $0x2f8] sm:$0xff] }
 0x6ca   :  { %v2451_v56 = vunpack.c.l.b16 %v2346_v26  ;;  %v7137_v26 = vld [vmem:[%s9563_s5 + $0x288] sm:$0xff] }
 0x6cb   :  { %v2316_v15 = vsel %vm2315_vm7, %v7387_v42, %v2312_v50  ;;  %v7138_v50 = vld [vmem:[%s9563_s5 + $0x290] sm:$0xff] }
 0x6cc   :  { %v2338_v53 = vmul.f32 %v2316_v15, %v8692_v16  ;;  %v7146_v15 = vld [vmem:[%s9563_s5 + $0x2d0] sm:$0xff] }
 0x6ce   :  { %v2343_v54 = vmul.f32 %v8762_v63, %v2338_v53  ;;  %v7150_v53 = vld [vmem:[%s9563_s5 + $0x2f0] sm:$0xff] }
 0x6d0   :  { %v2347_v57 = vpack.c.bf16 %v2343_v54, %v2343_v54  ;;  %v7141_v54 = vld [vmem:[%s9563_s5 + $0x2a8] sm:$0xff] }
 0x6d2   :  { %v2452_v10 = vunpack.c.l.b16 %v2347_v57  ;;  %v7145_v57 = vld [vmem:[%s9563_s5 + $0x2c8] sm:$0xff] }
 0x6d4   :  { %v8768_v60 = vpack.c.b16 %v2452_v10, %v2451_v56  ;;  %v7149_v56 = vld [vmem:[%s9563_s5 + $0x2e8] sm:$0xff]  ;;  %v7136_v10 = vld [vmem:[%s9563_s5 + $0x280] sm:$0xff] }
 0x6d6   :  { %6153 = vmatmul.msk.bf16.vlgmr.msra.gmra.mxu2 %vm334_vm0, %v8768_v60  ;;  %6171 = vmatmul.msk.bf16.vlgmr.msra.gmra.mxu3 %vm334_vm0, %v8768_v60 }
 0x6d7   :  { %6189 = vmatmul.msk.bf16.vlgmr.msrb.gmra.mxu0 %vm334_vm0, %v8768_v60  ;;  %6207 = vmatmul.msk.bf16.vlgmr.msrb.gmra.mxu1 %vm334_vm0, %v8768_v60 }
 0x6d8   :  { %2835 = vmatpush.bf16.msra.mxu2 %v7139_v12  ;;  %2921 = vmatpush.bf16.msrb.mxu0 %v7147_v18 }
 0x6d9   :  { %2964 = vmatpush.bf16.msrb.mxu1 %v7151_v45 }
 0x6dc   :  { %2836 = vmatpush.bf16.msra.mxu2 %v7138_v50  ;;  %2922 = vmatpush.bf16.msrb.mxu0 %v7146_v15 }
 0x6dd   :  { %2965 = vmatpush.bf16.msrb.mxu1 %v7150_v53 }
 0x6e0   :  { %2837 = vmatpush.bf16.msra.mxu2 %v7137_v26  ;;  %2923 = vmatpush.bf16.msrb.mxu0 %v7145_v57 }
 0x6e1   :  { %2966 = vmatpush.bf16.msrb.mxu1 %v7149_v56 }
 0x6e4   :  { %2838 = vmatpush.bf16.msra.mxu2 %v7136_v10 }
 0x6f9   :  { %v2285_v21 = vpop.xlane.xlu0 %2284 }
 0x6fa   :  { %v2291_v5 = vmul.f32 %v2285_v21, %v8008_v25  ;;  %v7140_v21 = vld [vmem:[%s9563_s5 + $0x2a0] sm:$0xff] }
 0x6fc   :  { %v2295_v1 = vadd.f32 1e-06, %v2291_v5  ;;  %v7144_v5 = vld [vmem:[%s9563_s5 + $0x2c0] sm:$0xff] }
 0x6fd   :  { %2924 = vmatpush.bf16.msrb.mxu0 %v7144_v5 }
 0x6fe   :  { %7388 = vrsqrt.f32 %v2295_v1  ;;  %vm2323_vm9 = vweird.f32 %v2295_v1 }
 0x701   :  { %v2288_v19 = vpop.xlane.xlu1 %2287 }
 0x702   :  { %v2292_v3 = vmul.f32 %v2288_v19, %v8008_v25 }
 0x704   :  { %v7389_v46 = vpop.eup %7388  ;;  %v2296_v32 = vadd.f32 1e-06, %v2292_v3 }
 0x705   :  { %v2318_v35 = vmul.f32 %v7389_v46, %v2295_v1  ;;  %vm2324_vm8 = vweird.f32 %v7389_v46  ;;  %v7148_v1 = vld [vmem:[%s9563_s5 + $0x2e0] sm:$0xff] }
 0x706   :  { %7390 = vrsqrt.f32 %v2296_v32  ;;  %vm2325_vm10 = vmor %vm2323_vm9, %vm2324_vm8  ;;  %vm2333_vm12 = vweird.f32 %v2296_v32  ;;  %2967 = vmatpush.bf16.msrb.mxu1 %v7148_v1 }
 0x707   :  { %v2319_v58 = vmul.f32 %v7389_v46, %v2318_v35 }
 0x709   :  { %v2320_v39 = vmul.f32 0.5, %v2319_v58 }
 0x70b   :  { %v2321_v44 = vsub.f32 1.5, %v2320_v39 }
 0x70c   :  { %v7391_v38 = vpop.eup %7390 }
 0x70d   :  { %v2322_v28 = vmul.f32 %v7389_v46, %v2321_v44  ;;  %v2328_v52 = vmul.f32 %v7391_v38, %v2296_v32  ;;  %vm2334_vm11 = vweird.f32 %v7391_v38 }
 0x70e   :  { %vm2335_vm13 = vmor %vm2333_vm12, %vm2334_vm11 }
 0x70f   :  { %v2326_v47 = vsel %vm2325_vm10, %v7389_v46, %v2322_v28  ;;  %v2329_v43 = vmul.f32 %v7391_v38, %v2328_v52 }
 0x710   :  { %v2339_v4 = vmul.f32 %v2326_v47, %v8698_v27 }
 0x711   :  { %v2330_v36 = vmul.f32 0.5, %v2329_v43 }
 0x712   :  { %v2344_v48 = vmul.f32 %v8762_v63, %v2339_v4 }
 0x713   :  { %v2331_v0 = vsub.f32 1.5, %v2330_v36 }
 0x714   :  { %v2348_v40 = vpack.c.bf16 %v2344_v48, %v2344_v48 }
 0x715   :  { %v2332_v22 = vmul.f32 %v7391_v38, %v2331_v0 }
 0x716   :  { %v2453_v23 = vunpack.c.l.b16 %v2348_v40 }
 0x717   :  { %v2336_v55 = vsel %vm2335_vm13, %v7391_v38, %v2332_v22 }
 0x718   :  { %v2340_v8 = vmul.f32 %v2336_v55, %v8704_v14 }
 0x71a   :  { %v2345_v42 = vmul.f32 %v8762_v63, %v2340_v8  ;;  %v7143_v63 = vld [vmem:[%s9563_s5 + $0x2b8] sm:$0xff] }
 0x71b   :  { %2878 = vmatpush.bf16.msra.mxu3 %v7143_v63 }
 0x71c   :  { %v2349_v62 = vpack.c.bf16 %v2345_v42, %v2345_v42 }
 0x71e   :  { %v2454_v61 = vunpack.c.l.b16 %v2349_v62 }
 0x71f   :  { %2879 = vmatpush.bf16.msra.mxu3 %v7142_v9 }
 0x720   :  { %v2456_v2 = vpack.c.b16 %v2454_v61, %v2453_v23 }
 0x722   :  { %6154 = vmatmul.msk.bf16.gmra.mxu2 %vm334_vm0, %v2456_v2  ;;  %6172 = vmatmul.msk.bf16.gmra.mxu3 %vm334_vm0, %v2456_v2 }
 0x723   :  { %6190 = vmatmul.msk.bf16.gmra.mxu0 %vm334_vm0, %v2456_v2  ;;  %6208 = vmatmul.msk.bf16.gmra.mxu1 %vm334_vm0, %v2456_v2 }
 0x724   :  { %2880 = vmatpush.bf16.msra.mxu3 %v7141_v54 }
 0x728   :  { %2881 = vmatpush.bf16.msra.mxu3 %v7140_v21 }
 0x732   :  { %6225 = vmatmul.msk.bf16.vlgmr.msrb.gmra.mxu2 %vm334_vm0, %v8768_v60  ;;  %6243 = vmatmul.msk.bf16.vlgmr.msrb.gmra.mxu3 %vm334_vm0, %v8768_v60 }
 0x733   :  { %6261 = vmatmul.msk.bf16.vlgmr.msra.gmra.mxu0 %vm334_vm0, %v8768_v60  ;;  %6279 = vmatmul.msk.bf16.vlgmr.msra.gmra.mxu1 %vm334_vm0, %v8768_v60 }
 0x742   :  { %6226 = vmatmul.msk.bf16.gmra.mxu2 %vm334_vm0, %v2456_v2  ;;  %6244 = vmatmul.msk.bf16.gmra.mxu3 %vm334_vm0, %v2456_v2 }
 0x743   :  { %6262 = vmatmul.msk.bf16.gmra.mxu0 %vm334_vm0, %v2456_v2  ;;  %6280 = vmatmul.msk.bf16.gmra.mxu1 %vm334_vm0, %v2456_v2 }
 0x752   :  { %6297 = vmatmul.msk.bf16.vlgmr.msra.gmra.mxu2 %vm334_vm0, %v8768_v60  ;;  %6315 = vmatmul.msk.bf16.vlgmr.msra.gmra.mxu3 %vm334_vm0, %v8768_v60 }
 0x753   :  { %6333 = vmatmul.msk.bf16.vlgmr.msrb.gmra.mxu0 %vm334_vm0, %v8768_v60  ;;  %6351 = vmatmul.msk.bf16.vlgmr.msrb.gmra.mxu1 %vm334_vm0, %v8768_v60 }
 0x754   :  { %v8908_v19 = vpop.f32.mrf.mxu0  ;;  %v8910_v3 = vpop.f32.mrf.mxu1 }
 0x755   :  { %v2987_v56 = vpack.c.bf16 %v8908_v19, %v8908_v19 }
 0x759   :  { %v2496_v33 = vpop.f32.mrf.mxu2  ;;  %v2539_v29 = vpop.f32.mrf.mxu3 }
 0x75a   :  { %v2979_v4 = vpack.c.bf16 %v2496_v33, %v2496_v33  ;;  %v2983_v0 = vpack.c.bf16 %v2539_v29, %v2539_v29 }
 0x75c   :  { %v8912_v30 = vpop.f32.mrf.mxu0  ;;  %v8914_v46 = vpop.f32.mrf.mxu1 }
 0x761   :  { %v2498_v32 = vpop.f32.mrf.mxu2  ;;  %v2541_v60 = vpop.f32.mrf.mxu3 }
 0x762   :  { %6298 = vmatmul.msk.bf16.gmra.mxu2 %vm334_vm0, %v2456_v2  ;;  %6316 = vmatmul.msk.bf16.gmra.mxu3 %vm334_vm0, %v2456_v2  ;;  %v2980_v12 = vpack.c.bf16 %v2498_v32, %v2498_v32  ;;  %v2984_v63 = vpack.c.bf16 %v2541_v60, %v2541_v60 }
 0x763   :  { %6334 = vmatmul.msk.bf16.gmra.mxu0 %vm334_vm0, %v2456_v2  ;;  %6352 = vmatmul.msk.bf16.gmra.mxu1 %vm334_vm0, %v2456_v2 }
 0x7a0   :  { %v8916_v20 = vpop.f32.mrf.mxu0  ;;  %v8918_v35 = vpop.f32.mrf.mxu1 }
 0x7a5   :  { %v8920_v24 = vpop.f32.mrf.mxu2  ;;  %v8922_v51 = vpop.f32.mrf.mxu3 }
 0x7a6   :  { %v2981_v10 = vpack.c.bf16 %v8920_v24, %v8920_v24  ;;  %v2988_v24 = vpack.c.bf16 %v8912_v30, %v8912_v30  ;;  %v2991_v30 = vpack.c.bf16 %v8910_v3, %v8910_v3 }
 0x7a8   :  { %v8924_v41 = vpop.f32.mrf.mxu0  ;;  %v8926_v7 = vpop.f32.mrf.mxu1 }
 0x7ad   :  { %v8928_v58 = vpop.f32.mrf.mxu2  ;;  %v8930_v39 = vpop.f32.mrf.mxu3 }
 0x7b0   :  { %v2754_v17 = vpop.f32.mrf.mxu0  ;;  %v2797_v28 = vpop.f32.mrf.mxu1 }
 0x7b1   :  { %v3003_v37 = vpack.c.bf16 %v2754_v17, %v2754_v17  ;;  %v3007_v49 = vpack.c.bf16 %v2797_v28, %v2797_v28  ;;  %v2982_v17 = vpack.c.bf16 %v8928_v58, %v8928_v58  ;;  %v2985_v58 = vpack.c.bf16 %v8922_v51, %v8922_v51 }
 0x7b2   :  { %v2992_v51 = vpack.c.bf16 %v8914_v46, %v8914_v46 }
 0x7b3   :  { %v3183_v11 = vsel %vm1091_vm14, %v3003_v37, 0  ;;  %v3259_v40 = vsel %vm1091_vm14, %v3007_v49, 0 }
 0x7b5   :  { %v2668_v59 = vpop.f32.mrf.mxu2  ;;  %v2711_v13 = vpop.f32.mrf.mxu3 }
 0x7b6   :  { %v2995_v44 = vpack.c.bf16 %v2668_v59, %v2668_v59  ;;  %v2999_v38 = vpack.c.bf16 %v2711_v13, %v2711_v13 }
 0x7b8   :  { %v3031_v52 = vsel %vm1091_vm14, %v2995_v44, 0  ;;  %v3107_v31 = vsel %vm1091_vm14, %v2999_v38, 0  ;;  %v2756_v34 = vpop.f32.mrf.mxu0  ;;  %v2799_v42 = vpop.f32.mrf.mxu1 }
 0x7b9   :  { %3040 = vmatpush.bf16.xpose.msrb.mxu2 %v3031_v52  ;;  %3116 = vmatpush.bf16.xpose.msra.mxu0 %v3107_v31  ;;  %v3004_v47 = vpack.c.bf16 %v2756_v34, %v2756_v34  ;;  %v3008_v23 = vpack.c.bf16 %v2799_v42, %v2799_v42 }
 0x7bb   :  { %v3202_v62 = vsel %vm1091_vm14, %v3004_v47, 0  ;;  %v3278_v53 = vsel %vm1091_vm14, %v3008_v23, 0 }
 0x7bd   :  { %v2670_v43 = vpop.f32.mrf.mxu2  ;;  %v2713_v36 = vpop.f32.mrf.mxu3 }
 0x7be   :  { %v2996_v22 = vpack.c.bf16 %v2670_v43, %v2670_v43  ;;  %v3000_v48 = vpack.c.bf16 %v2713_v36, %v2713_v36 }
 0x7c0   :  { %6353 = vmatmul.msk.bf16.vlgmr.msrb.gmra.mxu2 %vm1091_vm14, %v2979_v4  ;;  %6357 = vmatmul.msk.bf16.vlgmr.msra.gmra.mxu0 %vm1091_vm14, %v2983_v0  ;;  %v3050_v55 = vsel %vm1091_vm14, %v2996_v22, 0  ;;  %v3126_v8 = vsel %vm1091_vm14, %v3000_v48, 0  ;;  %v2759_v50 = vpop.f32.mrf.mxu0  ;;  %v2802_v59 = vpop.f32.mrf.mxu1  ;;  %v2986_v0 = vpack.c.bf16 %v8930_v39, %v8930_v39 }
 0x7c1   :  { %3192 = vmatpush.bf16.xpose.msrb.mxu0 %v3183_v11  ;;  %3059 = vmatpush.bf16.xpose.msrb.mxu3 %v3050_v55  ;;  %v3005_v26 = vpack.c.bf16 %v2759_v50, %v2759_v50  ;;  %v3009_v28 = vpack.c.bf16 %v2802_v59, %v2802_v59  ;;  %v7478_v59 = vld [vmem:[%s9559_s1 + $0x20] sm:$0xff] }
 0x7c2   :  { %3135 = vmatpush.bf16.xpose.msra.mxu1 %v3126_v8 }
 0x7c3   :  { %v3221_v1 = vsel %vm1091_vm14, %v3005_v26, 0  ;;  %v3297_v34 = vsel %vm1091_vm14, %v3009_v28, 0  ;;  %v7479_v28 = vld [vmem:[%s9559_s1 + $0x10] sm:$0xff] }
 0x7c5   :  { %v2673_v61 = vpop.f32.mrf.mxu2  ;;  %v2716_v2 = vpop.f32.mrf.mxu3 }
 0x7c6   :  { %v2997_v18 = vpack.c.bf16 %v2673_v61, %v2673_v61  ;;  %v3001_v45 = vpack.c.bf16 %v2716_v2, %v2716_v2 }
 0x7c8   :  { %v3069_v9 = vsel %vm1091_vm14, %v2997_v18, 0  ;;  %v3145_v15 = vsel %vm1091_vm14, %v3001_v45, 0  ;;  %6354 = vmatmul.msk.bf16.vlgmr.msrb.gmra.mxu3 %vm1091_vm14, %v2980_v12  ;;  %v2761_v32 = vpop.f32.mrf.mxu0  ;;  %v2804_v43 = vpop.f32.mrf.mxu1 }
 0x7c9   :  { %3268 = vmatpush.bf16.xpose.msra.mxu0 %v3259_v40  ;;  %6358 = vmatmul.msk.bf16.vlgmr.msra.gmra.mxu1 %vm1091_vm14, %v2984_v63  ;;  %v3006_v19 = vpack.c.bf16 %v2761_v32, %v2761_v32  ;;  %v3010_v3 = vpack.c.bf16 %v2804_v43, %v2804_v43  ;;  %v2989_v40 = vpack.c.bf16 %v8916_v20, %v8916_v20 }
 0x7ca   :  { %3211 = vmatpush.bf16.xpose.msrb.mxu1 %v3202_v62  ;;  %3078 = vmatpush.bf16.xpose.msra.mxu2 %v3069_v9  ;;  %v2990_v62 = vpack.c.bf16 %v8924_v41, %v8924_v41  ;;  %v2993_v20 = vpack.c.bf16 %v8918_v35, %v8918_v35  ;;  %v2994_v41 = vpack.c.bf16 %v8926_v7, %v8926_v7 }
 0x7cb   :  { %v3240_v38 = vsel %vm1091_vm14, %v3006_v19, 0  ;;  %v3316_v48 = vsel %vm1091_vm14, %v3010_v3, 0  ;;  %v7477_v19 = vld [vmem:[%s9559_s1 + $0x8] sm:$0xff] }
 0x7cd   :  { %v2675_v54 = vpop.f32.mrf.mxu2  ;;  %v2718_v57 = vpop.f32.mrf.mxu3 }
 0x7ce   :  { %v2998_v21 = vpack.c.bf16 %v2675_v54, %v2675_v54  ;;  %v3002_v5 = vpack.c.bf16 %v2718_v57, %v2718_v57 }
 0x7d0   :  { %6361 = vmatmul.msk.bf16.vlgmr.msrb.gmra.mxu0 %vm1091_vm14, %v2987_v56  ;;  %v3088_v33 = vsel %vm1091_vm14, %v2998_v21, 0  ;;  %v3164_v29 = vsel %vm1091_vm14, %v3002_v5, 0  ;;  %v8996_v50 = vpop.f32.mrf.mxu0  ;;  %v8998_v9 = vpop.f32.mrf.mxu1 }
 0x7d1   :  { %6355 = vmatmul.msk.bf16.vlgmr.msra.gmra.mxu2 %vm1091_vm14, %v2981_v10  ;;  %3097 = vmatpush.bf16.xpose.msra.mxu3 %v3088_v33  ;;  %v7476_v10 = vld [vmem:[%s9559_s1] sm:$0xff] }
 0x7d2   :  { %3287 = vmatpush.bf16.xpose.msra.mxu1 %v3278_v53  ;;  %3154 = vmatpush.bf16.xpose.msrb.mxu2 %v3145_v15 }
 0x7d5   :  { %v2840_v60 = vpop.f32.mrf.mxu2  ;;  %v2883_v13 = vpop.f32.mrf.mxu3 }
 0x7d6   :  { %v3011_v37 = vpack.c.bf16 %v2840_v60, %v2840_v60  ;;  %v3015_v52 = vpack.c.bf16 %v2883_v13, %v2883_v13 }
 0x7d8   :  { %v3527_v44 = vsel %vm1592_vm15, %v3011_v37, 0  ;;  %6356 = vmatmul.msk.bf16.vlgmr.msra.gmra.mxu3 %vm1091_vm14, %v2982_v17  ;;  %v3603_v49 = vsel %vm1592_vm15, %v3015_v52, 0  ;;  %v9000_v35 = vpop.f32.mrf.mxu0  ;;  %v9002_v15 = vpop.f32.mrf.mxu1 }
 0x7d9   :  { %3173 = vmatpush.bf16.xpose.msrb.mxu3 %v3164_v29  ;;  %6362 = vmatmul.msk.bf16.vlgmr.msrb.gmra.mxu1 %vm1091_vm14, %v2988_v24 }
 0x7da   :  { %3230 = vmatpush.bf16.xpose.msra.mxu2 %v3221_v1  ;;  %3536 = vmatpush.bf16.msrb.mxu0 %v3527_v44 }
 0x7dd   :  { %v2842_v31 = vpop.f32.mrf.mxu2  ;;  %v2885_v36 = vpop.f32.mrf.mxu3 }
 0x7de   :  { %v3012_v11 = vpack.c.bf16 %v2842_v31, %v2842_v31  ;;  %v3016_v4 = vpack.c.bf16 %v2885_v36, %v2885_v36  ;;  %v7481_v36 = vld [vmem:[%s9559_s1 + $0x18] sm:$0xff] }
 0x7e0   :  { %6365 = vmatmul.msk.bf16.vlgmr.msra.gmra.mxu0 %vm1091_vm14, %v2991_v30  ;;  %v3546_v47 = vsel %vm1592_vm15, %v3012_v11, 0  ;;  %v3622_v55 = vsel %vm1592_vm15, %v3016_v4, 0  ;;  %v9004_v53 = vpop.f32.mrf.mxu0  ;;  %v9006_v26 = vpop.f32.mrf.mxu1 }
 0x7e1   :  { %3249 = vmatpush.bf16.xpose.msra.mxu3 %v3240_v38  ;;  %6359 = vmatmul.msk.bf16.vlgmr.msrb.gmra.mxu2 %vm1091_vm14, %v2985_v58 }
 0x7e2   :  { %3306 = vmatpush.bf16.xpose.msrb.mxu2 %v3297_v34  ;;  %3612 = vmatpush.bf16.msra.mxu0 %v3603_v49  ;;  %v7480_v34 = vld [vmem:[%s9559_s1 + $0x28] sm:$0xff] }
 0x7e3   :  { %3555 = vmatpush.bf16.msrb.mxu1 %v3546_v47 }
 0x7e5   :  { %v2845_v22 = vpop.f32.mrf.mxu2  ;;  %v2888_v23 = vpop.f32.mrf.mxu3 }
 0x7e6   :  { %v3013_v8 = vpack.c.bf16 %v2845_v22, %v2845_v22  ;;  %v3017_v2 = vpack.c.bf16 %v2888_v23, %v2888_v23 }
 0x7e8   :  { %6360 = vmatmul.msk.bf16.vlgmr.msrb.gmra.mxu3 %vm1091_vm14, %v2986_v0  ;;  %v3565_v46 = vsel %vm1592_vm15, %v3013_v8, 0  ;;  %v3641_v12 = vsel %vm1592_vm15, %v3017_v2, 0  ;;  %v9008_v54 = vpop.f32.mrf.mxu0  ;;  %v9010_v7 = vpop.f32.mrf.mxu1  ;;  %v7484_v2 = vld [vmem:[%s9559_s1 + $0x48] sm:$0xff] }
 0x7e9   :  { %6366 = vmatmul.msk.bf16.vlgmr.msra.gmra.mxu1 %vm1091_vm14, %v2992_v51  ;;  %3325 = vmatpush.bf16.xpose.msrb.mxu3 %v3316_v48  ;;  %v7482_v48 = vld [vmem:[%s9559_s1 + $0x40] sm:$0xff] }
 0x7ea   :  { %3631 = vmatpush.bf16.msra.mxu1 %v3622_v55 }
 0x7ed   :  { %v2847_v39 = vpop.f32.mrf.mxu2  ;;  %v2890_v63 = vpop.f32.mrf.mxu3 }
 0x7ee   :  { %v3014_v42 = vpack.c.bf16 %v2847_v39, %v2847_v39  ;;  %v3018_v18 = vpack.c.bf16 %v2890_v63, %v2890_v63 }
 0x7f0   :  { %v3584_v61 = vsel %vm1592_vm15, %v3014_v42, 0  ;;  %v3660_v45 = vsel %vm1592_vm15, %v3018_v18, 0  ;;  %v7485_v18 = vld [vmem:[%s9559_s1 + $0x38] sm:$0xff] }
 0x7f1   :  { %6363 = vmatmul.msk.bf16.vlgmr.msra.gmra.mxu2 %vm1091_vm14, %v2989_v40 }
 0x7f2   :  { %3574 = vmatpush.bf16.msra.mxu2 %v3565_v46  ;;  %v7483_v46 = vld [vmem:[%s9559_s1 + $0x30] sm:$0xff] }
 0x7f8   :  { %6364 = vmatmul.msk.bf16.vlgmr.msra.gmra.mxu3 %vm1091_vm14, %v2990_v62 }
 0x7f9   :  { %3593 = vmatpush.bf16.msra.mxu3 %v3584_v61 }
 0x801   :  { %6367 = vmatmul.msk.bf16.vlgmr.msrb.gmra.mxu2 %vm1091_vm14, %v2993_v20 }
 0x802   :  { %3650 = vmatpush.bf16.msrb.mxu2 %v3641_v12 }
 0x808   :  { %6368 = vmatmul.msk.bf16.vlgmr.msrb.gmra.mxu3 %vm1091_vm14, %v2994_v41 }
 0x809   :  { %3669 = vmatpush.bf16.msrb.mxu3 %v3660_v45 }
 0x83d   :  { %v3118_v57 = vpop.f32.mrf.mxu0 }
 0x83e   :  { %v9029_v13 = vadd.f32 %v7478_v59, %v3118_v57 }
 0x840   :  { %v3343_v58 = vsel %vm1396_vm1, %v9029_v13, -inf }
 0x843   :  { %v3042_v56 = vpop.f32.mrf.mxu2 }
 0x844   :  { %v9015_v21 = vadd.f32 %v7476_v10, %v3042_v56  ;;  %v7486_v10 = vld [vmem:[%s9559_s1 + $0x60] sm:$0xff] }
 0x845   :  { %v3120_v5 = vpop.f32.mrf.mxu0 }
 0x846   :  { %v3137_v1 = vpop.f32.mrf.mxu1  ;;  %v3331_v33 = vsel %vm1396_vm1, %v9015_v21, -inf }
 0x847   :  { %3332 = vmax.xlane.f32.xlu2 %v3331_v33  ;;  %v9043_v49 = vadd.f32 %v7480_v34, %v3137_v1  ;;  %v7490_v34 = vld [vmem:[%s9559_s1 + $0x70] sm:$0xff] }
 0x849   :  { %v3346_v0 = vsel %vm1396_vm1, %v9043_v49, -inf }
 0x84b   :  { %v3044_v29 = vpop.f32.mrf.mxu2  ;;  %v3061_v32 = vpop.f32.mrf.mxu3 }
 0x84c   :  { %v9022_v60 = vadd.f32 %v7477_v19, %v3061_v32  ;;  %v7487_v29 = vld [vmem:[%s9559_s1 + $0x50] sm:$0xff] }
 0x84d   :  { %v3194_v17 = vpop.f32.mrf.mxu0 }
 0x84e   :  { %v3139_v24 = vpop.f32.mrf.mxu1  ;;  %v3334_v37 = vsel %vm1396_vm1, %v9022_v60, -inf  ;;  %v9057_v55 = vadd.f32 %v7482_v48, %v3194_v17  ;;  %v7488_v17 = vld [vmem:[%s9559_s1 + $0x68] sm:$0xff] }
 0x84f   :  { %3335 = vmax.xlane.f32.xlu0 %v3334_v37 }
 0x850   :  { %v3355_v23 = vsel %vm1396_vm1, %v9057_v55, -inf }
 0x853   :  { %v3063_v44 = vpop.f32.mrf.mxu3 }
 0x854   :  { %v3080_v38 = vpop.f32.mrf.mxu2 }
 0x855   :  { %v9034_v52 = vadd.f32 %v7479_v28, %v3080_v38  ;;  %v3196_v31 = vpop.f32.mrf.mxu0  ;;  %v7489_v38 = vld [vmem:[%s9559_s1 + $0x58] sm:$0xff] }
 0x856   :  { %v3213_v30 = vpop.f32.mrf.mxu1 }
 0x857   :  { %v3337_v11 = vsel %vm1396_vm1, %v9034_v52, -inf  ;;  %3344 = vmax.xlane.f32.xlu0 %v3343_v58  ;;  %v9071_v20 = vadd.f32 %v7484_v2, %v3213_v30 }
 0x858   :  { %3338 = vmax.xlane.f32.xlu1 %v3337_v11 }
 0x859   :  { %v3358_v56 = vsel %vm1396_vm1, %v9071_v20, -inf }
 0x85b   :  { %v3099_v43 = vpop.f32.mrf.mxu3 }
 0x85c   :  { %v3082_v47 = vpop.f32.mrf.mxu2  ;;  %v9048_v3 = vadd.f32 %v7481_v36, %v3099_v43 }
 0x85d   :  { %v3270_v51 = vpop.f32.mrf.mxu0 }
 0x85e   :  { %v3215_v4 = vpop.f32.mrf.mxu1  ;;  %v3340_v22 = vsel %vm1396_vm1, %v9048_v3, -inf  ;;  %v9085_v5 = vadd.f32 %v7486_v10, %v3270_v51 }
 0x85f   :  { %3341 = vmax.xlane.f32.xlu2 %v3340_v22 }
 0x860   :  { %3347 = vmax.xlane.f32.xlu1 %v3346_v0  ;;  %v3367_v24 = vsel %vm1396_vm1, %v9085_v5, -inf }
 0x863   :  { %v3101_v8 = vpop.f32.mrf.mxu3 }
 0x864   :  { %v3156_v40 = vpop.f32.mrf.mxu2 }
 0x865   :  { %v9062_v39 = vadd.f32 %v7483_v46, %v3156_v40  ;;  %v3272_v42 = vpop.f32.mrf.mxu0 }
 0x866   :  { %v3289_v62 = vpop.f32.mrf.mxu1 }
 0x867   :  { %v3349_v61 = vsel %vm1396_vm1, %v9062_v39, -inf  ;;  %v9099_v37 = vadd.f32 %v7488_v17, %v3289_v62 }
 0x868   :  { %3356 = vmax.xlane.f32.xlu1 %v3355_v23  ;;  %3350 = vmax.xlane.f32.xlu2 %v3349_v61  ;;  %v7491_v23 = vld [vmem:[%s9559_s1 + $0x78] sm:$0xff] }
 0x869   :  { %v3370_v31 = vsel %vm1396_vm1, %v9099_v37, -inf }
 0x86b   :  { %v3175_v63 = vpop.f32.mrf.mxu3 }
 0x86c   :  { %v3158_v12 = vpop.f32.mrf.mxu2  ;;  %v9076_v41 = vadd.f32 %v7485_v18, %v3175_v63 }
 0x86e   :  { %v3291_v45 = vpop.f32.mrf.mxu1  ;;  %v3352_v57 = vsel %vm1396_vm1, %v9076_v41, -inf }
 0x86f   :  { %3353 = vmax.xlane.f32.xlu0 %v3352_v57 }
 0x870   :  { %3359 = vmax.xlane.f32.xlu2 %v3358_v56 }
 0x873   :  { %v3177_v1 = vpop.f32.mrf.mxu3 }
 0x874   :  { %v3232_v33 = vpop.f32.mrf.mxu2 }
 0x875   :  { %v9090_v32 = vadd.f32 %v7487_v29, %v3232_v33 }
 0x877   :  { %v3361_v19 = vsel %vm1396_vm1, %v9090_v32, -inf }
 0x878   :  { %3362 = vmax.xlane.f32.xlu0 %v3361_v19  ;;  %3368 = vmax.xlane.f32.xlu2 %v3367_v24 }
 0x87b   :  { %v3251_v44 = vpop.f32.mrf.mxu3 }
 0x87c   :  { %v3234_v59 = vpop.f32.mrf.mxu2  ;;  %v9104_v28 = vadd.f32 %v7489_v38, %v3251_v44 }
 0x87e   :  { %v3364_v30 = vsel %vm1396_vm1, %v9104_v28, -inf }
 0x87f   :  { %3365 = vmax.xlane.f32.xlu1 %v3364_v30 }
 0x880   :  { %3371 = vmax.xlane.f32.xlu0 %v3370_v31 }
 0x883   :  { %v3253_v58 = vpop.f32.mrf.mxu3 }
 0x884   :  { %v3308_v11 = vpop.f32.mrf.mxu2 }
 0x885   :  { %v9113_v47 = vadd.f32 %v7490_v34, %v3308_v11 }
 0x887   :  { %v3373_v43 = vsel %vm1396_vm1, %v9113_v47, -inf }
 0x888   :  { %3374 = vmax.xlane.f32.xlu0 %v3373_v43 }
 0x88b   :  { %v3327_v4 = vpop.f32.mrf.mxu3 }
 0x88c   :  { %v3310_v36 = vpop.f32.mrf.mxu2  ;;  %v9126_v61 = vadd.f32 %v7491_v23, %v3327_v4 }
 0x88e   :  { %v3376_v56 = vsel %vm1396_vm1, %v9126_v61, -inf }
 0x893   :  { %v3329_v51 = vpop.f32.mrf.mxu3 }
 0x8ba   :  { %v3333_v0 = vpop.xlane.xlu2 %3332 }
 0x8bb   :  { %v3379_v22 = vsub.f32 %v9015_v21, %v3333_v0 }
 0x8bd   :  { %v3395_v48 = vmul.f32 1.442695, %v3379_v22 }
 0x8bf   :  { %7392 = vpow2.f32 %v3395_v48 }
 0x8c2   :  { %v3336_v8 = vpop.xlane.xlu0 %3335 }
 0x8c3   :  { %v3380_v40 = vsub.f32 %v9022_v60, %v3336_v8 }
 0x8c5   :  { %v9119_v46 = vpop.eup %7392  ;;  %v3397_v42 = vmul.f32 1.442695, %v3380_v40 }
 0x8c6   :  { %v3427_v62 = vsel %vm1396_vm1, %v9119_v46, 0.0 }
 0x8c7   :  { %7394 = vpow2.f32 %v3397_v42  ;;  %3428 = vadd.xlane.f32.xlu1 %v3427_v62 }
 0x8ca   :  { %v3345_v21 = vpop.xlane.xlu0 %3344 }
 0x8cb   :  { %v3339_v2 = vpop.xlane.xlu1 %3338  ;;  %v3383_v12 = vsub.f32 %v9029_v13, %v3345_v21 }
 0x8cc   :  { %v3381_v60 = vsub.f32 %v9034_v52, %v3339_v2 }
 0x8cd   :  { %v9130_v63 = vpop.eup %7394  ;;  %v3403_v18 = vmul.f32 1.442695, %v3383_v12 }
 0x8ce   :  { %v3399_v45 = vmul.f32 1.442695, %v3381_v60  ;;  %v3430_v57 = vsel %vm1396_vm1, %v9130_v63, 0.0 }
 0x8cf   :  { %7396 = vpow2.f32 %v3403_v18  ;;  %3431 = vadd.xlane.f32.xlu2 %v3430_v57  ;;  %3377 = vmax.xlane.f32.xlu1 %v3376_v56 }
 0x8d0   :  { %7398 = vpow2.f32 %v3399_v45 }
 0x8d2   :  { %v3342_v1 = vpop.xlane.xlu2 %3341 }
 0x8d3   :  { %v3348_v10 = vpop.xlane.xlu1 %3347  ;;  %v3382_v52 = vsub.f32 %v9048_v3, %v3342_v1 }
 0x8d4   :  { %v3384_v13 = vsub.f32 %v9043_v49, %v3348_v10 }
 0x8d5   :  { %v9138_v33 = vpop.eup %7396  ;;  %v3401_v19 = vmul.f32 1.442695, %v3382_v52 }
 0x8d6   :  { %v3405_v29 = vmul.f32 1.442695, %v3384_v13  ;;  %v9140_v24 = vpop.eup %7398  ;;  %v3439_v17 = vsel %vm1396_vm1, %v9138_v33, 0.0 }
 0x8d7   :  { %v3433_v59 = vsel %vm1396_vm1, %v9140_v24, 0.0  ;;  %3440 = vadd.xlane.f32.xlu1 %v3439_v17 }
 0x8d8   :  { %7400 = vpow2.f32 %v3405_v29  ;;  %3434 = vadd.xlane.f32.xlu2 %v3433_v59 }
 0x8d9   :  { %7402 = vpow2.f32 %v3401_v19 }
 0x8db   :  { %v3357_v44 = vpop.xlane.xlu1 %3356  ;;  %v3351_v49 = vpop.xlane.xlu2 %3350 }
 0x8dc   :  { %v3387_v3 = vsub.f32 %v9057_v55, %v3357_v44  ;;  %v3385_v38 = vsub.f32 %v9062_v39, %v3351_v49 }
 0x8de   :  { %v9148_v31 = vpop.eup %7400  ;;  %v3411_v30 = vmul.f32 1.442695, %v3387_v3  ;;  %v3407_v58 = vmul.f32 1.442695, %v3385_v38 }
 0x8df   :  { %v9150_v11 = vpop.eup %7402  ;;  %v3442_v34 = vsel %vm1396_vm1, %v9148_v31, 0.0 }
 0x8e0   :  { %7404 = vpow2.f32 %v3411_v30  ;;  %v3436_v43 = vsel %vm1396_vm1, %v9150_v11, 0.0  ;;  %3443 = vadd.xlane.f32.xlu2 %v3442_v34 }
 0x8e1   :  { %7406 = vpow2.f32 %v3407_v58  ;;  %3437 = vadd.xlane.f32.xlu0 %v3436_v43  ;;  %v3019_v58 = vpack.c.bf16 %v8996_v50, %v8996_v50 }
 0x8e2   :  { %v3354_v36 = vpop.xlane.xlu0 %3353 }
 0x8e3   :  { %v3360_v55 = vpop.xlane.xlu2 %3359  ;;  %v3386_v39 = vsub.f32 %v9076_v41, %v3354_v36 }
 0x8e4   :  { %v3388_v4 = vsub.f32 %v9071_v20, %v3360_v55 }
 0x8e5   :  { %v3409_v0 = vmul.f32 1.442695, %v3386_v39 }
 0x8e6   :  { %v9158_v51 = vpop.eup %7404  ;;  %v3413_v22 = vmul.f32 1.442695, %v3388_v4 }
 0x8e7   :  { %v9160_v48 = vpop.eup %7406  ;;  %v3451_v8 = vsel %vm1396_vm1, %v9158_v51, 0.0  ;;  %7408 = vpow2.f32 %v3409_v0  ;;  %v3679_v0 = vsel %vm1592_vm15, %v3019_v58, 0 }
 0x8e8   :  { %v3445_v40 = vsel %vm1396_vm1, %v9160_v48, 0.0  ;;  %7410 = vpow2.f32 %v3413_v22  ;;  %3452 = vadd.xlane.f32.xlu2 %v3451_v8  ;;  %v3020_v8 = vpack.c.bf16 %v9000_v35, %v9000_v35 }
 0x8e9   :  { %3446 = vadd.xlane.f32.xlu0 %v3445_v40 }
 0x8eb   :  { %v3363_v42 = vpop.xlane.xlu0 %3362  ;;  %v3369_v41 = vpop.xlane.xlu2 %3368 }
 0x8ec   :  { %v3389_v20 = vsub.f32 %v9090_v32, %v3363_v42  ;;  %v3391_v62 = vsub.f32 %v9085_v5, %v3369_v41  ;;  %v3698_v41 = vsel %vm1592_vm15, %v3020_v8, 0 }
 0x8ed   :  { %v9168_v23 = vpop.eup %7408 }
 0x8ee   :  { %v3415_v21 = vmul.f32 1.442695, %v3389_v20  ;;  %v3419_v2 = vmul.f32 1.442695, %v3391_v62  ;;  %v9170_v12 = vpop.eup %7410  ;;  %v3448_v60 = vsel %vm1396_vm1, %v9168_v23, 0.0 }
 0x8ef   :  { %3449 = vadd.xlane.f32.xlu1 %v3448_v60  ;;  %v3454_v18 = vsel %vm1396_vm1, %v9170_v12, 0.0 }
 0x8f0   :  { %7412 = vpow2.f32 %v3415_v21 }
 0x8f1   :  { %7414 = vpow2.f32 %v3419_v2  ;;  %3455 = vadd.xlane.f32.xlu0 %v3454_v18  ;;  %v3021_v2 = vpack.c.bf16 %v9004_v53, %v9004_v53 }
 0x8f2   :  { %v3366_v32 = vpop.xlane.xlu1 %3365 }
 0x8f3   :  { %v3372_v45 = vpop.xlane.xlu0 %3371  ;;  %v3390_v57 = vsub.f32 %v9104_v28, %v3366_v32 }
 0x8f4   :  { %v3392_v5 = vsub.f32 %v9099_v37, %v3372_v45 }
 0x8f5   :  { %v3417_v1 = vmul.f32 1.442695, %v3390_v57 }
 0x8f6   :  { %v9178_v56 = vpop.eup %7412  ;;  %v3421_v10 = vmul.f32 1.442695, %v3392_v5 }
 0x8f7   :  { %v9180_v13 = vpop.eup %7414  ;;  %v3457_v52 = vsel %vm1396_vm1, %v9178_v56, 0.0 }
 0x8f8   :  { %7416 = vpow2.f32 %v3421_v10  ;;  %3458 = vadd.xlane.f32.xlu1 %v3457_v52  ;;  %v3463_v29 = vsel %vm1396_vm1, %v9180_v13, 0.0  ;;  %v3717_v10 = vsel %vm1592_vm15, %v3021_v2, 0 }
 0x8f9   :  { %7418 = vpow2.f32 %v3417_v1  ;;  %3464 = vadd.xlane.f32.xlu0 %v3463_v29  ;;  %v3024_v29 = vpack.c.bf16 %v9002_v15, %v9002_v15  ;;  %v3025_v15 = vpack.c.bf16 %v9006_v26, %v9006_v26 }
 0x8fb   :  { %v3375_v19 = vpop.xlane.xlu0 %3374 }
 0x8fc   :  { %v3393_v37 = vsub.f32 %v9113_v47, %v3375_v19 }
 0x8fe   :  { %v9187_v28 = vpop.eup %7416  ;;  %v3423_v17 = vmul.f32 1.442695, %v3393_v37 }
 0x8ff   :  { %v9189_v59 = vpop.eup %7418  ;;  %v3466_v44 = vsel %vm1396_vm1, %v9187_v28, 0.0 }
 0x900   :  { %7420 = vpow2.f32 %v3423_v17  ;;  %v3460_v49 = vsel %vm1396_vm1, %v9189_v59, 0.0  ;;  %3467 = vadd.xlane.f32.xlu1 %v3466_v44 }
 0x901   :  { %3461 = vadd.xlane.f32.xlu2 %v3460_v49 }
 0x906   :  { %v9195_v3 = vpop.eup %7420 }
 0x907   :  { %v3469_v38 = vsel %vm1396_vm1, %v9195_v3, 0.0 }
 0x909   :  { %3470 = vadd.xlane.f32.xlu2 %v3469_v38 }
 0x93a   :  { %v3429_v47 = vpop.xlane.xlu1 %3428 }
 0x93b   :  { %7422 = vrcp.f32 %v3429_v47 }
 0x941   :  { %v7423_v30 = vpop.eup %7422 }
 0x942   :  { %v3491_v34 = vmul.f32 %v7423_v30, %v9119_v46  ;;  %v3378_v43 = vpop.xlane.xlu1 %3377  ;;  %v3432_v36 = vpop.xlane.xlu2 %3431 }
 0x943   :  { %v3394_v55 = vsub.f32 %v9126_v61, %v3378_v43  ;;  %7424 = vrcp.f32 %v3432_v36  ;;  %v3793_v43 = vsel %vm1592_vm15, %v3025_v15, 0 }
 0x944   :  { %v3507_v39 = vpack.c.bf16 %v3491_v34, %v3491_v34 }
 0x945   :  { %v3425_v4 = vmul.f32 1.442695, %v3394_v55 }
 0x946   :  { %6369 = vmatmul.msk.bf16.vlgmr.msrb.gmra.mxu0 %vm1396_vm1, %v3507_v39 }
 0x947   :  { %7426 = vpow2.f32 %v3425_v4  ;;  %3688 = vmatpush.bf16.msrb.mxu0 %v3679_v0 }
 0x949   :  { %v7425_v22 = vpop.eup %7424 }
 0x94a   :  { %v3492_v50 = vmul.f32 %v7425_v22, %v9130_v63  ;;  %v3441_v46 = vpop.xlane.xlu1 %3440  ;;  %v3023_v63 = vpack.c.bf16 %v8998_v9, %v8998_v9 }
 0x94b   :  { %7428 = vrcp.f32 %v3441_v46  ;;  %v3435_v40 = vpop.xlane.xlu2 %3434 }
 0x94c   :  { %v3508_v42 = vpack.c.bf16 %v3492_v50, %v3492_v50  ;;  %7430 = vrcp.f32 %v3435_v40  ;;  %v3755_v57 = vsel %vm1592_vm15, %v3023_v63, 0 }
 0x94d   :  { %v9208_v61 = vpop.eup %7426 }
 0x94e   :  { %6370 = vmatmul.msk.bf16.vlgmr.msrb.gmra.mxu1 %vm1396_vm1, %v3508_v42  ;;  %v3472_v20 = vsel %vm1396_vm1, %v9208_v61, 0.0 }
 0x94f   :  { %3707 = vmatpush.bf16.msrb.mxu1 %v3698_v41  ;;  %3473 = vadd.xlane.f32.xlu0 %v3472_v20 }
 0x951   :  { %v7429_v62 = vpop.eup %7428 }
 0x952   :  { %v7431_v35 = vpop.eup %7430  ;;  %v3495_v21 = vmul.f32 %v7429_v62, %v9138_v33  ;;  %v3022_v33 = vpack.c.bf16 %v9008_v54, %v9008_v54  ;;  %v3774_v54 = vsel %vm1592_vm15, %v3024_v29, 0 }
 0x953   :  { %v3493_v60 = vmul.f32 %v7431_v35, %v9140_v24  ;;  %v3444_v45 = vpop.xlane.xlu2 %3443 }
 0x954   :  { %v3438_v18 = vpop.xlane.xlu0 %3437  ;;  %v3511_v32 = vpack.c.bf16 %v3495_v21, %v3495_v21  ;;  %v3736_v44 = vsel %vm1592_vm15, %v3022_v33, 0  ;;  %v7154_v33 = vld [vmem:[%s9564_s6 + $0x30] sm:$0xff] }
 0x955   :  { %7432 = vrcp.f32 %v3438_v18  ;;  %v3509_v5 = vpack.c.bf16 %v3493_v60, %v3493_v60 }
 0x956   :  { %7434 = vrcp.f32 %v3444_v45  ;;  %6373 = vmatmul.msk.bf16.vlgmr.msra.gmra.mxu0 %vm1396_vm1, %v3511_v32 }
 0x957   :  { %6371 = vmatmul.msk.bf16.vlgmr.msra.gmra.mxu2 %vm1396_vm1, %v3509_v5  ;;  %3764 = vmatpush.bf16.msra.mxu0 %v3755_v57 }
 0x958   :  { %3726 = vmatpush.bf16.msra.mxu2 %v3717_v10 }
 0x95b   :  { %v7433_v9 = vpop.eup %7432  ;;  %v3453_v52 = vpop.xlane.xlu2 %3452 }
 0x95c   :  { %v7435_v53 = vpop.eup %7434  ;;  %v3494_v24 = vmul.f32 %v7433_v9, %v9150_v11  ;;  %v3447_v1 = vpop.xlane.xlu0 %3446 }
 0x95d   :  { %v3496_v19 = vmul.f32 %v7435_v53, %v9148_v31  ;;  %7436 = vrcp.f32 %v3447_v1 }
 0x95e   :  { %v3510_v37 = vpack.c.bf16 %v3494_v24, %v3494_v24  ;;  %7438 = vrcp.f32 %v3453_v52 }
 0x95f   :  { %v3512_v17 = vpack.c.bf16 %v3496_v19, %v3496_v19 }
 0x960   :  { %6372 = vmatmul.msk.bf16.vlgmr.msra.gmra.mxu3 %vm1396_vm1, %v3510_v37 }
 0x961   :  { %6374 = vmatmul.msk.bf16.vlgmr.msra.gmra.mxu1 %vm1396_vm1, %v3512_v17  ;;  %3745 = vmatpush.bf16.msra.mxu3 %v3736_v44 }
 0x962   :  { %3783 = vmatpush.bf16.msra.mxu1 %v3774_v54  ;;  %v3450_v49 = vpop.xlane.xlu1 %3449 }
 0x963   :  { %v7437_v11 = vpop.eup %7436  ;;  %7440 = vrcp.f32 %v3450_v49 }
 0x964   :  { %v7439_v38 = vpop.eup %7438  ;;  %v3497_v31 = vmul.f32 %v7437_v11, %v9160_v48  ;;  %v3456_v47 = vpop.xlane.xlu0 %3455  ;;  %v3026_v48 = vpack.c.bf16 %v9010_v7, %v9010_v7 }
 0x965   :  { %v3499_v30 = vmul.f32 %v7439_v38, %v9158_v51  ;;  %7442 = vrcp.f32 %v3456_v47 }
 0x966   :  { %v3513_v58 = vpack.c.bf16 %v3497_v31, %v3497_v31  ;;  %v3812_v8 = vsel %vm1592_vm15, %v3026_v48, 0 }
 0x967   :  { %v3515_v34 = vpack.c.bf16 %v3499_v30, %v3499_v30 }
 0x968   :  { %6375 = vmatmul.msk.bf16.vlgmr.msrb.gmra.mxu2 %vm1396_vm1, %v3513_v58 }
 0x969   :  { %6377 = vmatmul.msk.bf16.vlgmr.msrb.gmra.mxu0 %vm1396_vm1, %v3515_v34  ;;  %3802 = vmatpush.bf16.msrb.mxu2 %v3793_v43  ;;  %v7441_v36 = vpop.eup %7440 }
 0x96a   :  { %v3498_v26 = vmul.f32 %v7441_v36, %v9168_v23 }
 0x96b   :  { %v7443_v55 = vpop.eup %7442  ;;  %v3459_v39 = vpop.xlane.xlu1 %3458 }
 0x96c   :  { %v3500_v51 = vmul.f32 %v7443_v55, %v9170_v12  ;;  %7444 = vrcp.f32 %v3459_v39  ;;  %v3465_v4 = vpop.xlane.xlu0 %3464  ;;  %v3514_v0 = vpack.c.bf16 %v3498_v26, %v3498_v26 }
 0x96d   :  { %7446 = vrcp.f32 %v3465_v4 }
 0x96e   :  { %v3516_v22 = vpack.c.bf16 %v3500_v51, %v3500_v51 }
 0x970   :  { %6376 = vmatmul.msk.bf16.vlgmr.msrb.gmra.mxu3 %vm1396_vm1, %v3514_v0 }
 0x971   :  { %6378 = vmatmul.msk.bf16.vlgmr.msrb.gmra.mxu1 %vm1396_vm1, %v3516_v22  ;;  %3821 = vmatpush.bf16.msrb.mxu3 %v3812_v8 }
 0x972   :  { %v7445_v50 = vpop.eup %7444 }
 0x973   :  { %v7447_v23 = vpop.eup %7446  ;;  %v3501_v46 = vmul.f32 %v7445_v50, %v9178_v56  ;;  %v3468_v40 = vpop.xlane.xlu1 %3467 }
 0x974   :  { %v3503_v7 = vmul.f32 %v7447_v23, %v9180_v13  ;;  %7448 = vrcp.f32 %v3468_v40  ;;  %v3462_v12 = vpop.xlane.xlu2 %3461 }
 0x975   :  { %v3517_v42 = vpack.c.bf16 %v3501_v46, %v3501_v46  ;;  %7450 = vrcp.f32 %v3462_v12 }
 0x976   :  { %v3519_v41 = vpack.c.bf16 %v3503_v7, %v3503_v7 }
 0x978   :  { %6379 = vmatmul.msk.bf16.vlgmr.msra.gmra.mxu2 %vm1396_vm1, %v3517_v42 }
 0x979   :  { %6381 = vmatmul.msk.bf16.vlgmr.msra.gmra.mxu0 %vm1396_vm1, %v3519_v41  ;;  %3923 = vmatpush.bf16.msra.mxu2 %v7154_v33 }
 0x97a   :  { %v7449_v20 = vpop.eup %7448 }
 0x97b   :  { %v7451_v62 = vpop.eup %7450  ;;  %v3504_v35 = vmul.f32 %v7449_v20, %v9187_v28  ;;  %v7152_v28 = vld [vmem:[%s9564_s6 + $0x20] sm:$0xff] }
 0x97c   :  { %v3502_v63 = vmul.f32 %v7451_v62, %v9189_v59  ;;  %v3471_v21 = vpop.xlane.xlu2 %3470  ;;  %3890 = vmatpush.bf16.msrb.mxu1 %v7152_v28  ;;  %v7153_v59 = vld [vmem:[%s9564_s6 + $0x28] sm:$0xff] }
 0x97d   :  { %v3520_v56 = vpack.c.bf16 %v3504_v35, %v3504_v35  ;;  %7452 = vrcp.f32 %v3471_v21  ;;  %3859 = vmatpush.bf16.msrb.mxu0 %v7153_v59 }
 0x97e   :  { %v3518_v2 = vpack.c.bf16 %v3502_v63, %v3502_v63 }
 0x980   :  { %6380 = vmatmul.msk.bf16.vlgmr.msra.gmra.mxu3 %vm1396_vm1, %v3518_v2 }
 0x981   :  { %6382 = vmatmul.msk.bf16.vlgmr.msra.gmra.mxu1 %vm1396_vm1, %v3520_v56 }
 0x983   :  { %v7453_v13 = vpop.eup %7452 }
 0x984   :  { %v3505_v60 = vmul.f32 %v7453_v13, %v9195_v3 }
 0x986   :  { %v3521_v18 = vpack.c.bf16 %v3505_v60, %v3505_v60 }
 0x988   :  { %6383 = vmatmul.msk.bf16.vlgmr.msrb.gmra.mxu2 %vm1396_vm1, %v3521_v18 }
 0x9c2   :  { %v3474_v45 = vpop.xlane.xlu0 %3473 }
 0x9c3   :  { %7454 = vrcp.f32 %v3474_v45  ;;  %v3538_v32 = vpop.f32.mrf.mxu0 }
 0x9c9   :  { %v7455_v5 = vpop.eup %7454 }
 0x9ca   :  { %v3506_v57 = vmul.f32 %v7455_v5, %v9208_v61  ;;  %v7155_v61 = vld [vmem:[%s9564_s6 + $0x38] sm:$0xff] }
 0x9cb   :  { %v3540_v3 = vpop.f32.mrf.mxu0  ;;  %v3557_v10 = vpop.f32.mrf.mxu1  ;;  %3960 = vmatpush.bf16.msra.mxu3 %v7155_v61 }
 0x9cc   :  { %v3522_v9 = vpack.c.bf16 %v3506_v57, %v3506_v57  ;;  %v3836_v53 = vpack.c.bf16 %v3557_v10, %v3538_v32 }
 0x9ce   :  { %6384 = vmatmul.msk.bf16.vlgmr.msrb.gmra.mxu3 %vm1396_vm1, %v3522_v9  ;;  %6403 = vmatmul.msk.bf16.vlgmr.msrb.gmra.mxu1 %vm1091_vm14, %v3836_v53 }
 0x9d3   :  { %v3559_v24 = vpop.f32.mrf.mxu1  ;;  %v3614_v1 = vpop.f32.mrf.mxu0 }
 0x9da   :  { %v3576_v52 = vpop.f32.mrf.mxu2 }
 0x9db   :  { %v3616_v29 = vpop.f32.mrf.mxu0 }
 0x9de   :  { %v3633_v19 = vpop.f32.mrf.mxu1 }
 0x9df   :  { %v3838_v37 = vpack.c.bf16 %v3633_v19, %v3614_v1 }
 0x9e1   :  { %6397 = vmatmul.msk.bf16.vlgmr.msrb.gmra.mxu0 %vm1091_vm14, %v3838_v37 }
 0x9e2   :  { %v3578_v17 = vpop.f32.mrf.mxu2 }
 0x9e3   :  { %v3595_v44 = vpop.f32.mrf.mxu3 }
 0x9e4   :  { %v3837_v54 = vpack.c.bf16 %v3595_v44, %v3576_v52 }
 0x9e6   :  { %v3635_v11 = vpop.f32.mrf.mxu1  ;;  %v3690_v49 = vpop.f32.mrf.mxu0  ;;  %6404 = vmatmul.msk.bf16.gmra.mxu1 %vm1091_vm14, %v3837_v54 }
 0x9eb   :  { %v3597_v38 = vpop.f32.mrf.mxu3  ;;  %v3652_v15 = vpop.f32.mrf.mxu2 }
 0x9ee   :  { %v3692_v31 = vpop.f32.mrf.mxu0  ;;  %v3709_v47 = vpop.f32.mrf.mxu1 }
 0x9ef   :  { %v3902_v30 = vpack.c.bf16 %v3709_v47, %v3690_v49  ;;  %v7159_v47 = vld [vmem:[%s9565_s7 + $0x38] sm:$0xff] }
 0x9f0   :  { %4099 = vmatpush.bf16.msra.mxu0 %v7159_v47 }
 0x9f1   :  { %6409 = vmatmul.msk.bf16.vlgmr.msra.gmra.mxu2 %vm1091_vm14, %v3902_v30  ;;  %v7158_v30 = vld [vmem:[%s9565_s7 + $0x30] sm:$0xff] }
 0x9f3   :  { %v3654_v58 = vpop.f32.mrf.mxu2  ;;  %v3671_v34 = vpop.f32.mrf.mxu3 }
 0x9f4   :  { %v3839_v43 = vpack.c.bf16 %v3671_v34, %v3652_v15  ;;  %4100 = vmatpush.bf16.msra.mxu0 %v7158_v30  ;;  %v7162_v30 = vld [vmem:[%s9566_s8 + $0x50] sm:$0xff] }
 0x9f6   :  { %v3711_v36 = vpop.f32.mrf.mxu1  ;;  %v3766_v55 = vpop.f32.mrf.mxu0  ;;  %6398 = vmatmul.msk.bf16.gmra.mxu0 %vm1091_vm14, %v3839_v43  ;;  %v7156_v43 = vld [vmem:[%s9565_s7 + $0x20] sm:$0xff] }
 0x9fb   :  { %v3673_v26 = vpop.f32.mrf.mxu3  ;;  %v3728_v39 = vpop.f32.mrf.mxu2 }
 0x9fe   :  { %v3768_v48 = vpop.f32.mrf.mxu0  ;;  %v3785_v51 = vpop.f32.mrf.mxu1 }
 0x9ff   :  { %v3939_v4 = vpack.c.bf16 %v3785_v51, %v3766_v55 }
 0xa01   :  { %6415 = vmatmul.msk.bf16.vlgmr.msra.gmra.mxu3 %vm1091_vm14, %v3939_v4 }
 0xa03   :  { %v3730_v0 = vpop.f32.mrf.mxu2  ;;  %v3747_v22 = vpop.f32.mrf.mxu3 }
 0xa04   :  { %v3903_v8 = vpack.c.bf16 %v3747_v22, %v3728_v39 }
 0xa06   :  { %v3787_v50 = vpop.f32.mrf.mxu1  ;;  %6410 = vmatmul.msk.bf16.gmra.mxu2 %vm1091_vm14, %v3903_v8 }
 0xa0b   :  { %v3749_v23 = vpop.f32.mrf.mxu3  ;;  %v3804_v46 = vpop.f32.mrf.mxu2 }
 0xa13   :  { %v3806_v40 = vpop.f32.mrf.mxu2 }
 0xa4b   :  { %v3892_v20 = vpop.f32.mrf.mxu1 }
 0xa51   :  { %v3823_v7 = vpop.f32.mrf.mxu3 }
 0xa52   :  { %v3940_v12 = vpack.c.bf16 %v3823_v7, %v3804_v46 }
 0xa53   :  { %v3894_v60 = vpop.f32.mrf.mxu1 }
 0xa54   :  { %6416 = vmatmul.msk.bf16.gmra.mxu3 %vm1091_vm14, %v3940_v12 }
 0xa59   :  { %v3825_v42 = vpop.f32.mrf.mxu3 }
 0xa5e   :  { %v3861_v41 = vpop.f32.mrf.mxu0 }
 0xa5f   :  { %v3893_v35 = vadd.f32 %v3892_v20, %v3861_v41  ;;  %v7300_v41 = vld [vmem:[%s9561_s3 + $0x1] ss:$0 sm:$0xff] }
 0xa63   :  { %v3897_v53 = vpop.f32.mrf.mxu1 }
 0xa66   :  { %v3863_v2 = vpop.f32.mrf.mxu0 }
 0xa67   :  { %v3895_v28 = vadd.f32 %v3894_v60, %v3863_v2 }
 0xa6b   :  { %v3899_v37 = vpop.f32.mrf.mxu1 }
 0xa73   :  { %v3866_v9 = vpop.f32.mrf.mxu0 }
 0xa74   :  { %v3925_v62 = vpop.f32.mrf.mxu2  ;;  %v3898_v24 = vadd.f32 %v3897_v53, %v3866_v9  ;;  %v7164_v53 = vld [vmem:[%s9566_s8 + $0x60] sm:$0xff] }
 0xa75   :  { %v3935_v63 = vadd.f32 %v3925_v62, %v3893_v35 }
 0xa7b   :  { %v3868_v61 = vpop.f32.mrf.mxu0 }
 0xa7c   :  { %v3927_v18 = vpop.f32.mrf.mxu2  ;;  %v3900_v17 = vadd.f32 %v3899_v37, %v3868_v61 }
 0xa7d   :  { %v3936_v45 = vadd.f32 %v3927_v18, %v3895_v28  ;;  %v7167_v28 = vld [vmem:[%s9566_s8 + $0x78] sm:$0xff] }
 0xa7e   :  { %4185 = vmatpush.bf16.msra.mxu1 %v7167_v28 }
 0xa84   :  { %v3962_v21 = vpop.f32.mrf.mxu3 }
 0xa85   :  { %v3972_v56 = vadd.f32 %v3962_v21, %v3935_v63 }
 0xa87   :  { %v9281_v13 = vadd.f32 %v3972_v56, %v8686_v6 }
 0xa89   :  { %v3981_v59 = vmul.f32 %v9281_v13, %v9281_v13  ;;  %v3930_v33 = vpop.f32.mrf.mxu2 }
 0xa8a   :  { %v3937_v1 = vadd.f32 %v3930_v33, %v3898_v24 }
 0xa8b   :  { %v3985_v32 = vsel %vm334_vm0, %v3981_v59, 0.0  ;;  %v7166_v59 = vld [vmem:[%s9566_s8 + $0x70] sm:$0xff] }
 0xa8c   :  { %3986 = vadd.xlane.f32.xlu1 %v3985_v32  ;;  %v3964_v5 = vpop.f32.mrf.mxu3  ;;  %4186 = vmatpush.bf16.msra.mxu1 %v7166_v59 }
 0xa8d   :  { %v3973_v57 = vadd.f32 %v3964_v5, %v3936_v45 }
 0xa8f   :  { %v9287_v3 = vadd.f32 %v3973_v57, %v8692_v16 }
 0xa91   :  { %v3982_v10 = vmul.f32 %v9287_v3, %v9287_v3  ;;  %v3932_v16 = vpop.f32.mrf.mxu2 }
 0xa92   :  { %v3938_v54 = vadd.f32 %v3932_v16, %v3900_v17 }
 0xa93   :  { %v3988_v6 = vsel %vm334_vm0, %v3982_v10, 0.0  ;;  %v7165_v10 = vld [vmem:[%s9566_s8 + $0x68] sm:$0xff] }
 0xa94   :  { %3989 = vadd.xlane.f32.xlu2 %v3988_v6  ;;  %4187 = vmatpush.bf16.msra.mxu1 %v7165_v10 }
 0xa98   :  { %4188 = vmatpush.bf16.msra.mxu1 %v7164_v53 }
 0xad7   :  { %v3967_v52 = vpop.f32.mrf.mxu3 }
 0xad8   :  { %v3974_v29 = vadd.f32 %v3967_v52, %v3937_v1  ;;  %v7163_v52 = vld [vmem:[%s9566_s8 + $0x58] sm:$0xff] }
 0xad9   :  { %4189 = vmatpush.bf16.msra.mxu1 %v7163_v52 }
 0xada   :  { %v9293_v19 = vadd.f32 %v3974_v29, %v8698_v27 }
 0xadc   :  { %v3983_v44 = vmul.f32 %v9293_v19, %v9293_v19 }
 0xadd   :  { %4190 = vmatpush.bf16.msra.mxu1 %v7162_v30 }
 0xade   :  { %v3991_v11 = vsel %vm334_vm0, %v3983_v44, 0.0 }
 0xadf   :  { %3992 = vadd.xlane.f32.xlu0 %v3991_v11  ;;  %v3969_v49 = vpop.f32.mrf.mxu3 }
 0xae0   :  { %v3975_v38 = vadd.f32 %v3969_v49, %v3938_v54 }
 0xae2   :  { %v9299_v15 = vadd.f32 %v3975_v38, %v8704_v14  ;;  %v7157_v14 = vld [vmem:[%s9565_s7 + $0x28] sm:$0xff] }
 0xae3   :  { %4101 = vmatpush.bf16.msra.mxu0 %v7157_v14  ;;  %v7161_v14 = vld [vmem:[%s9566_s8 + $0x48] sm:$0xff] }
 0xae4   :  { %v3984_v31 = vmul.f32 %v9299_v15, %v9299_v15  ;;  %4191 = vmatpush.bf16.msra.mxu1 %v7161_v14 }
 0xae6   :  { %v3994_v27 = vsel %vm334_vm0, %v3984_v31, 0.0 }
 0xae7   :  { %3995 = vadd.xlane.f32.xlu1 %v3994_v27  ;;  %4102 = vmatpush.bf16.msra.mxu0 %v7156_v43 }
 0xaff   :  { %v3987_v58 = vpop.xlane.xlu1 %3986 }
 0xb00   :  { %v3997_v34 = vmul.f32 %v3987_v58, %v8008_v25  ;;  %v7160_v58 = vld [vmem:[%s9566_s8 + $0x40] sm:$0xff] }
 0xb01   :  { %4192 = vmatpush.bf16.msra.mxu1 %v7160_v58 }
 0xb02   :  { %v4001_v36 = vadd.f32 1e-06, %v3997_v34 }
 0xb04   :  { %7456 = vrsqrt.f32 %v4001_v36  ;;  %vm4011_vm1 = vweird.f32 %v4001_v36 }
 0xb07   :  { %v3990_v55 = vpop.xlane.xlu2 %3989 }
 0xb08   :  { %v3998_v26 = vmul.f32 %v3990_v55, %v8008_v25 }
 0xb0a   :  { %v7457_v39 = vpop.eup %7456  ;;  %v4002_v48 = vadd.f32 1e-06, %v3998_v26 }
 0xb0b   :  { %v4006_v51 = vmul.f32 %v7457_v39, %v4001_v36  ;;  %vm4012_vm14 = vweird.f32 %v7457_v39 }
 0xb0c   :  { %7458 = vrsqrt.f32 %v4002_v48  ;;  %vm4013_vm2 = vmor %vm4011_vm1, %vm4012_vm14  ;;  %vm4021_vm4 = vweird.f32 %v4002_v48 }
 0xb0d   :  { %v4007_v4 = vmul.f32 %v7457_v39, %v4006_v51 }
 0xb0f   :  { %v4008_v0 = vmul.f32 0.5, %v4007_v4 }
 0xb11   :  { %v4009_v22 = vsub.f32 1.5, %v4008_v0 }
 0xb12   :  { %v7459_v8 = vpop.eup %7458 }
 0xb13   :  { %v4016_v50 = vmul.f32 %v7459_v8, %v4002_v48  ;;  %v4010_v23 = vmul.f32 %v7457_v39, %v4009_v22  ;;  %vm4022_vm3 = vweird.f32 %v7459_v8 }
 0xb14   :  { %vm4023_vm5 = vmor %vm4021_vm4, %vm4022_vm3 }
 0xb15   :  { %v4017_v46 = vmul.f32 %v7459_v8, %v4016_v50  ;;  %v4014_v7 = vsel %vm4013_vm2, %v7457_v39, %v4010_v23 }
 0xb16   :  { %v4045_v20 = vmul.f32 %v4014_v7, %v9281_v13 }
 0xb17   :  { %v4018_v40 = vmul.f32 0.5, %v4017_v46 }
 0xb18   :  { %v4050_v63 = vmul.f32 %v7300_v41, %v4045_v20 }
 0xb19   :  { %v4019_v12 = vsub.f32 1.5, %v4018_v40 }
 0xb1b   :  { %v4020_v42 = vmul.f32 %v7459_v8, %v4019_v12 }
 0xb1d   :  { %v4024_v62 = vsel %vm4023_vm5, %v7459_v8, %v4020_v42 }
 0xb1e   :  { %v4046_v35 = vmul.f32 %v4024_v62, %v9287_v3 }
 0xb20   :  { %v4051_v21 = vmul.f32 %v7300_v41, %v4046_v35 }
 0xb22   :  { %v4054_v56 = vpack.c.bf16 %v4051_v21, %v4050_v63 }
 0xb24   :  { %6441 = vmatmul.msk.bf16.vlgmr.msra.gmra.mxu0 %vm334_vm0, %v4054_v56 }
 0xb52   :  { %v3993_v2 = vpop.xlane.xlu0 %3992 }
 0xb53   :  { %v3999_v60 = vmul.f32 %v3993_v2, %v8008_v25 }
 0xb55   :  { %v4003_v18 = vadd.f32 1e-06, %v3999_v60 }
 0xb57   :  { %7460 = vrsqrt.f32 %v4003_v18  ;;  %vm4031_vm7 = vweird.f32 %v4003_v18 }
 0xb5a   :  { %v3996_v45 = vpop.xlane.xlu1 %3995 }
 0xb5b   :  { %v4000_v32 = vmul.f32 %v3996_v45, %v8008_v25 }
 0xb5d   :  { %v7461_v5 = vpop.eup %7460  ;;  %v4004_v57 = vadd.f32 1e-06, %v4000_v32 }
 0xb5e   :  { %v4026_v6 = vmul.f32 %v7461_v5, %v4003_v18  ;;  %vm4032_vm6 = vweird.f32 %v7461_v5 }
 0xb5f   :  { %7462 = vrsqrt.f32 %v4004_v57  ;;  %vm4033_vm8 = vmor %vm4031_vm7, %vm4032_vm6  ;;  %vm4041_vm10 = vweird.f32 %v4004_v57 }
 0xb60   :  { %v4027_v9 = vmul.f32 %v7461_v5, %v4026_v6  ;;  %v7301_v6 = vld [vmem:[%s9562_s4] ss:$0 sm:$0xff] }
 0xb62   :  { %v4028_v33 = vmul.f32 0.5, %v4027_v9 }
 0xb64   :  { %v4029_v24 = vsub.f32 1.5, %v4028_v33 }
 0xb65   :  { %v7463_v1 = vpop.eup %7462 }
 0xb66   :  { %v4036_v29 = vmul.f32 %v7463_v1, %v4004_v57  ;;  %v4030_v61 = vmul.f32 %v7461_v5, %v4029_v24  ;;  %vm4042_vm9 = vweird.f32 %v7463_v1 }
 0xb67   :  { %vm4043_vm11 = vmor %vm4041_vm10, %vm4042_vm9 }
 0xb68   :  { %v4037_v37 = vmul.f32 %v7463_v1, %v4036_v29  ;;  %v4034_v17 = vsel %vm4033_vm8, %v7461_v5, %v4030_v61 }
 0xb69   :  { %v4047_v11 = vmul.f32 %v4034_v17, %v9293_v19 }
 0xb6a   :  { %v4038_v16 = vmul.f32 0.5, %v4037_v37 }
 0xb6b   :  { %v4052_v31 = vmul.f32 %v7300_v41, %v4047_v11 }
 0xb6c   :  { %v4039_v44 = vsub.f32 1.5, %v4038_v16 }
 0xb6e   :  { %v4040_v54 = vmul.f32 %v7463_v1, %v4039_v44 }
 0xb70   :  { %v4044_v49 = vsel %vm4043_vm11, %v7463_v1, %v4040_v54 }
 0xb71   :  { %v4048_v38 = vmul.f32 %v4044_v49, %v9299_v15 }
 0xb73   :  { %v4053_v27 = vmul.f32 %v7300_v41, %v4048_v38 }
 0xb75   :  { %v4055_v47 = vpack.c.bf16 %v4053_v27, %v4052_v31 }
 0xb77   :  { %6442 = vmatmul.msk.bf16.gmra.mxu0 %vm334_vm0, %v4055_v47 }
 0xba1   :  { %v4104_v34 = vpop.f32.mrf.mxu0 }
 0xba2   :  { %v4114_v36 = vmax.f32 %v4104_v34, 0.0 }
 0xba9   :  { %v4106_v43 = vpop.f32.mrf.mxu0 }
 0xbaa   :  { %v4115_v55 = vmax.f32 %v4106_v43, 0.0 }
 0xbac   :  { %v4118_v26 = vpack.c.bf16 %v4115_v55, %v4114_v36 }
 0xbae   :  { %4193 = vmatmul.bf16.vlgmr.msra.gmra.mxu1 %v4118_v26 }
 0xbf4   :  { %v4109_v39 = vpop.f32.mrf.mxu0 }
 0xbf5   :  { %v4116_v51 = vmax.f32 %v4109_v39, 0.0 }
 0xbfc   :  { %v4111_v48 = vpop.f32.mrf.mxu0 }
 0xbfd   :  { %v4117_v4 = vmax.f32 %v4111_v48, 0.0 }
 0xbff   :  { %v4119_v0 = vpack.c.bf16 %v4117_v4, %v4116_v51 }
 0xc01   :  { %4198 = vmatmul.bf16.gmra.mxu1 %v4119_v0 }
 0xc2b   :  { %v4194_v22 = vpop.f32.mrf.mxu1 }
 0xc2c   :  { %v4204_v8 = vadd.f32 %v4194_v22, %v9281_v13 }
 0xc2e   :  { %v4209_v50 = vmul.f32 %v4204_v8, %v4204_v8 }
 0xc30   :  { %v4213_v23 = vsel %vm334_vm0, %v4209_v50, 0.0 }
 0xc31   :  { %4214 = vadd.xlane.f32.xlu2 %v4213_v23 }
 0xc33   :  { %v4196_v46 = vpop.f32.mrf.mxu1 }
 0xc34   :  { %v4205_v40 = vadd.f32 %v4196_v46, %v9287_v3 }
 0xc36   :  { %v4210_v7 = vmul.f32 %v4205_v40, %v4205_v40 }
 0xc38   :  { %v4216_v12 = vsel %vm334_vm0, %v4210_v7, 0.0 }
 0xc39   :  { %4217 = vadd.xlane.f32.xlu0 %v4216_v12 }
 0xc7e   :  { %v4199_v42 = vpop.f32.mrf.mxu1 }
 0xc7f   :  { %v9358_v41 = vadd.f32 %v4199_v42, %v9293_v19 }
 0xc81   :  { %v4211_v20 = vmul.f32 %v9358_v41, %v9358_v41 }
 0xc83   :  { %v4219_v13 = vsel %vm334_vm0, %v4211_v20, 0.0 }
 0xc84   :  { %4220 = vadd.xlane.f32.xlu1 %v4219_v13 }
 0xc86   :  { %v4201_v62 = vpop.f32.mrf.mxu1 }
 0xc87   :  { %v9364_v35 = vadd.f32 %v4201_v62, %v9299_v15 }
 0xc89   :  { %v4212_v3 = vmul.f32 %v9364_v35, %v9364_v35 }
 0xc8b   :  { %v4222_v63 = vsel %vm334_vm0, %v4212_v3, 0.0 }
 0xc8c   :  { %4223 = vadd.xlane.f32.xlu2 %v4222_v63 }
 0xca4   :  { %v4215_v21 = vpop.xlane.xlu2 %4214 }
 0xca5   :  { %v4225_v19 = vmul.f32 %v4215_v21, %v8008_v25 }
 0xca7   :  { %v4229_v56 = vadd.f32 1e-06, %v4225_v19 }
 0xca9   :  { %7464 = vrsqrt.f32 %v4229_v56  ;;  %vm4239_vm13 = vweird.f32 %v4229_v56 }
 0xcac   :  { %v4218_v2 = vpop.xlane.xlu0 %4217 }
 0xcad   :  { %v4226_v60 = vmul.f32 %v4218_v2, %v8008_v25 }
 0xcaf   :  { %v7465_v18 = vpop.eup %7464  ;;  %v4230_v28 = vadd.f32 1e-06, %v4226_v60 }
 0xcb0   :  { %v4234_v59 = vmul.f32 %v7465_v18, %v4229_v56  ;;  %vm4240_vm12 = vweird.f32 %v7465_v18 }
 0xcb1   :  { %7466 = vrsqrt.f32 %v4230_v28  ;;  %vm4241_vm14 = vmor %vm4239_vm13, %vm4240_vm12  ;;  %vm4249_vm2 = vweird.f32 %v4230_v28 }
 0xcb2   :  { %v4235_v15 = vmul.f32 %v7465_v18, %v4234_v59 }
 0xcb4   :  { %v4236_v45 = vmul.f32 0.5, %v4235_v15 }
 0xcb6   :  { %v4237_v32 = vsub.f32 1.5, %v4236_v45 }
 0xcb7   :  { %v7467_v5 = vpop.eup %7466 }
 0xcb8   :  { %v4238_v57 = vmul.f32 %v7465_v18, %v4237_v32  ;;  %v4244_v10 = vmul.f32 %v7467_v5, %v4230_v28  ;;  %vm4250_vm1 = vweird.f32 %v7467_v5 }
 0xcb9   :  { %vm4251_vm3 = vmor %vm4249_vm2, %vm4250_vm1 }
 0xcba   :  { %v4242_v9 = vsel %vm4241_vm14, %v7465_v18, %v4238_v57  ;;  %v4245_v53 = vmul.f32 %v7467_v5, %v4244_v10 }
 0xcbb   :  { %v4273_v33 = vmul.f32 %v4242_v9, %v4204_v8 }
 0xcbc   :  { %v4246_v24 = vmul.f32 0.5, %v4245_v53 }
 0xcbd   :  { %v4280_v1 = vmul.f32 %v7301_v6, %v4273_v33 }
 0xcbe   :  { %v4247_v52 = vsub.f32 1.5, %v4246_v24 }
 0xcc0   :  { %v4248_v29 = vmul.f32 %v7467_v5, %v4247_v52 }
 0xcc2   :  { %v4252_v61 = vsel %vm4251_vm3, %v7467_v5, %v4248_v29 }
 0xcc3   :  { %v4274_v37 = vmul.f32 %v4252_v61, %v4205_v40 }
 0xcc5   :  { %v4281_v16 = vmul.f32 %v7301_v6, %v4274_v37 }
 0xcf7   :  { %v4221_v17 = vpop.xlane.xlu1 %4220 }
 0xcf8   :  { %v4227_v44 = vmul.f32 %v4221_v17, %v8008_v25 }
 0xcfa   :  { %v4231_v54 = vadd.f32 1e-06, %v4227_v44 }
 0xcfc   :  { %7468 = vrsqrt.f32 %v4231_v54  ;;  %vm4259_vm5 = vweird.f32 %v4231_v54 }
 0xcff   :  { %v4224_v11 = vpop.xlane.xlu2 %4223 }
 0xd00   :  { %v4228_v49 = vmul.f32 %v4224_v11, %v8008_v25 }
 0xd02   :  { %v7469_v38 = vpop.eup %7468  ;;  %v4232_v31 = vadd.f32 1e-06, %v4228_v49 }
 0xd03   :  { %v4254_v27 = vmul.f32 %v7469_v38, %v4231_v54  ;;  %vm4260_vm4 = vweird.f32 %v7469_v38 }
 0xd04   :  { %7470 = vrsqrt.f32 %v4232_v31  ;;  %vm4261_vm6 = vmor %vm4259_vm5, %vm4260_vm4  ;;  %vm4269_vm8 = vweird.f32 %v4232_v31 }
 0xd05   :  { %v4255_v47 = vmul.f32 %v7469_v38, %v4254_v27 }
 0xd07   :  { %v4256_v30 = vmul.f32 0.5, %v4255_v47 }
 0xd09   :  { %v4257_v14 = vsub.f32 1.5, %v4256_v30 }
 0xd0a   :  { %v7471_v58 = vpop.eup %7470 }
 0xd0b   :  { %v4258_v34 = vmul.f32 %v7469_v38, %v4257_v14  ;;  %v4264_v43 = vmul.f32 %v7471_v58, %v4232_v31  ;;  %vm4270_vm7 = vweird.f32 %v7471_v58 }
 0xd0c   :  { %vm4271_vm9 = vmor %vm4269_vm8, %vm4270_vm7 }
 0xd0d   :  { %v4262_v36 = vsel %vm4261_vm6, %v7469_v38, %v4258_v34  ;;  %v4265_v55 = vmul.f32 %v7471_v58, %v4264_v43 }
 0xd0e   :  { %v4275_v26 = vmul.f32 %v4262_v36, %v9358_v41 }
 0xd0f   :  { %v4266_v39 = vmul.f32 0.5, %v4265_v55 }
 0xd10   :  { %v4282_v48 = vmul.f32 %v7301_v6, %v4275_v26 }
 0xd11   :  { %v4267_v25 = vsub.f32 1.5, %v4266_v39 }
 0xd13   :  { %v4268_v51 = vmul.f32 %v7471_v58, %v4267_v25 }
 0xd15   :  { %v4272_v4 = vsel %vm4271_vm9, %v7471_v58, %v4268_v51 }
 0xd16   :  { %v4276_v0 = vmul.f32 %v4272_v4, %v9364_v35 }
 0xd18   :  { %v4283_v22 = vmul.f32 %v7301_v6, %v4276_v0 }
 0xd19   :  { %7508 = dma.done.wait [#allocation3], 16384 }
 0xd1a   :  { %7509 = vsyncadd [#allocation3], 4294950912  ;;  %v4289_v8 = vpack.c.bf16 %v4280_v1, %v4280_v1  ;;  %v4290_v50 = vpack.c.bf16 %v4281_v16, %v4281_v16  ;;  %v4291_v23 = vpack.c.bf16 %v4282_v48, %v4282_v48  ;;  %v4292_v46 = vpack.c.bf16 %v4283_v22, %v4283_v22  ;;  %v6541_v63 = vld [vmem:[#allocation2 + $0xe0] sm:$0xf]  ;;  %v7198_v21 = vld [vmem:[#allocation2 + $0xec] sm:$0xf0] }
 0xd1b   :  { %vm4335_vm10 = vcmask 1041409   ;;  %vm4338_vm11 = vcmask 1042434   ;;  %v7196_v19 = vld [vmem:[#allocation2 + $0xe4] sm:$0xf]  ;;  %vm4341_vm12 = vcmask 1043459   ;;  %v6542_v56 = vor.u32 %v7198_v21, %v6541_v63 }
 0xd1c   :  { %v9378_v40 = vunpack.c.l.b16 %v4289_v8  ;;  %v9380_v7 = vunpack.c.l.b16 %v4290_v50  ;;  %v9382_v12 = vunpack.c.l.b16 %v4291_v23  ;;  %v9384_v42 = vunpack.c.l.b16 %v4292_v46  ;;  %v6543_v2 = vld [vmem:[#allocation2 + $0xf0] sm:$0xf0]  ;;  %v6609_v60 = vld [vmem:[#allocation2 + $0x60] sm:$0xf]  ;;  %v7182_v18 = vld [vmem:[#allocation2 + $0x6c] sm:$0xf0] }
 0xd1d   :  { %v6546_v28 = vor.u32 %v7196_v19, %v6543_v2  ;;  %v6610_v59 = vor.u32 %v7182_v18, %v6609_v60  ;;  %v7180_v15 = vld [vmem:[#allocation2 + $0x64] sm:$0xf]  ;;  %v6611_v45 = vld [vmem:[#allocation2 + $0x70] sm:$0xf0]  ;;  %v6525_v32 = vld [vmem:[#allocation2 + $0xc0] sm:$0xf]  ;;  %4431 = vmatpush.bf16.msrb.mxu2 %v6542_v56 }
 0xd1e   :  { %v4334_v41 = vrot.slane %v9378_v40, 1  ;;  %v4337_v20 = vrot.slane %v9382_v12, 7  ;;  %v4340_v13 = vrot.slane %v9384_v42, 6  ;;  %v4479_v62 = vrot.slane %v9380_v7, 7  ;;  %v7194_v57 = vld [vmem:[#allocation2 + $0xcc] sm:$0xf0] }
 0xd1f   :  { %v4481_v35 = vrot.slane %v9382_v12, 6  ;;  %v4483_v3 = vrot.slane %v9384_v42, 5  ;;  %v6614_v5 = vor.u32 %v7180_v15, %v6611_v45  ;;  %v7192_v10 = vld [vmem:[#allocation2 + $0xc4] sm:$0xf]  ;;  %v6527_v6 = vld [vmem:[#allocation2 + $0xd0] sm:$0xf0]  ;;  %4444 = vmatpush.bf16.msrb.mxu3 %v6546_v28  ;;  %4573 = vmatpush.bf16.msrb.mxu0 %v6610_v59  ;;  %v6526_v9 = vor.u32 %v7194_v57, %v6525_v32 }
 0xd20   :  { %v6530_v53 = vor.u32 %v7192_v10, %v6527_v6  ;;  %v6593_v33 = vld [vmem:[#allocation2 + $0x40] sm:$0xf]  ;;  %v7178_v24 = vld [vmem:[#allocation2 + $0x4c] sm:$0xf0]  ;;  %v7176_v1 = vld [vmem:[#allocation2 + $0x44] sm:$0xf]  ;;  %v4336_v16 = vsel %vm4335_vm10, %v9380_v7, %v4334_v41  ;;  %v4480_v49 = vsel %vm4335_vm10, %v4479_v62, %v9378_v40 }
 0xd21   :  { %4586 = vmatpush.bf16.msrb.mxu1 %v6614_v5  ;;  %v6594_v52 = vor.u32 %v7178_v24, %v6593_v33  ;;  %v6595_v29 = vld [vmem:[#allocation2 + $0x50] sm:$0xf0]  ;;  %v6509_v61 = vld [vmem:[#allocation2 + $0xa0] sm:$0xf]  ;;  %v7190_v37 = vld [vmem:[#allocation2 + $0xac] sm:$0xf0]  ;;  %4432 = vmatpush.bf16.msrb.mxu2 %v6526_v9  ;;  %v4339_v36 = vsel %vm4338_vm11, %v4337_v20, %v4336_v16  ;;  %v4482_v25 = vsel %vm4338_vm11, %v4481_v35, %v4480_v49 }
 0xd22   :  { %v6598_v17 = vor.u32 %v7176_v1, %v6595_v29  ;;  %v7188_v44 = vld [vmem:[#allocation2 + $0xa4] sm:$0xf]  ;;  %v6511_v54 = vld [vmem:[#allocation2 + $0xb0] sm:$0xf0]  ;;  %v6577_v11 = vld [vmem:[#allocation2 + $0x20] sm:$0xf]  ;;  %v6510_v38 = vor.u32 %v7190_v37, %v6509_v61  ;;  %v4342_v8 = vsel %vm4341_vm12, %v4340_v13, %v4339_v36  ;;  %v4484_v41 = vsel %vm4341_vm12, %v4483_v3, %v4482_v25 }
 0xd23   :  { %v7174_v31 = vld [vmem:[#allocation2 + $0x2c] sm:$0xf0]  ;;  %v7172_v27 = vld [vmem:[#allocation2 + $0x24] sm:$0xf]  ;;  %v6579_v47 = vld [vmem:[#allocation2 + $0x30] sm:$0xf0]  ;;  %4445 = vmatpush.bf16.msrb.mxu3 %v6530_v53  ;;  %4574 = vmatpush.bf16.msrb.mxu0 %v6594_v52  ;;  %v6514_v30 = vor.u32 %v7188_v44, %v6511_v54  ;;  %v9404_v2 = vpack.c.b16 %v4342_v8, %v4342_v8  ;;  %v9406_v59 = vpack.c.b16 %v4484_v41, %v4484_v41 }
 0xd24   :  { %v6578_v14 = vor.u32 %v7174_v31, %v6577_v11  ;;  %v6493_v58 = vld [vmem:[#allocation2 + $0x80] sm:$0xf]  ;;  %v7186_v34 = vld [vmem:[#allocation2 + $0x8c] sm:$0xf0]  ;;  %v7184_v43 = vld [vmem:[#allocation2 + $0x84] sm:$0xf]  ;;  %v6582_v55 = vor.u32 %v7172_v27, %v6579_v47 }
 0xd25   :  { %4587 = vmatpush.bf16.msrb.mxu1 %v6598_v17  ;;  %v6495_v26 = vld [vmem:[#allocation2 + $0x90] sm:$0xf0]  ;;  %v6561_v39 = vld [vmem:[#allocation2] sm:$0xf]  ;;  %v7170_v48 = vld [vmem:[#allocation2 + $0xc] sm:$0xf0]  ;;  %4433 = vmatpush.bf16.msrb.mxu2 %v6510_v38  ;;  %v6494_v22 = vor.u32 %v7186_v34, %v6493_v58 }
 0xd26   :  { %v7168_v51 = vld [vmem:[#allocation2 + $0x4] sm:$0xf]  ;;  %v6563_v4 = vld [vmem:[#allocation2 + $0x10] sm:$0xf0]  ;;  %v7197_v0 = vld [vmem:[#allocation2 + $0xec] sm:$0xf]  ;;  %v6498_v23 = vor.u32 %v7184_v43, %v6495_v26  ;;  %v6562_v46 = vor.u32 %v7170_v48, %v6561_v39 }
 0xd27   :  { %v6551_v50 = vld [vmem:[#allocation2 + $0xf8] sm:$0xf0]  ;;  %4446 = vmatpush.bf16.msrb.mxu3 %v6514_v30  ;;  %4575 = vmatpush.bf16.msrb.mxu0 %v6578_v14  ;;  %v6677_v20 = vld [vmem:[#allocation2 + $0x160] sm:$0xf]  ;;  %v7214_v62 = vld [vmem:[#allocation2 + $0x16c] sm:$0xf0]  ;;  %v6566_v35 = vor.u32 %v7168_v51, %v6563_v4 }
 0xd28   :  { %v6554_v63 = vor.u32 %v7197_v0, %v6551_v50  ;;  %v6549_v21 = vld [vmem:[#allocation2 + $0xe8] sm:$0xf]  ;;  %v7199_v19 = vld [vmem:[#allocation2 + $0xf4] sm:$0xf0]  ;;  %v7212_v56 = vld [vmem:[#allocation2 + $0x164] sm:$0xf]  ;;  %v6678_v13 = vor.u32 %v7214_v62, %v6677_v20 }
 0xd29   :  { %4588 = vmatpush.bf16.msrb.mxu1 %v6582_v55  ;;  %v6679_v60 = vld [vmem:[#allocation2 + $0x170] sm:$0xf0]  ;;  %v7193_v18 = vld [vmem:[#allocation2 + $0xcc] sm:$0xf]  ;;  %v6535_v28 = vld [vmem:[#allocation2 + $0xd8] sm:$0xf0]  ;;  %4434 = vmatpush.bf16.msrb.mxu2 %v6494_v22  ;;  %v6550_v3 = vor.u32 %v7199_v19, %v6549_v21 }
 0xd2a   :  { %v6661_v15 = vld [vmem:[#allocation2 + $0x140] sm:$0xf]  ;;  %v7210_v45 = vld [vmem:[#allocation2 + $0x14c] sm:$0xf0]  ;;  %v6682_v32 = vor.u32 %v7212_v56, %v6679_v60  ;;  %v6538_v5 = vor.u32 %v7193_v18, %v6535_v28  ;;  %v6533_v57 = vld [vmem:[#allocation2 + $0xc8] sm:$0xf] }
 0xd2b   :  { %4447 = vmatpush.bf16.msrb.mxu3 %v6498_v23  ;;  %4576 = vmatpush.bf16.msrb.mxu0 %v6562_v46  ;;  %v7195_v10 = vld [vmem:[#allocation2 + $0xd4] sm:$0xf0]  ;;  %v7208_v6 = vld [vmem:[#allocation2 + $0x144] sm:$0xf]  ;;  %v6662_v9 = vor.u32 %v7210_v45, %v6661_v15  ;;  %v6663_v53 = vld [vmem:[#allocation2 + $0x150] sm:$0xf0] }
 0xd2c   :  { %6555 = vmatmul.msk.bf16.vlgmr.msrb.gmra.mxu2 %vm334_vm0, %v9404_v2  ;;  %v7189_v33 = vld [vmem:[#allocation2 + $0xac] sm:$0xf]  ;;  %v6519_v24 = vld [vmem:[#allocation2 + $0xb8] sm:$0xf0]  ;;  %v6645_v1 = vld [vmem:[#allocation2 + $0x120] sm:$0xf]  ;;  %v6534_v37 = vor.u32 %v7195_v10, %v6533_v57  ;;  %v6666_v44 = vor.u32 %v7208_v6, %v6663_v53 }
 0xd2d   :  { %4589 = vmatpush.bf16.msrb.mxu1 %v6566_v35  ;;  %v7206_v52 = vld [vmem:[#allocation2 + $0x12c] sm:$0xf0]  ;;  %v4638_v29 = vrot.slane %v9378_v40, 2  ;;  %v4639_v61 = vrot.slane %v9380_v7, 1  ;;  %4457 = vmatpush.bf16.msra.mxu2 %v6550_v3  ;;  %v6517_v16 = vld [vmem:[#allocation2 + $0xa8] sm:$0xf]  ;;  %v6522_v54 = vor.u32 %v7189_v33, %v6519_v24 }
 0xd2e   :  { %6556 = vmatmul.msk.bf16.vlgmr.msrb.gmra.mxu3 %vm334_vm0, %v9404_v2  ;;  %6623 = vmatmul.msk.bf16.vlgmr.msrb.gmra.mxu0 %vm334_vm0, %v9406_v59  ;;  %v4642_v17 = vrot.slane %v9384_v42, 7  ;;  %v7191_v11 = vld [vmem:[#allocation2 + $0xb4] sm:$0xf0]  ;;  %v7204_v49 = vld [vmem:[#allocation2 + $0x124] sm:$0xf]  ;;  %v6646_v31 = vor.u32 %v7206_v52, %v6645_v1 }
 0xd2f   :  { %4470 = vmatpush.bf16.msra.mxu3 %v6554_v63  ;;  %4732 = vmatpush.bf16.msra.mxu0 %v6678_v13  ;;  %v6647_v38 = vld [vmem:[#allocation2 + $0x130] sm:$0xf0]  ;;  %v7185_v27 = vld [vmem:[#allocation2 + $0x8c] sm:$0xf]  ;;  %v6503_v47 = vld [vmem:[#allocation2 + $0x98] sm:$0xf0]  ;;  %v4640_v43 = vsel %vm4335_vm10, %v4639_v61, %v4638_v29  ;;  %v6518_v36 = vor.u32 %v7191_v11, %v6517_v16 }
 0xd30   :  { %6624 = vmatmul.msk.bf16.vlgmr.msrb.gmra.mxu1 %vm334_vm0, %v9406_v59  ;;  %v6629_v30 = vld [vmem:[#allocation2 + $0x100] sm:$0xf]  ;;  %v7202_v14 = vld [vmem:[#allocation2 + $0x10c] sm:$0xf0]  ;;  %v7181_v58 = vld [vmem:[#allocation2 + $0x6c] sm:$0xf]  ;;  %v6650_v48 = vor.u32 %v7204_v49, %v6647_v38  ;;  %v6506_v25 = vor.u32 %v7185_v27, %v6503_v47  ;;  %v4641_v50 = vsel %vm4338_vm11, %v9382_v12, %v4640_v43 }
 0xd31   :  { %4745 = vmatpush.bf16.msra.mxu1 %v6682_v32  ;;  %v6619_v34 = vld [vmem:[#allocation2 + $0x78] sm:$0xf0]  ;;  %4458 = vmatpush.bf16.msra.mxu2 %v6534_v37  ;;  %v6501_v55 = vld [vmem:[#allocation2 + $0x88] sm:$0xf]  ;;  %v6745_v26 = vld [vmem:[#allocation2 + $0x1e0] sm:$0xf]  ;;  %v6630_v22 = vor.u32 %v7202_v14, %v6629_v30  ;;  %v4643_v56 = vsel %vm4341_vm12, %v4642_v17, %v4641_v50 }
 0xd32   :  { %v7230_v39 = vld [vmem:[#allocation2 + $0x1ec] sm:$0xf0]  ;;  %v7187_v51 = vld [vmem:[#allocation2 + $0x94] sm:$0xf0]  ;;  %v7200_v4 = vld [vmem:[#allocation2 + $0x104] sm:$0xf]  ;;  %v6622_v8 = vor.u32 %v7181_v58, %v6619_v34  ;;  %v9423_v6 = vpack.c.b16 %v4643_v56, %v4643_v56 }
 0xd33   :  { %4471 = vmatpush.bf16.msra.mxu3 %v6538_v5  ;;  %4733 = vmatpush.bf16.msra.mxu0 %v6662_v9  ;;  %v6631_v0 = vld [vmem:[#allocation2 + $0x110] sm:$0xf0]  ;;  %v6617_v23 = vld [vmem:[#allocation2 + $0x68] sm:$0xf]  ;;  %v7183_v46 = vld [vmem:[#allocation2 + $0x74] sm:$0xf0]  ;;  %v6746_v20 = vor.u32 %v7230_v39, %v6745_v26  ;;  %v6502_v21 = vor.u32 %v7187_v51, %v6501_v55 }
 0xd34   :  { %v7228_v41 = vld [vmem:[#allocation2 + $0x1e4] sm:$0xf]  ;;  %v6747_v62 = vld [vmem:[#allocation2 + $0x1f0] sm:$0xf0]  ;;  %v7177_v35 = vld [vmem:[#allocation2 + $0x4c] sm:$0xf]  ;;  %v6634_v19 = vor.u32 %v7200_v4, %v6631_v0  ;;  %v6618_v13 = vor.u32 %v7183_v46, %v6617_v23 }
 0xd35   :  { %4746 = vmatpush.bf16.msra.mxu1 %v6666_v44  ;;  %v6603_v63 = vld [vmem:[#allocation2 + $0x58] sm:$0xf0]  ;;  %4459 = vmatpush.bf16.msra.mxu2 %v6518_v36  ;;  %v6601_v60 = vld [vmem:[#allocation2 + $0x48] sm:$0xf]  ;;  %v7179_v18 = vld [vmem:[#allocation2 + $0x54] sm:$0xf0]  ;;  %v6750_v28 = vor.u32 %v7228_v41, %v6747_v62 }
 0xd36   :  { %v6606_v15 = vor.u32 %v7177_v35, %v6603_v63  ;;  %v6729_v45 = vld [vmem:[#allocation2 + $0x1c0] sm:$0xf]  ;;  %v7226_v3 = vld [vmem:[#allocation2 + $0x1cc] sm:$0xf0]  ;;  %v7224_v32 = vld [vmem:[#allocation2 + $0x1c4] sm:$0xf]  ;;  %v6602_v9 = vor.u32 %v7179_v18, %v6601_v60 }
 0xd37   :  { %4472 = vmatpush.bf16.msra.mxu3 %v6522_v54  ;;  %4734 = vmatpush.bf16.msra.mxu0 %v6646_v31  ;;  %v6731_v5 = vld [vmem:[#allocation2 + $0x1d0] sm:$0xf0]  ;;  %v7173_v57 = vld [vmem:[#allocation2 + $0x2c] sm:$0xf]  ;;  %v6587_v10 = vld [vmem:[#allocation2 + $0x38] sm:$0xf0]  ;;  %v6730_v53 = vor.u32 %v7226_v3, %v6729_v45 }
 0xd38   :  { %v6585_v33 = vld [vmem:[#allocation2 + $0x28] sm:$0xf]  ;;  %v7175_v24 = vld [vmem:[#allocation2 + $0x34] sm:$0xf0]  ;;  %v6713_v1 = vld [vmem:[#allocation2 + $0x1a0] sm:$0xf]  ;;  %v6734_v52 = vor.u32 %v7224_v32, %v6731_v5  ;;  %v6590_v29 = vor.u32 %v7173_v57, %v6587_v10 }
 0xd39   :  { %4747 = vmatpush.bf16.msra.mxu1 %v6650_v48  ;;  %4460 = vmatpush.bf16.msra.mxu2 %v6502_v21  ;;  %v7222_v61 = vld [vmem:[#allocation2 + $0x1ac] sm:$0xf0]  ;;  %v7220_v37 = vld [vmem:[#allocation2 + $0x1a4] sm:$0xf]  ;;  %v6715_v16 = vld [vmem:[#allocation2 + $0x1b0] sm:$0xf0]  ;;  %v6586_v27 = vor.u32 %v7175_v24, %v6585_v33 }
 0xd3a   :  { %v7169_v17 = vld [vmem:[#allocation2 + $0xc] sm:$0xf]  ;;  %v6571_v44 = vld [vmem:[#allocation2 + $0x18] sm:$0xf0]  ;;  %v4801_v54 = vrot.slane %v9378_v40, 3  ;;  %v4802_v11 = vrot.slane %v9380_v7, 2  ;;  %v6714_v47 = vor.u32 %v7222_v61, %v6713_v1  ;;  %v6718_v58 = vor.u32 %v7220_v37, %v6715_v16 }
 0xd3b   :  { %4473 = vmatpush.bf16.msra.mxu3 %v6506_v25  ;;  %4735 = vmatpush.bf16.msra.mxu0 %v6630_v22  ;;  %v6569_v49 = vld [vmem:[#allocation2 + $0x8] sm:$0xf]  ;;  %v7213_v38 = vld [vmem:[#allocation2 + $0x16c] sm:$0xf]  ;;  %v6687_v31 = vld [vmem:[#allocation2 + $0x178] sm:$0xf0]  ;;  %v6574_v34 = vor.u32 %v7169_v17, %v6571_v44 }
 0xd3c   :  { %6557 = vmatmul.msk.bf16.vlgmr.msra.gmra.mxu2 %vm334_vm0, %v9404_v2  ;;  %v6697_v30 = vld [vmem:[#allocation2 + $0x180] sm:$0xf]  ;;  %v7218_v14 = vld [vmem:[#allocation2 + $0x18c] sm:$0xf0]  ;;  %v7216_v43 = vld [vmem:[#allocation2 + $0x184] sm:$0xf]  ;;  %v6690_v26 = vor.u32 %v7213_v38, %v6687_v31  ;;  %v4803_v39 = vsel %vm4335_vm10, %v4802_v11, %v4801_v54 }
 0xd3d   :  { %4748 = vmatpush.bf16.msra.mxu1 %v6634_v19  ;;  %4599 = vmatpush.bf16.msrb.mxu2 %v6618_v13  ;;  %v6699_v36 = vld [vmem:[#allocation2 + $0x190] sm:$0xf0]  ;;  %v4804_v55 = vrot.slane %v9382_v12, 1  ;;  %v6685_v48 = vld [vmem:[#allocation2 + $0x168] sm:$0xf]  ;;  %v6698_v50 = vor.u32 %v7218_v14, %v6697_v30  ;;  %v4964_v11 = vrot.slane %v9378_v40, 4 }
 0xd3e   :  { %6558 = vmatmul.msk.bf16.vlgmr.msra.gmra.mxu3 %vm334_vm0, %v9404_v2  ;;  %6691 = vmatmul.msk.bf16.vlgmr.msra.gmra.mxu0 %vm334_vm0, %v9423_v6  ;;  %v7171_v2 = vld [vmem:[#allocation2 + $0x14] sm:$0xf0]  ;;  %v6813_v51 = vld [vmem:[#allocation2 + $0x260] sm:$0xf]  ;;  %v7246_v4 = vld [vmem:[#allocation2 + $0x26c] sm:$0xf0]  ;;  %v6702_v41 = vor.u32 %v7216_v43, %v6699_v36 }
 0xd3f   :  { %4612 = vmatpush.bf16.msrb.mxu3 %v6622_v8  ;;  %4895 = vmatpush.bf16.msrb.mxu0 %v6746_v20  ;;  %v7215_v25 = vld [vmem:[#allocation2 + $0x174] sm:$0xf0]  ;;  %v7244_v0 = vld [vmem:[#allocation2 + $0x264] sm:$0xf]  ;;  %v6815_v22 = vld [vmem:[#allocation2 + $0x270] sm:$0xf0]  ;;  %v6570_v8 = vor.u32 %v7171_v2, %v6569_v49  ;;  %v4805_v20 = vsel %vm4338_vm11, %v4804_v55, %v4803_v39  ;;  %v6814_v35 = vor.u32 %v7246_v4, %v6813_v51 }
 0xd40   :  { %6692 = vmatmul.msk.bf16.vlgmr.msra.gmra.mxu1 %vm334_vm0, %v9423_v6  ;;  %v7209_v23 = vld [vmem:[#allocation2 + $0x14c] sm:$0xf]  ;;  %v6671_v46 = vld [vmem:[#allocation2 + $0x158] sm:$0xf0]  ;;  %v6686_v62 = vor.u32 %v7215_v25, %v6685_v48  ;;  %v6818_v63 = vor.u32 %v7244_v0, %v6815_v22  ;;  %v6669_v21 = vld [vmem:[#allocation2 + $0x148] sm:$0xf]  ;;  %v4806_v13 = vsel %vm4341_vm12, %v9384_v42, %v4805_v20 }
 0xd41   :  { %4908 = vmatpush.bf16.msrb.mxu1 %v6750_v28  ;;  %4600 = vmatpush.bf16.msrb.mxu2 %v6602_v9  ;;  %v7211_v19 = vld [vmem:[#allocation2 + $0x154] sm:$0xf0]  ;;  %v6674_v56 = vor.u32 %v7209_v23, %v6671_v46  ;;  %v6797_v60 = vld [vmem:[#allocation2 + $0x240] sm:$0xf]  ;;  %v7242_v18 = vld [vmem:[#allocation2 + $0x24c] sm:$0xf0]  ;;  %v9440_v10 = vpack.c.b16 %v4806_v13, %v4806_v13 }
 0xd42   :  { %v6670_v28 = vor.u32 %v7211_v19, %v6669_v21  ;;  %v6799_v45 = vld [vmem:[#allocation2 + $0x250] sm:$0xf0]  ;;  %v7205_v3 = vld [vmem:[#allocation2 + $0x12c] sm:$0xf]  ;;  %v6655_v32 = vld [vmem:[#allocation2 + $0x138] sm:$0xf0] }
 0xd43   :  { %4613 = vmatpush.bf16.msrb.mxu3 %v6606_v15  ;;  %4896 = vmatpush.bf16.msrb.mxu0 %v6730_v53  ;;  %v7240_v15 = vld [vmem:[#allocation2 + $0x244] sm:$0xf]  ;;  %v6653_v5 = vld [vmem:[#allocation2 + $0x128] sm:$0xf]  ;;  %v7207_v57 = vld [vmem:[#allocation2 + $0x134] sm:$0xf0]  ;;  %v6798_v53 = vor.u32 %v7242_v18, %v6797_v60 }
 0xd44   :  { %v6781_v9 = vld [vmem:[#allocation2 + $0x220] sm:$0xf]  ;;  %v6802_v33 = vor.u32 %v7240_v15, %v6799_v45  ;;  %v7238_v24 = vld [vmem:[#allocation2 + $0x22c] sm:$0xf0]  ;;  %v7236_v1 = vld [vmem:[#allocation2 + $0x224] sm:$0xf]  ;;  %v6654_v61 = vor.u32 %v7207_v57, %v6653_v5 }
 0xd45   :  { %4909 = vmatpush.bf16.msrb.mxu1 %v6734_v52  ;;  %4601 = vmatpush.bf16.msrb.mxu2 %v6586_v27  ;;  %v6783_v52 = vld [vmem:[#allocation2 + $0x230] sm:$0xf0]  ;;  %v7201_v37 = vld [vmem:[#allocation2 + $0x10c] sm:$0xf]  ;;  %v6639_v16 = vld [vmem:[#allocation2 + $0x118] sm:$0xf0]  ;;  %v6782_v2 = vor.u32 %v7238_v24, %v6781_v9 }
 0xd46   :  { %v6637_v17 = vld [vmem:[#allocation2 + $0x108] sm:$0xf]  ;;  %v7203_v44 = vld [vmem:[#allocation2 + $0x114] sm:$0xf0]  ;;  %v7229_v54 = vld [vmem:[#allocation2 + $0x1ec] sm:$0xf] }
 0xd47   :  { %4614 = vmatpush.bf16.msrb.mxu3 %v6590_v29  ;;  %4897 = vmatpush.bf16.msrb.mxu0 %v6714_v47  ;;  %v6658_v29 = vor.u32 %v7205_v3, %v6655_v32  ;;  %v4965_v49 = vrot.slane %v9380_v7, 3  ;;  %v6765_v38 = vld [vmem:[#allocation2 + $0x200] sm:$0xf]  ;;  %v6755_v31 = vld [vmem:[#allocation2 + $0x1f8] sm:$0xf0]  ;;  %v6638_v43 = vor.u32 %v7203_v44, %v6637_v17  ;;  %v4967_v36 = vrot.slane %v9382_v12, 2 }
 0xd48   :  { %v6753_v27 = vld [vmem:[#allocation2 + $0x1e8] sm:$0xf]  ;;  %v7231_v47 = vld [vmem:[#allocation2 + $0x1f4] sm:$0xf0]  ;;  %v7234_v30 = vld [vmem:[#allocation2 + $0x20c] sm:$0xf0]  ;;  %v6758_v39 = vor.u32 %v7229_v54, %v6755_v31 }
 0xd49   :  { %4910 = vmatpush.bf16.msrb.mxu1 %v6718_v58  ;;  %4602 = vmatpush.bf16.msrb.mxu2 %v6570_v8  ;;  %v7232_v14 = vld [vmem:[#allocation2 + $0x204] sm:$0xf]  ;;  %v6767_v58 = vld [vmem:[#allocation2 + $0x210] sm:$0xf0]  ;;  %v6881_v55 = vld [vmem:[#allocation2 + $0x2e0] sm:$0xf]  ;;  %v4966_v48 = vsel %vm4335_vm10, %v4965_v49, %v4964_v11  ;;  %v6754_v25 = vor.u32 %v7231_v47, %v6753_v27  ;;  %v6766_v23 = vor.u32 %v7234_v30, %v6765_v38 }
 0xd4a   :  { %v7260_v51 = vld [vmem:[#allocation2 + $0x2e4] sm:$0xf]  ;;  %v6883_v4 = vld [vmem:[#allocation2 + $0x2f0] sm:$0xf0]  ;;  %v7225_v0 = vld [vmem:[#allocation2 + $0x1cc] sm:$0xf]  ;;  %v6770_v46 = vor.u32 %v7232_v14, %v6767_v58  ;;  %v4968_v20 = vsel %vm4338_vm11, %v4967_v36, %v4966_v48 }
 0xd4b   :  { %4615 = vmatpush.bf16.msrb.mxu3 %v6574_v34  ;;  %4898 = vmatpush.bf16.msrb.mxu0 %v6698_v50  ;;  %v6642_v34 = vor.u32 %v7201_v37, %v6639_v16  ;;  %v6739_v22 = vld [vmem:[#allocation2 + $0x1d8] sm:$0xf0]  ;;  %v6737_v8 = vld [vmem:[#allocation2 + $0x1c8] sm:$0xf]  ;;  %v7227_v50 = vld [vmem:[#allocation2 + $0x1d4] sm:$0xf0] }
 0xd4c   :  { %6625 = vmatmul.msk.bf16.vlgmr.msrb.gmra.mxu2 %vm334_vm0, %v9406_v59  ;;  %v6742_v21 = vor.u32 %v7225_v0, %v6739_v22  ;;  %v6738_v19 = vor.u32 %v7227_v50, %v6737_v8  ;;  %v7256_v13 = vld [vmem:[#allocation2 + $0x2c4] sm:$0xf]  ;;  %v6867_v60 = vld [vmem:[#allocation2 + $0x2d0] sm:$0xf0]  ;;  %v6723_v15 = vld [vmem:[#allocation2 + $0x1b8] sm:$0xf0] }
 0xd4d   :  { %4911 = vmatpush.bf16.msrb.mxu1 %v6702_v41  ;;  %4758 = vmatpush.bf16.msra.mxu2 %v6686_v62  ;;  %v4969_v41 = vrot.slane %v9384_v42, 1  ;;  %v6870_v3 = vor.u32 %v7256_v13, %v6867_v60  ;;  %v6721_v32 = vld [vmem:[#allocation2 + $0x1a8] sm:$0xf]  ;;  %v7223_v5 = vld [vmem:[#allocation2 + $0x1b4] sm:$0xf0]  ;;  %v5128_v47 = vrot.slane %v9378_v40, 5 }
 0xd4e   :  { %6626 = vmatmul.msk.bf16.vlgmr.msrb.gmra.mxu3 %vm334_vm0, %v9406_v59  ;;  %6759 = vmatmul.msk.bf16.vlgmr.msrb.gmra.mxu0 %vm334_vm0, %v9440_v10  ;;  %v6786_v59 = vor.u32 %v7236_v1, %v6783_v52  ;;  %v6849_v57 = vld [vmem:[#allocation2 + $0x2a0] sm:$0xf]  ;;  %v7254_v9 = vld [vmem:[#allocation2 + $0x2ac] sm:$0xf0]  ;;  %v7217_v1 = vld [vmem:[#allocation2 + $0x18c] sm:$0xf] }
 0xd4f   :  { %4771 = vmatpush.bf16.msra.mxu3 %v6690_v26  ;;  %5059 = vmatpush.bf16.msra.mxu0 %v6814_v35  ;;  %v7262_v26 = vld [vmem:[#allocation2 + $0x2ec] sm:$0xf0]  ;;  %v6886_v35 = vor.u32 %v7260_v51, %v6883_v4  ;;  %v4970_v18 = vsel %vm4341_vm12, %v4969_v41, %v4968_v20  ;;  %v6707_v52 = vld [vmem:[#allocation2 + $0x198] sm:$0xf0]  ;;  %v6705_v37 = vld [vmem:[#allocation2 + $0x188] sm:$0xf]  ;;  %v6850_v44 = vor.u32 %v7254_v9, %v6849_v57 }
 0xd50   :  { %6760 = vmatmul.msk.bf16.vlgmr.msrb.gmra.mxu1 %vm334_vm0, %v9440_v10  ;;  %v6882_v62 = vor.u32 %v7262_v26, %v6881_v55  ;;  %v9457_v24 = vpack.c.b16 %v4970_v18, %v4970_v18  ;;  %v7219_v16 = vld [vmem:[#allocation2 + $0x194] sm:$0xf0]  ;;  %v6833_v17 = vld [vmem:[#allocation2 + $0x280] sm:$0xf]  ;;  %v7250_v11 = vld [vmem:[#allocation2 + $0x28c] sm:$0xf0]  ;;  %v6710_v58 = vor.u32 %v7217_v1, %v6707_v52 }
 0xd51   :  { %5072 = vmatpush.bf16.msra.mxu1 %v6818_v63  ;;  %4759 = vmatpush.bf16.msra.mxu2 %v6670_v28  ;;  %v6865_v63 = vld [vmem:[#allocation2 + $0x2c0] sm:$0xf]  ;;  %v7221_v28 = vld [vmem:[#allocation2 + $0x1ac] sm:$0xf]  ;;  %v7248_v49 = vld [vmem:[#allocation2 + $0x284] sm:$0xf]  ;;  %v6834_v55 = vor.u32 %v7250_v11, %v6833_v17 }
 0xd52   :  { %v6835_v38 = vld [vmem:[#allocation2 + $0x290] sm:$0xf0]  ;;  %v7245_v31 = vld [vmem:[#allocation2 + $0x26c] sm:$0xf]  ;;  %v6823_v27 = vld [vmem:[#allocation2 + $0x278] sm:$0xf0] }
 0xd53   :  { %4772 = vmatpush.bf16.msra.mxu3 %v6674_v56  ;;  %5060 = vmatpush.bf16.msra.mxu0 %v6798_v53  ;;  %v7258_v56 = vld [vmem:[#allocation2 + $0x2cc] sm:$0xf0]  ;;  %v7252_v53 = vld [vmem:[#allocation2 + $0x2a4] sm:$0xf]  ;;  %v7247_v30 = vld [vmem:[#allocation2 + $0x274] sm:$0xf0]  ;;  %v6838_v26 = vor.u32 %v7248_v49, %v6835_v38  ;;  %v6826_v48 = vor.u32 %v7245_v31, %v6823_v27 }
 0xd54   :  { %v6866_v45 = vor.u32 %v7258_v56, %v6865_v63  ;;  %v6949_v14 = vld [vmem:[#allocation2 + $0x360] sm:$0xf]  ;;  %v6951_v36 = vld [vmem:[#allocation2 + $0x370] sm:$0xf0]  ;;  %v5133_v51 = vrot.slane %v9384_v42, 2  ;;  %v5292_v31 = vrot.slane %v9378_v40, 6 }
 0xd55   :  { %5073 = vmatpush.bf16.msra.mxu1 %v6802_v33  ;;  %4760 = vmatpush.bf16.msra.mxu2 %v6654_v61  ;;  %v6851_v33 = vld [vmem:[#allocation2 + $0x2b0] sm:$0xf0]  ;;  %v6722_v61 = vor.u32 %v7223_v5, %v6721_v32  ;;  %v7241_v0 = vld [vmem:[#allocation2 + $0x24c] sm:$0xf]  ;;  %v6807_v22 = vld [vmem:[#allocation2 + $0x258] sm:$0xf0] }
 0xd56   :  { %v6854_v54 = vor.u32 %v7252_v53, %v6851_v33  ;;  %v6933_v41 = vld [vmem:[#allocation2 + $0x340] sm:$0xf]  ;;  %v7274_v20 = vld [vmem:[#allocation2 + $0x34c] sm:$0xf0]  ;;  %v7237_v18 = vld [vmem:[#allocation2 + $0x22c] sm:$0xf] }
 0xd57   :  { %4773 = vmatpush.bf16.msra.mxu3 %v6658_v29  ;;  %5061 = vmatpush.bf16.msra.mxu0 %v6782_v2  ;;  %v6726_v29 = vor.u32 %v7221_v28, %v6723_v15  ;;  %v5129_v2 = vrot.slane %v9380_v7, 4  ;;  %v6934_v56 = vor.u32 %v7274_v20, %v6933_v41  ;;  %v6791_v28 = vld [vmem:[#allocation2 + $0x238] sm:$0xf0]  ;;  %v6789_v15 = vld [vmem:[#allocation2 + $0x228] sm:$0xf]  ;;  %v5293_v27 = vrot.slane %v9380_v7, 5 }
 0xd58   :  { %v7270_v32 = vld [vmem:[#allocation2 + $0x32c] sm:$0xf0]  ;;  %v7268_v5 = vld [vmem:[#allocation2 + $0x324] sm:$0xf]  ;;  %v6919_v57 = vld [vmem:[#allocation2 + $0x330] sm:$0xf0]  ;;  %v6794_v1 = vor.u32 %v7237_v18, %v6791_v28 }
 0xd59   :  { %5074 = vmatpush.bf16.msra.mxu1 %v6786_v59  ;;  %4761 = vmatpush.bf16.msra.mxu2 %v6638_v43  ;;  %v6821_v59 = vld [vmem:[#allocation2 + $0x268] sm:$0xf]  ;;  %v7276_v43 = vld [vmem:[#allocation2 + $0x364] sm:$0xf]  ;;  %v7233_v53 = vld [vmem:[#allocation2 + $0x20c] sm:$0xf]  ;;  %v6922_v17 = vor.u32 %v7268_v5, %v6919_v57 }
 0xd5a   :  { %v6822_v4 = vor.u32 %v7247_v30, %v6821_v59  ;;  %v6954_v50 = vor.u32 %v7276_v43, %v6951_v36  ;;  %v6775_v33 = vld [vmem:[#allocation2 + $0x218] sm:$0xf0]  ;;  %v6903_v11 = vld [vmem:[#allocation2 + $0x310] sm:$0xf0]  ;;  %v7261_v49 = vld [vmem:[#allocation2 + $0x2ec] sm:$0xf] }
 0xd5b   :  { %4774 = vmatpush.bf16.msra.mxu3 %v6642_v34  ;;  %5062 = vmatpush.bf16.msra.mxu0 %v6766_v23  ;;  %v6706_v34 = vor.u32 %v7219_v16, %v6705_v37  ;;  %v6805_v23 = vld [vmem:[#allocation2 + $0x248] sm:$0xf]  ;;  %v6901_v37 = vld [vmem:[#allocation2 + $0x300] sm:$0xf]  ;;  %v6891_v38 = vld [vmem:[#allocation2 + $0x2f8] sm:$0xf0]  ;;  %v6778_v30 = vor.u32 %v7233_v53, %v6775_v33 }
 0xd5c   :  { %6693 = vmatmul.msk.bf16.vlgmr.msra.gmra.mxu2 %vm334_vm0, %v9423_v6  ;;  %v7017_v59 = vld [vmem:[#allocation2 + $0x3e0] sm:$0xf]  ;;  %v5295_v36 = vrot.slane %v9382_v12, 4  ;;  %v7003_v41 = vld [vmem:[#allocation2 + $0x3d0] sm:$0xf0] }
 0xd5d   :  { %4921 = vmatpush.bf16.msrb.mxu2 %v6754_v25  ;;  %5075 = vmatpush.bf16.msra.mxu1 %v6770_v46  ;;  %v5130_v25 = vsel %vm4335_vm10, %v5129_v2, %v5128_v47  ;;  %v7243_v46 = vld [vmem:[#allocation2 + $0x254] sm:$0xf0]  ;;  %v6889_v47 = vld [vmem:[#allocation2 + $0x2e8] sm:$0xf]  ;;  %v6985_v28 = vld [vmem:[#allocation2 + $0x3a0] sm:$0xf] }
 0xd5e   :  { %6694 = vmatmul.msk.bf16.vlgmr.msra.gmra.mxu3 %vm334_vm0, %v9423_v6  ;;  %6827 = vmatmul.msk.bf16.vlgmr.msra.gmra.mxu0 %vm334_vm0, %v9457_v24  ;;  %v7278_v6 = vld [vmem:[#allocation2 + $0x36c] sm:$0xf0]  ;;  %v7263_v2 = vld [vmem:[#allocation2 + $0x2f4] sm:$0xf0]  ;;  %v7249_v5 = vld [vmem:[#allocation2 + $0x28c] sm:$0xf] }
 0xd5f   :  { %4934 = vmatpush.bf16.msrb.mxu3 %v6758_v39  ;;  %5223 = vmatpush.bf16.msrb.mxu0 %v6882_v62  ;;  %v5131_v39 = vrot.slane %v9382_v12, 3  ;;  %v6950_v8 = vor.u32 %v7278_v6, %v6949_v14  ;;  %v7272_v62 = vld [vmem:[#allocation2 + $0x344] sm:$0xf]  ;;  %v7255_v18 = vld [vmem:[#allocation2 + $0x2b4] sm:$0xf0] }
 0xd60   :  { %6828 = vmatmul.msk.bf16.vlgmr.msra.gmra.mxu1 %vm334_vm0, %v9457_v24  ;;  %v6843_v33 = vld [vmem:[#allocation2 + $0x298] sm:$0xf0] }
 0xd61   :  { %5236 = vmatpush.bf16.msrb.mxu1 %v6886_v35  ;;  %4922 = vmatpush.bf16.msrb.mxu2 %v6738_v19  ;;  %v6935_v35 = vld [vmem:[#allocation2 + $0x350] sm:$0xf0]  ;;  %v5132_v63 = vsel %vm4338_vm11, %v5131_v39, %v5130_v25  ;;  %v6806_v19 = vor.u32 %v7243_v46, %v6805_v23  ;;  %v5297_v39 = vrot.slane %v9384_v42, 3  ;;  %v7257_v25 = vld [vmem:[#allocation2 + $0x2cc] sm:$0xf] }
 0xd62   :  { %v6938_v13 = vor.u32 %v7272_v62, %v6935_v35  ;;  %v5134_v60 = vsel %vm4341_vm12, %v5133_v51, %v5132_v63  ;;  %v6875_v51 = vld [vmem:[#allocation2 + $0x2d8] sm:$0xf0]  ;;  %v7290_v23 = vld [vmem:[#allocation2 + $0x3cc] sm:$0xf0]  ;;  %v7288_v46 = vld [vmem:[#allocation2 + $0x3c4] sm:$0xf] }
 0xd63   :  { %4935 = vmatpush.bf16.msrb.mxu3 %v6742_v21  ;;  %5224 = vmatpush.bf16.msrb.mxu0 %v6866_v45  ;;  %v6810_v21 = vor.u32 %v7241_v0, %v6807_v22  ;;  %v7239_v45 = vld [vmem:[#allocation2 + $0x234] sm:$0xf0]  ;;  %v9474_v9 = vpack.c.b16 %v5134_v60, %v5134_v60  ;;  %v6873_v22 = vld [vmem:[#allocation2 + $0x2c8] sm:$0xf]  ;;  %v6878_v62 = vor.u32 %v7257_v25, %v6875_v51 }
 0xd64   :  { %v6790_v52 = vor.u32 %v7239_v45, %v6789_v15  ;;  %v6857_v60 = vld [vmem:[#allocation2 + $0x2a8] sm:$0xf]  ;;  %v7286_v15 = vld [vmem:[#allocation2 + $0x3ac] sm:$0xf0]  ;;  %v7284_v45 = vld [vmem:[#allocation2 + $0x3a4] sm:$0xf] }
 0xd65   :  { %5237 = vmatpush.bf16.msrb.mxu1 %v6870_v3  ;;  %4923 = vmatpush.bf16.msrb.mxu2 %v6722_v61  ;;  %v6917_v3 = vld [vmem:[#allocation2 + $0x320] sm:$0xf]  ;;  %v7235_v61 = vld [vmem:[#allocation2 + $0x214] sm:$0xf0]  ;;  %v6858_v53 = vor.u32 %v7255_v18, %v6857_v60  ;;  %v6925_v25 = vld [vmem:[#allocation2 + $0x328] sm:$0xf] }
 0xd66   :  { %v6918_v16 = vor.u32 %v7270_v32, %v6917_v3  ;;  %v6987_v3 = vld [vmem:[#allocation2 + $0x3b0] sm:$0xf0]  ;;  %v7271_v51 = vld [vmem:[#allocation2 + $0x334] sm:$0xf0]  ;;  %v7009_v60 = vld [vmem:[#allocation2 + $0x3c8] sm:$0xf] }
 0xd67   :  { %4936 = vmatpush.bf16.msrb.mxu3 %v6726_v29  ;;  %5225 = vmatpush.bf16.msrb.mxu0 %v6850_v44  ;;  %v6773_v29 = vld [vmem:[#allocation2 + $0x208] sm:$0xf]  ;;  %v7266_v44 = vld [vmem:[#allocation2 + $0x30c] sm:$0xf0]  ;;  %v7291_v18 = vld [vmem:[#allocation2 + $0x3d4] sm:$0xf0] }
 0xd68   :  { %v6774_v14 = vor.u32 %v7235_v61, %v6773_v29  ;;  %v6902_v6 = vor.u32 %v7266_v44, %v6901_v37  ;;  %v6986_v29 = vor.u32 %v7286_v15, %v6985_v28  ;;  %v6990_v61 = vor.u32 %v7284_v45, %v6987_v3  ;;  %v6969_v37 = vld [vmem:[#allocation2 + $0x380] sm:$0xf]  ;;  %v6971_v44 = vld [vmem:[#allocation2 + $0x390] sm:$0xf0]  ;;  %v7285_v15 = vld [vmem:[#allocation2 + $0x3ac] sm:$0xf] }
 0xd69   :  { %5238 = vmatpush.bf16.msrb.mxu1 %v6854_v54  ;;  %4924 = vmatpush.bf16.msrb.mxu2 %v6706_v34  ;;  %v7264_v54 = vld [vmem:[#allocation2 + $0x304] sm:$0xf]  ;;  %v7019_v34 = vld [vmem:[#allocation2 + $0x3f0] sm:$0xf0]  ;;  %v7010_v28 = vor.u32 %v7291_v18, %v7009_v60  ;;  %v6995_v45 = vld [vmem:[#allocation2 + $0x3b8] sm:$0xf0] }
 0xd6a   :  { %v6906_v43 = vor.u32 %v7264_v54, %v6903_v11  ;;  %v7277_v54 = vld [vmem:[#allocation2 + $0x36c] sm:$0xf]  ;;  %v5456_v11 = vrot.slane %v9378_v40, 7  ;;  %v5459_v40 = vrot.slane %v9382_v12, 5  ;;  %v6993_v3 = vld [vmem:[#allocation2 + $0x3a8] sm:$0xf] }
 0xd6b   :  { %4937 = vmatpush.bf16.msrb.mxu3 %v6710_v58  ;;  %5226 = vmatpush.bf16.msrb.mxu0 %v6834_v55  ;;  %v7292_v58 = vld [vmem:[#allocation2 + $0x3e4] sm:$0xf]  ;;  %v6894_v55 = vor.u32 %v7261_v49, %v6891_v38  ;;  %v5457_v49 = vrot.slane %v9380_v7, 6  ;;  %v6959_v38 = vld [vmem:[#allocation2 + $0x378] sm:$0xf0] }
 0xd6c   :  { %6761 = vmatmul.msk.bf16.vlgmr.msrb.gmra.mxu2 %vm334_vm0, %v9440_v10  ;;  %v7022_v0 = vor.u32 %v7292_v58, %v7019_v34  ;;  %v6962_v7 = vor.u32 %v7277_v54, %v6959_v38  ;;  %v6943_v58 = vld [vmem:[#allocation2 + $0x358] sm:$0xf0]  ;;  %v6941_v34 = vld [vmem:[#allocation2 + $0x348] sm:$0xf] }
 0xd6d   :  { %5239 = vmatpush.bf16.msrb.mxu1 %v6838_v26  ;;  %5085 = vmatpush.bf16.msra.mxu2 %v6822_v4  ;;  %v5294_v26 = vsel %vm4335_vm10, %v5293_v27, %v5292_v31  ;;  %v6957_v31 = vld [vmem:[#allocation2 + $0x368] sm:$0xf]  ;;  %v7279_v27 = vld [vmem:[#allocation2 + $0x374] sm:$0xf0] }
 0xd6e   :  { %6762 = vmatmul.msk.bf16.vlgmr.msrb.gmra.mxu3 %vm334_vm0, %v9440_v10  ;;  %6895 = vmatmul.msk.bf16.vlgmr.msrb.gmra.mxu0 %vm334_vm0, %v9474_v9  ;;  %v7294_v10 = vld [vmem:[#allocation2 + $0x3ec] sm:$0xf0]  ;;  %v5296_v20 = vsel %vm4338_vm11, %v5295_v36, %v5294_v26 }
 0xd6f   :  { %5098 = vmatpush.bf16.msra.mxu3 %v6826_v48  ;;  %5387 = vmatpush.bf16.msra.mxu0 %v6950_v8  ;;  %v6890_v48 = vor.u32 %v7263_v2, %v6889_v47  ;;  %v7018_v4 = vor.u32 %v7294_v10, %v7017_v59  ;;  %v7259_v8 = vld [vmem:[#allocation2 + $0x2d4] sm:$0xf0]  ;;  %v6846_v47 = vor.u32 %v7249_v5, %v6843_v33  ;;  %v7273_v10 = vld [vmem:[#allocation2 + $0x34c] sm:$0xf] }
 0xd70   :  { %6896 = vmatmul.msk.bf16.vlgmr.msrb.gmra.mxu1 %vm334_vm0, %v9474_v9  ;;  %v6874_v35 = vor.u32 %v7259_v8, %v6873_v22  ;;  %v6926_v22 = vor.u32 %v7271_v51, %v6925_v25  ;;  %v6911_v8 = vld [vmem:[#allocation2 + $0x318] sm:$0xf0]  ;;  %v7287_v5 = vld [vmem:[#allocation2 + $0x3b4] sm:$0xf0]  ;;  %v7281_v33 = vld [vmem:[#allocation2 + $0x38c] sm:$0xf] }
 0xd71   :  { %5400 = vmatpush.bf16.msra.mxu1 %v6954_v50  ;;  %5086 = vmatpush.bf16.msra.mxu2 %v6806_v19  ;;  %v7001_v50 = vld [vmem:[#allocation2 + $0x3c0] sm:$0xf]  ;;  %v5298_v19 = vsel %vm4341_vm12, %v5297_v39, %v5296_v20  ;;  %v7269_v39 = vld [vmem:[#allocation2 + $0x32c] sm:$0xf]  ;;  %v7025_v20 = vld [vmem:[#allocation2 + $0x3e8] sm:$0xf] }
 0xd72   :  { %v7002_v63 = vor.u32 %v7290_v23, %v7001_v50  ;;  %v9491_v32 = vpack.c.b16 %v5298_v19, %v5298_v19  ;;  %v6909_v50 = vld [vmem:[#allocation2 + $0x308] sm:$0xf]  ;;  %v7267_v23 = vld [vmem:[#allocation2 + $0x314] sm:$0xf0] }
 0xd73   :  { %5099 = vmatpush.bf16.msra.mxu3 %v6810_v21  ;;  %5388 = vmatpush.bf16.msra.mxu0 %v6934_v56  ;;  %v7006_v21 = vor.u32 %v7288_v46, %v7003_v41  ;;  %v7253_v56 = vld [vmem:[#allocation2 + $0x2ac] sm:$0xf]  ;;  %v7027_v41 = vld [vmem:[#allocation2 + $0x3f8] sm:$0xf0] }
 0xd74   :  { %v7293_v46 = vld [vmem:[#allocation2 + $0x3ec] sm:$0xf] }
 0xd75   :  { %5401 = vmatpush.bf16.msra.mxu1 %v6938_v13  ;;  %5087 = vmatpush.bf16.msra.mxu2 %v6790_v52  ;;  %v6859_v13 = vld [vmem:[#allocation2 + $0x2b8] sm:$0xf0]  ;;  %v7251_v52 = vld [vmem:[#allocation2 + $0x294] sm:$0xf0] }
 0xd76   :  { %v6862_v57 = vor.u32 %v7253_v56, %v6859_v13  ;;  %v7289_v56 = vld [vmem:[#allocation2 + $0x3cc] sm:$0xf]  ;;  %v7011_v13 = vld [vmem:[#allocation2 + $0x3d8] sm:$0xf0] }
 0xd77   :  { %5100 = vmatpush.bf16.msra.mxu3 %v6794_v1  ;;  %5389 = vmatpush.bf16.msra.mxu0 %v6918_v16  ;;  %v6841_v1 = vld [vmem:[#allocation2 + $0x288] sm:$0xf]  ;;  %v7282_v16 = vld [vmem:[#allocation2 + $0x38c] sm:$0xf0] }
 0xd78   :  { %v6842_v2 = vor.u32 %v7251_v52, %v6841_v1  ;;  %v6979_v1 = vld [vmem:[#allocation2 + $0x398] sm:$0xf0]  ;;  %v6977_v52 = vld [vmem:[#allocation2 + $0x388] sm:$0xf] }
 0xd79   :  { %5402 = vmatpush.bf16.msra.mxu1 %v6922_v17  ;;  %5088 = vmatpush.bf16.msra.mxu2 %v6774_v14  ;;  %v7280_v17 = vld [vmem:[#allocation2 + $0x384] sm:$0xf]  ;;  %v6958_v14 = vor.u32 %v7279_v27, %v6957_v31 }
 0xd7a   :  { %v6974_v59 = vor.u32 %v7280_v17, %v6971_v44 }
 0xd7b   :  { %5101 = vmatpush.bf16.msra.mxu3 %v6778_v30  ;;  %5390 = vmatpush.bf16.msra.mxu0 %v6902_v6  ;;  %v5458_v30 = vsel %vm4335_vm10, %v5457_v49, %v5456_v11  ;;  %v7275_v6 = vld [vmem:[#allocation2 + $0x354] sm:$0xf0] }
 0xd7c   :  { %6829 = vmatmul.msk.bf16.vlgmr.msra.gmra.mxu2 %vm334_vm0, %v9457_v24  ;;  %v5460_v36 = vsel %vm4338_vm11, %v5459_v40, %v5458_v30  ;;  %v6942_v12 = vor.u32 %v7275_v6, %v6941_v34 }
 0xd7d   :  { %5403 = vmatpush.bf16.msra.mxu1 %v6906_v43  ;;  %5249 = vmatpush.bf16.msrb.mxu2 %v6890_v48  ;;  %v5461_v43 = vrot.slane %v9384_v42, 4  ;;  %v6927_v48 = vld [vmem:[#allocation2 + $0x338] sm:$0xf0]  ;;  %v7265_v42 = vld [vmem:[#allocation2 + $0x30c] sm:$0xf] }
 0xd7e   :  { %6830 = vmatmul.msk.bf16.vlgmr.msra.gmra.mxu3 %vm334_vm0, %v9457_v24  ;;  %6963 = vmatmul.msk.bf16.vlgmr.msra.gmra.mxu0 %vm334_vm0, %v9491_v32  ;;  %v6970_v24 = vor.u32 %v7282_v16, %v6969_v37 }
 0xd7f   :  { %5262 = vmatpush.bf16.msrb.mxu3 %v6894_v55  ;;  %5551 = vmatpush.bf16.msrb.mxu0 %v7018_v4  ;;  %v6946_v55 = vor.u32 %v7273_v10, %v6943_v58  ;;  %v5462_v26 = vsel %vm4341_vm12, %v5461_v43, %v5460_v36 }
 0xd80   :  { %6964 = vmatmul.msk.bf16.vlgmr.msra.gmra.mxu1 %vm334_vm0, %v9491_v32  ;;  %v5463_v4 = vpack.c.b16 %v5462_v26, %v5462_v26 }
 0xd81   :  { %5564 = vmatpush.bf16.msrb.mxu1 %v7022_v0  ;;  %5250 = vmatpush.bf16.msrb.mxu2 %v6874_v35  ;;  %v6930_v0 = vor.u32 %v7269_v39, %v6927_v48  ;;  %v6914_v35 = vor.u32 %v7265_v42, %v6911_v8 }
 0xd83   :  { %5263 = vmatpush.bf16.msrb.mxu3 %v6878_v62  ;;  %5552 = vmatpush.bf16.msrb.mxu0 %v7002_v63  ;;  %v7295_v62 = vld [vmem:[#allocation2 + $0x3f4] sm:$0xf0]  ;;  %v6910_v63 = vor.u32 %v7267_v23, %v6909_v50 }
 0xd84   :  { %v7026_v19 = vor.u32 %v7295_v62, %v7025_v20 }
 0xd85   :  { %5565 = vmatpush.bf16.msrb.mxu1 %v7006_v21  ;;  %5251 = vmatpush.bf16.msrb.mxu2 %v6858_v53  ;;  %v7030_v21 = vor.u32 %v7293_v46, %v7027_v41  ;;  %v6994_v53 = vor.u32 %v7287_v5, %v6993_v3 }
 0xd87   :  { %5264 = vmatpush.bf16.msrb.mxu3 %v6862_v57  ;;  %5553 = vmatpush.bf16.msrb.mxu0 %v6986_v29  ;;  %v6998_v57 = vor.u32 %v7285_v15, %v6995_v45  ;;  %v7283_v29 = vld [vmem:[#allocation2 + $0x394] sm:$0xf0] }
 0xd88   :  { %v6978_v37 = vor.u32 %v7283_v29, %v6977_v52 }
 0xd89   :  { %5566 = vmatpush.bf16.msrb.mxu1 %v6990_v61  ;;  %5252 = vmatpush.bf16.msrb.mxu2 %v6842_v2  ;;  %v6982_v61 = vor.u32 %v7281_v33, %v6979_v1  ;;  %v9533_v33 = vld [vmem:[%s9567_s9] sm:$0xf] }
 0xd8b   :  { %5265 = vmatpush.bf16.msrb.mxu3 %v6846_v47  ;;  %5554 = vmatpush.bf16.msrb.mxu0 %v6970_v24 }
 0xd8c   :  { %6897 = vmatmul.msk.bf16.vlgmr.msrb.gmra.mxu2 %vm334_vm0, %v9474_v9 }
 0xd8d   :  { %5567 = vmatpush.bf16.msrb.mxu1 %v6974_v59  ;;  %5413 = vmatpush.bf16.msra.mxu2 %v6958_v14 }
 0xd8e   :  { %6898 = vmatmul.msk.bf16.vlgmr.msrb.gmra.mxu3 %vm334_vm0, %v9474_v9  ;;  %7031 = vmatmul.msk.bf16.vlgmr.msrb.gmra.mxu0 %vm334_vm0, %v5463_v4  ;;  %v7014_v9 = vor.u32 %v7289_v56, %v7011_v13 }
 0xd8f   :  { %5426 = vmatpush.bf16.msra.mxu3 %v6962_v7 }
 0xd90   :  { %7032 = vmatmul.msk.bf16.vlgmr.msrb.gmra.mxu1 %vm334_vm0, %v5463_v4 }
 0xd91   :  { %5414 = vmatpush.bf16.msra.mxu2 %v6942_v12 }
 0xd93   :  { %5427 = vmatpush.bf16.msra.mxu3 %v6946_v55 }
 0xd95   :  { %5415 = vmatpush.bf16.msra.mxu2 %v6926_v22 }
 0xd97   :  { %5428 = vmatpush.bf16.msra.mxu3 %v6930_v0 }
 0xd99   :  { %5416 = vmatpush.bf16.msra.mxu2 %v6910_v63 }
 0xd9b   :  { %5429 = vmatpush.bf16.msra.mxu3 %v6914_v35 }
 0xd9c   :  { %6965 = vmatmul.msk.bf16.vlgmr.msra.gmra.mxu2 %vm334_vm0, %v9491_v32 }
 0xd9d   :  { %5577 = vmatpush.bf16.msrb.mxu2 %v7026_v19 }
 0xd9e   :  { %6966 = vmatmul.msk.bf16.vlgmr.msra.gmra.mxu3 %vm334_vm0, %v9491_v32 }
 0xd9f   :  { %5590 = vmatpush.bf16.msrb.mxu3 %v7030_v21 }
 0xda1   :  { %5578 = vmatpush.bf16.msrb.mxu2 %v7010_v28 }
 0xda3   :  { %5591 = vmatpush.bf16.msrb.mxu3 %v7014_v9 }
 0xda5   :  { %5579 = vmatpush.bf16.msrb.mxu2 %v6994_v53 }
 0xda7   :  { %5592 = vmatpush.bf16.msrb.mxu3 %v6998_v57 }
 0xda9   :  { %5580 = vmatpush.bf16.msrb.mxu2 %v6978_v37 }
 0xdab   :  { %5593 = vmatpush.bf16.msrb.mxu3 %v6982_v61  ;;  %v4578_v16 = vpop.f32.mrf.mxu0 }
 0xdac   :  { %7033 = vmatmul.msk.bf16.vlgmr.msrb.gmra.mxu2 %vm334_vm0, %v5463_v4 }
 0xdad   :  { %v4591_v17 = vpop.f32.mrf.mxu1 }
 0xdae   :  { %7034 = vmatmul.msk.bf16.vlgmr.msrb.gmra.mxu3 %vm334_vm0, %v5463_v4 }
 0xdaf   :  { %v4436_v44 = vpop.f32.mrf.mxu2 }
 0xdb0   :  { %v4579_v54 = vadd.f32 %v4578_v16, %v4436_v44  ;;  %v5606_v44 = vperm.slane %v9533_v33, 1 }
 0xdb1   :  { %v4449_v11 = vpop.f32.mrf.mxu3 }
 0xdb2   :  { %v4592_v49 = vadd.f32 %v4591_v17, %v4449_v11  ;;  %v5605_v17 = vperm.slane %v9533_v33, 0 }
 0xdb3   :  { %v4580_v38 = vpop.f32.mrf.mxu0 }
 0xdb5   :  { %v4593_v31 = vpop.f32.mrf.mxu1 }
 0xdb7   :  { %v4438_v27 = vpop.f32.mrf.mxu2 }
 0xdb9   :  { %v4451_v47 = vpop.f32.mrf.mxu3 }
 0xdbb   :  { %v4737_v2 = vpop.f32.mrf.mxu0 }
 0xdbc   :  { %v4780_v59 = vadd.f32 %v4737_v2, %v4579_v54 }
 0xdbd   :  { %v4750_v24 = vpop.f32.mrf.mxu1 }
 0xdbe   :  { %v4781_v32 = vadd.f32 %v4750_v24, %v4592_v49 }
 0xdbf   :  { %v4462_v40 = vpop.f32.mrf.mxu2 }
 0xdc1   :  { %v4475_v7 = vpop.f32.mrf.mxu3 }
 0xdc3   :  { %v4739_v30 = vpop.f32.mrf.mxu0 }
 0xdc5   :  { %v4752_v14 = vpop.f32.mrf.mxu1 }
 0xdc7   :  { %v4464_v10 = vpop.f32.mrf.mxu2 }
 0xdc9   :  { %v4477_v58 = vpop.f32.mrf.mxu3 }
 0xdcb   :  { %v4900_v34 = vpop.f32.mrf.mxu0 }
 0xdcc   :  { %v4943_v3 = vadd.f32 %v4900_v34, %v4780_v59 }
 0xdcd   :  { %v4913_v6 = vpop.f32.mrf.mxu1 }
 0xdce   :  { %v4944_v5 = vadd.f32 %v4913_v6, %v4781_v32 }
 0xdcf   :  { %v4604_v43 = vpop.f32.mrf.mxu2 }
 0xdd0   :  { %v4605_v55 = vadd.f32 %v4604_v43, %v4462_v40 }
 0xdd1   :  { %v4617_v36 = vpop.f32.mrf.mxu3 }
 0xdd2   :  { %v4618_v12 = vadd.f32 %v4617_v36, %v4475_v7 }
 0xdd3   :  { %v4902_v26 = vpop.f32.mrf.mxu0 }
 0xdd5   :  { %v4915_v39 = vpop.f32.mrf.mxu1 }
 0xdd7   :  { %v4606_v48 = vpop.f32.mrf.mxu2 }
 0xdd9   :  { %v4619_v25 = vpop.f32.mrf.mxu3 }
 0xddb   :  { %v5064_v51 = vpop.f32.mrf.mxu0 }
 0xddc   :  { %v5107_v57 = vadd.f32 %v5064_v51, %v4943_v3 }
 0xddd   :  { %v5077_v4 = vpop.f32.mrf.mxu1 }
 0xdde   :  { %v5108_v53 = vadd.f32 %v5077_v4, %v4944_v5  ;;  %v5607_v5 = vperm.slane %v9533_v33, 2 }
 0xddf   :  { %v4763_v0 = vpop.f32.mrf.mxu2 }
 0xde0   :  { %v9520_v42 = vadd.f32 %v4763_v0, %v4605_v55 }
 0xde1   :  { %v4776_v22 = vpop.f32.mrf.mxu3 }
 0xde2   :  { %v9522_v8 = vadd.f32 %v4776_v22, %v4618_v12 }
 0xde3   :  { %v5066_v50 = vpop.f32.mrf.mxu0 }
 0xde5   :  { %v5079_v23 = vpop.f32.mrf.mxu1 }
 0xde7   :  { %v4765_v46 = vpop.f32.mrf.mxu2 }
 0xde9   :  { %v4778_v41 = vpop.f32.mrf.mxu3 }
 0xdeb   :  { %v5228_v20 = vpop.f32.mrf.mxu0 }
 0xdec   :  { %v5271_v1 = vadd.f32 %v5228_v20, %v5107_v57 }
 0xded   :  { %v5241_v62 = vpop.f32.mrf.mxu1 }
 0xdee   :  { %v5272_v52 = vadd.f32 %v5241_v62, %v5108_v53 }
 0xdef   :  { %v4926_v35 = vpop.f32.mrf.mxu2 }
 0xdf0   :  { %v4945_v22 = vadd.f32 %v4926_v35, %v9520_v42 }
 0xdf1   :  { %v9524_v63 = vpop.f32.mrf.mxu3 }
 0xdf2   :  { %v4946_v20 = vadd.f32 %v9524_v63, %v9522_v8 }
 0xdf3   :  { %v5230_v21 = vpop.f32.mrf.mxu0 }
 0xdf5   :  { %v5243_v19 = vpop.f32.mrf.mxu1 }
 0xdf7   :  { %v4928_v56 = vpop.f32.mrf.mxu2 }
 0xdf9   :  { %v4941_v13 = vpop.f32.mrf.mxu3 }
 0xdfb   :  { %v5392_v60 = vpop.f32.mrf.mxu0 }
 0xdfc   :  { %v5435_v37 = vadd.f32 %v5392_v60, %v5271_v1 }
 0xdfd   :  { %v5405_v18 = vpop.f32.mrf.mxu1 }
 0xdfe   :  { %v5436_v16 = vadd.f32 %v5405_v18, %v5272_v52 }
 0xdff   :  { %v9526_v9 = vpop.f32.mrf.mxu2 }
 0xe00   :  { %v5109_v56 = vadd.f32 %v9526_v9, %v4945_v22 }
 0xe01   :  { %v9528_v28 = vpop.f32.mrf.mxu3 }
 0xe02   :  { %v5110_v42 = vadd.f32 %v9528_v28, %v4946_v20  ;;  %v5608_v28 = vperm.slane %v9533_v33, 3 }
 0xe03   :  { %v5394_v15 = vpop.f32.mrf.mxu0 }
 0xe05   :  { %v5407_v45 = vpop.f32.mrf.mxu1 }
 0xe07   :  { %v5092_v29 = vpop.f32.mrf.mxu2 }
 0xe09   :  { %v5105_v61 = vpop.f32.mrf.mxu3 }
 0xe0b   :  { %v5556_v54 = vpop.f32.mrf.mxu0 }
 0xe0c   :  { %v5599_v49 = vadd.f32 %v5556_v54, %v5435_v37 }
 0xe0d   :  { %v5569_v11 = vpop.f32.mrf.mxu1 }
 0xe0e   :  { %v5600_v38 = vadd.f32 %v5569_v11, %v5436_v16  ;;  %v5613_v31 = vadd.f32 %v5605_v17, %v5599_v49 }
 0xe0f   :  { %v5254_v24 = vpop.f32.mrf.mxu2 }
 0xe10   :  { %v5614_v27 = vadd.f32 %v5606_v44, %v5600_v38  ;;  %v7035_v47 = vmul.f32 -1.442695, %v5613_v31  ;;  %v5273_v15 = vadd.f32 %v5254_v24, %v5109_v56 }
 0xe11   :  { %v5267_v59 = vpop.f32.mrf.mxu3 }
 0xe12   :  { %v7036_v2 = vmul.f32 -1.442695, %v5614_v27  ;;  %7492 = vpow2.f32 %v7035_v47  ;;  %v5274_v45 = vadd.f32 %v5267_v59, %v5110_v42 }
 0xe13   :  { %v5558_v40 = vpop.f32.mrf.mxu0 }
 0xe14   :  { %7494 = vpow2.f32 %v7036_v2 }
 0xe15   :  { %v5571_v32 = vpop.f32.mrf.mxu1 }
 0xe17   :  { %v5256_v30 = vpop.f32.mrf.mxu2 }
 0xe18   :  { %v7493_v7 = vpop.eup %7492 }
 0xe19   :  { %v5269_v14 = vpop.f32.mrf.mxu3  ;;  %v5629_v58 = vadd.f32 1.0, %v7493_v7 }
 0xe1a   :  { %v7495_v10 = vpop.eup %7494 }
 0xe1b   :  { %v5630_v34 = vadd.f32 1.0, %v7495_v10  ;;  %7496 = vrcp.f32 %v5629_v58  ;;  %vm5638_vm14 = vweird.f32 %v5629_v58  ;;  %v5644_v23 = vand.u32 2147483648, %v5629_v58 }
 0xe1c   :  { %v5642_v21 = vand.u32 2147483647, %v5629_v58 }
 0xe1d   :  { %7498 = vrcp.f32 %v5630_v34  ;;  %v5659_v51 = vand.u32 2147483648, %v5630_v34  ;;  %v5657_v0 = vand.u32 2147483647, %v5630_v34  ;;  %vm5653_vm2 = vweird.f32 %v5630_v34 }
 0xe1e   :  { %v5645_v18 = vor.u32 1.1754944e-38, %v5644_v23  ;;  %vm5643_vm5 = vcmp.eq.f32.partialorder %v5642_v21, 8.507059e+37 }
 0xe1f   :  { %v5418_v6 = vpop.f32.mrf.mxu2  ;;  %v5660_v13 = vor.u32 1.1754944e-38, %v5659_v51  ;;  %vm5658_vm4 = vcmp.eq.f32.partialorder %v5657_v0, 8.507059e+37 }
 0xe20   :  { %v5437_v57 = vadd.f32 %v5418_v6, %v5273_v15 }
 0xe21   :  { %v5431_v43 = vpop.f32.mrf.mxu3  ;;  %v7497_v36 = vpop.eup %7496 }
 0xe22   :  { %v5634_v12 = vmul.f32 %v7497_v36, %v5629_v58  ;;  %vm5639_vm0 = vweird.f32 %v7497_v36  ;;  %v5438_v53 = vadd.f32 %v5431_v43, %v5274_v45 }
 0xe23   :  { %v7499_v55 = vpop.eup %7498  ;;  %vm9540_vm1 = vmor %vm5638_vm14, %vm5639_vm0 }
 0xe24   :  { %v5649_v26 = vmul.f32 %v7499_v55, %v5630_v34  ;;  %v5635_v39 = vsub.f32 1.0, %v5634_v12  ;;  %vm5654_vm13 = vweird.f32 %v7499_v55 }
 0xe25   :  { %vm5655_vm3 = vmor %vm5653_vm2, %vm5654_vm13 }
 0xe26   :  { %v5650_v48 = vsub.f32 1.0, %v5649_v26  ;;  %v5636_v25 = vmul.f32 %v7497_v36, %v5635_v39 }
 0xe27   :  { %v5420_v46 = vpop.f32.mrf.mxu2 }
 0xe28   :  { %v5651_v4 = vmul.f32 %v7499_v55, %v5650_v48  ;;  %v5637_v50 = vadd.f32 %v7497_v36, %v5636_v25 }
 0xe29   :  { %v5433_v41 = vpop.f32.mrf.mxu3 }
 0xe2a   :  { %v5652_v19 = vadd.f32 %v7499_v55, %v5651_v4  ;;  %v5641_v35 = vsel %vm9540_vm1, %v7497_v36, %v5637_v50 }
 0xe2b   :  { %v5646_v3 = vsel %vm5643_vm5, %v5645_v18, %v5641_v35 }
 0xe2c   :  { %v5656_v60 = vsel %vm5655_vm3, %v7499_v55, %v5652_v19 }
 0xe2d   :  { %v5661_v8 = vsel %vm5658_vm4, %v5660_v13, %v5656_v60 }
 0xe2e   :  { %v5697_v63 = vrot.slane %v5661_v8, 4 }
 0xe2f   :  { %v5582_v1 = vpop.f32.mrf.mxu2 }
 0xe30   :  { %v5699_v9 = vsel %vm1592_vm15, %v5646_v3, %v5697_v63  ;;  %v5601_v29 = vadd.f32 %v5582_v1, %v5437_v57 }
 0xe31   :  { %5703 = vst [vmem:[%s9569_s11] sm:$0xff] %v5699_v9  ;;  %v5595_v52 = vpop.f32.mrf.mxu3 }
 0xe32   :  { %v5602_v61 = vadd.f32 %v5595_v52, %v5438_v53  ;;  %v5615_v37 = vadd.f32 %v5607_v5, %v5601_v29 }
 0xe34   :  { %v5616_v16 = vadd.f32 %v5608_v28, %v5602_v61  ;;  %v7037_v17 = vmul.f32 -1.442695, %v5615_v37 }
 0xe36   :  { %v7038_v44 = vmul.f32 -1.442695, %v5616_v16  ;;  %7500 = vpow2.f32 %v7037_v17 }
 0xe37   :  { %v5584_v54 = vpop.f32.mrf.mxu2 }
 0xe38   :  { %7502 = vpow2.f32 %v7038_v44 }
 0xe39   :  { %v5597_v11 = vpop.f32.mrf.mxu3 }
 0xe3c   :  { %v7501_v49 = vpop.eup %7500 }
 0xe3d   :  { %v5631_v31 = vadd.f32 1.0, %v7501_v49 }
 0xe3e   :  { %v7503_v38 = vpop.eup %7502 }
 0xe3f   :  { %v5632_v33 = vadd.f32 1.0, %v7503_v38  ;;  %7504 = vrcp.f32 %v5631_v31  ;;  %vm5668_vm8 = vweird.f32 %v5631_v31  ;;  %v5674_v58 = vand.u32 2147483648, %v5631_v31 }
 0xe40   :  { %v5672_v34 = vand.u32 2147483647, %v5631_v31 }
 0xe41   :  { %7506 = vrcp.f32 %v5632_v33  ;;  %v5689_v7 = vand.u32 2147483648, %v5632_v33  ;;  %v5687_v14 = vand.u32 2147483647, %v5632_v33  ;;  %vm5683_vm10 = vweird.f32 %v5632_v33 }
 0xe42   :  { %v5675_v12 = vor.u32 1.1754944e-38, %v5674_v58  ;;  %vm5673_vm0 = vcmp.eq.f32.partialorder %v5672_v34, 8.507059e+37 }
 0xe43   :  { %v5690_v43 = vor.u32 1.1754944e-38, %v5689_v7  ;;  %vm5688_vm12 = vcmp.eq.f32.partialorder %v5687_v14, 8.507059e+37 }
 0xe45   :  { %v7505_v27 = vpop.eup %7504 }
 0xe46   :  { %v5664_v2 = vmul.f32 %v7505_v27, %v5631_v31  ;;  %vm5669_vm6 = vweird.f32 %v7505_v27 }
 0xe47   :  { %v7507_v47 = vpop.eup %7506  ;;  %vm5670_vm9 = vmor %vm5668_vm8, %vm5669_vm6 }
 0xe48   :  { %v5679_v24 = vmul.f32 %v7507_v47, %v5632_v33  ;;  %v5665_v59 = vsub.f32 1.0, %v5664_v2  ;;  %vm5684_vm7 = vweird.f32 %v7507_v47 }
 0xe49   :  { %vm5685_vm11 = vmor %vm5683_vm10, %vm5684_vm7 }
 0xe4a   :  { %v5680_v32 = vsub.f32 1.0, %v5679_v24  ;;  %v5666_v40 = vmul.f32 %v7505_v27, %v5665_v59 }
 0xe4c   :  { %v5681_v30 = vmul.f32 %v7507_v47, %v5680_v32  ;;  %v5667_v10 = vadd.f32 %v7505_v27, %v5666_v40 }
 0xe4e   :  { %v5682_v6 = vadd.f32 %v7507_v47, %v5681_v30  ;;  %v5671_v36 = vsel %vm5670_vm9, %v7505_v27, %v5667_v10 }
 0xe4f   :  { %v5676_v48 = vsel %vm5673_vm0, %v5675_v12, %v5671_v36 }
 0xe50   :  { %v5686_v55 = vsel %vm5685_vm11, %v7507_v47, %v5682_v6 }
 0xe51   :  { %v5691_v26 = vsel %vm5688_vm12, %v5690_v43, %v5686_v55 }
 0xe52   :  { %v5698_v39 = vrot.slane %v5691_v26, 4 }
 0xe54   :  { %v5700_v25 = vsel %vm1592_vm15, %v5676_v48, %v5698_v39 }
 0xe55   :  { %5704 = vst [vmem:[%s9569_s11 + $0x8] sm:$0xff] %v5700_v25 }
 0xe56   :  { %5709 = vsyncmov [#allocation3] }
 0xe59   :  { %s5710_s30 = vpop.sfrf %5709 }
 0xe5a   :  { %p7039_p0 = scmp.ne.s32.totalorder %s5710_s30, 0 }
 0xe5c   :  { %5714 = shalt.err (%p7039_p0)  }

</bundles_post_ra>
